<compile_context>
chip_gen: v6e
topology: v6e:2x2x1
jax: 0.10.0
libtpu: 0.0.40
codegen_flags: <defaults>
</compile_context>

<pallas_src>
import functools

import numpy as np
import jax
import jax.numpy as jnp
from jax.experimental import pallas as pl
from jax.experimental.pallas import tpu as pltpu


# ----------------------------------------------------------------------------
# Static model config: VGG16-bn config 'D', features[:43] (final MaxPool
# dropped), channels scaled by 1/16 so the synthetic kernel stays small.
# ----------------------------------------------------------------------------
CFG = [4, 4, "M", 8, 8, "M", 16, 16, 16, "M", 32, 32, 32, "M", 32, 32, 32]
N_CONVS = sum(1 for v in CFG if v != "M")
BN_EPS = 1e-5


# ----------------------------------------------------------------------------
# In-kernel building blocks (traced inline inside the fused kernel).
# Activation layout everywhere: x[(b*H + h), (w*C + c)]  -- f32, lane-dense.
# ----------------------------------------------------------------------------
def _conv3x3_bn_relu(x, g, b, H):
    """3x3 'same' conv + folded-BN bias + ReLU as ONE MXU matmul.

    x: (R, L) f32 with R = B*H, L = W*Cin.
    g: (3*L, Lout) bf16 width-expanded block-banded weight (BN scale and the
       horizontal zero padding are folded into its band structure on the host).
    b: (1, Lout) f32 (conv bias + BN shift, tiled over width).
    """
    R, L = x.shape
    zrow = jnp.zeros((1, L), x.dtype)
    # Row h-1 / h+1 of the SAME image: global row shift + zero the image-border
    # rows (this also wipes the rows that leaked in from the neighbouring image
    # in the stacked batch*row layout).  H is a power of two -> h = r & (H-1).
    up = jnp.concatenate([zrow, x[:R - 1]], axis=0)
    dn = jnp.concatenate([x[1:], zrow], axis=0)
    hh = jax.lax.broadcasted_iota(jnp.int32, (R, L), 0) & (H - 1)
    up = jnp.where(hh == 0, 0.0, up)          # vertical "same" padding (top)
    dn = jnp.where(hh == H - 1, 0.0, dn)      # vertical "same" padding (bottom)
    y = jnp.concatenate([up, x, dn], axis=-1)                   # (R, 3*L)
    out = jnp.dot(y.astype(jnp.bfloat16), g,
                  preferred_element_type=jnp.float32)           # (R, Lout) f32
    return jnp.maximum(out + b, 0.0)          # bias + ReLU, stays f32


def _maxpool2x2(x, W, C):
    """2x2 / stride-2 max pool in the (B*H, W*C) layout.

    Pair-max via shifted copies, then keep even rows / even width-blocks with
    tiny 0/1 selection matmuls (the MXU has plenty of idle slots).
    """
    R, L = x.shape                                              # L = W*C
    m = jnp.maximum(x, jnp.concatenate(
        [x[:, C:], jnp.zeros((R, C), x.dtype)], axis=1))        # width pairs
    m = jnp.maximum(m, jnp.concatenate(
        [m[1:], jnp.zeros((1, L), x.dtype)], axis=0))           # height pairs
    i = jax.lax.broadcasted_iota(jnp.int32, (R // 2, R), 0)
    p = jax.lax.broadcasted_iota(jnp.int32, (R // 2, R), 1)
    rsel = jnp.where(p == 2 * i, 1.0, 0.0)                      # (R//2, R)
    pp = jax.lax.broadcasted_iota(jnp.int32, (L, L // 2), 0)
    q = jax.lax.broadcasted_iota(jnp.int32, (L, L // 2), 1)
    # output lane q = w'*C + c  <-  input lane 2*w'*C + c = 2q - (q mod C)
    csel = jnp.where(pp == 2 * q - (q & (C - 1)), 1.0, 0.0)     # (L, L//2)
    out = jnp.dot(jnp.dot(rsel, m, preferred_element_type=jnp.float32),
                  csel, preferred_element_type=jnp.float32)
    return out                                                  # (R//2, L//2)


# ----------------------------------------------------------------------------
# Fused whole-network kernel (one grid step = one tile of B images)
# ----------------------------------------------------------------------------
def _vgg_fused_kernel(x_ref, *refs, in_channels, width):
    # refs : [g0, b0, g1, b1, ..., g12, b12, wg_cls, out]
    wg_ref = refs[2 * N_CONVS]
    o_ref = refs[2 * N_CONVS + 1]

    B, H0, L0 = x_ref.shape                       # block: (B, H, W*Cin)
    x = x_ref[...].reshape(B * H0, L0)            # (batch*row, width*chan) f32

    h, w, c = H0, width, in_channels
    ci = 0
    for v in CFG:                                 # static python loop (unrolled)
        if v == "M":
            x = _maxpool2x2(x, w, c)
            h //= 2
            w //= 2
        else:
            x = _conv3x3_bn_relu(x, refs[2 * ci][...], refs[2 * ci + 1][...], h)
            c = v
            ci += 1

    # Global average pool + 1x1 conv classifier.  The 1/(Hf*Wf) scale and the
    # width tiling are folded into wg on the host, so this is one matmul plus a
    # tiny per-image row-sum selection matmul.
    Rf = x.shape[0]                               # B * h_final
    logits_rows = jnp.dot(x.astype(jnp.bfloat16), wg_ref[...],
                          preferred_element_type=jnp.float32)   # (Rf, ncls)
    hf = Rf // B
    b_i = jax.lax.broadcasted_iota(jnp.int32, (B, Rf), 0)
    r_i = jax.lax.broadcasted_iota(jnp.int32, (B, Rf), 1)
    usum = jnp.where((r_i >= b_i * hf) & (r_i < (b_i + 1) * hf), 1.0, 0.0)
    logits = jnp.dot(usum, logits_rows, preferred_element_type=jnp.float32)
    ncls = o_ref.shape[-1]
    o_ref[...] = logits.reshape(B, 1, ncls)


# ----------------------------------------------------------------------------
# Parameter init: BN eval-mode + conv bias folded, weights expanded on the host
# into the width-banded (3*W*Cin, W*Cout) form the kernel consumes.
# ----------------------------------------------------------------------------
def init_params(key, in_channels, num_classes, height, width):
    assert height % 16 == 0 and width % 16 == 0, "4 maxpools need /16 spatial"
    assert (height & (height - 1)) == 0 and (width & (width - 1)) == 0, \
        "power-of-two spatial sizes (in-kernel masks use bit tricks)"

    conv_g, conv_b = [], []
    cin, h, w = in_channels, height, width
    for v in CFG:
        if v == "M":
            h //= 2
            w //= 2
            continue
        cout = v
        key, k_w, k_b, k_g, k_beta = jax.random.split(key, 5)
        wgt = 0.1 * jax.random.normal(k_w, (3, 3, cin, cout), jnp.float32)
        conv_bias = 0.1 * jax.random.normal(k_b, (cout,), jnp.float32)
        gamma = 1.0 + 0.1 * jax.random.normal(k_g, (cout,), jnp.float32)
        beta = 0.1 * jax.random.normal(k_beta, (cout,), jnp.float32)
        run_mean = jnp.zeros((cout,), jnp.float32)
        run_var = jnp.ones((cout,), jnp.float32)
        scale = gamma / jnp.sqrt(run_var + BN_EPS)

        wf = np.asarray(wgt * scale[None, None, None, :], np.float32)
        bias = np.asarray((conv_bias - run_mean) * scale + beta, np.float32)

        # Width-expanded block-banded weight: output lane (wo*Cout+co) reads
        # input lane (wi*Cin+c) of the kh-th row tap iff |wi-wo| <= 1.  The
        # horizontal "same" zero padding is implicit in the missing band edges.
        g = np.zeros((3, w, cin, w, cout), np.float32)
        for wo in range(w):
            for kk in range(3):
                wi = wo + kk - 1
                if 0 <= wi < w:
                    g[:, wi, :, wo, :] = wf[:, kk, :, :]
        conv_g.append(jnp.asarray(g.reshape(3 * w * cin, w * cout), jnp.bfloat16))
        conv_b.append(jnp.asarray(np.tile(bias, w).reshape(1, w * cout), jnp.float32))
        cin = cout

    key, k_c = jax.random.split(key)
    # PyTorch classifier weight is (num_classes, Cin, 1, 1), bias=False; stored
    # transposed, tiled over the final width and pre-scaled by the GAP mean.
    w_cls = 0.1 * jax.random.normal(k_c, (cin, num_classes), jnp.float32)
    wg = np.tile(np.asarray(w_cls, np.float32), (w, 1)) / float(h * w)
    return {"conv_g": conv_g, "conv_b": conv_b,
            "cls_wg": jnp.asarray(wg, jnp.bfloat16)}


# ----------------------------------------------------------------------------
# Forward wrapper: one pallas_call for the entire network, batch-tiled grid
# ----------------------------------------------------------------------------
def conv_vgg_forward(x_nchw, params, *, batch_tile=None):
    conv_g, conv_b, wg = params["conv_g"], params["conv_b"], params["cls_wg"]
    N, Cin, H, W = x_nchw.shape
    ncls = wg.shape[-1]

    # NCHW -> (N, H, W*Cin): lane-dense rows, avoids a 128-lane-padded 3-wide
    # channel-minor layout in HBM/VMEM.
    x = jnp.transpose(x_nchw, (0, 2, 3, 1)).reshape(N, H, W * Cin)

    # Batch tile per grid step.  <=8 is VMEM-safe on every generation; raise to
    # ~16 (v7x) / ~32-48 (v5e/v6e) for real batches, keeping >=2 steps per core.
    bt = batch_tile if batch_tile is not None else min(N, 8)
    while N % bt:
        bt -= 1
    grid = (N // bt,)

    in_specs = [pl.BlockSpec((bt, H, W * Cin), lambda n: (n, 0, 0))]
    args = [x]
    for g, b in zip(conv_g, conv_b):
        in_specs.append(pl.BlockSpec(g.shape, lambda n: (0, 0)))
        in_specs.append(pl.BlockSpec(b.shape, lambda n: (0, 0)))
        args += [g, b]
    in_specs.append(pl.BlockSpec(wg.shape, lambda n: (0, 0)))
    args.append(wg)

    kernel = functools.partial(_vgg_fused_kernel, in_channels=Cin, width=W)
    out = pl.pallas_call(
        kernel,
        out_shape=jax.ShapeDtypeStruct((N, 1, ncls), jnp.float32),
        grid=grid,
        in_specs=in_specs,
        out_specs=pl.BlockSpec((bt, 1, ncls), lambda n: (n, 0, 0)),
        compiler_params=pltpu.CompilerParams(
            dimension_semantics=("parallel",)),   # batch tiles across TCs (v7x)
    )(*args)
    return out.reshape(N, ncls)                   # == x.view(-1, num_classes)


# ----------------------------------------------------------------------------
if __name__ == "__main__":
    num_classes = 10
    key = jax.random.PRNGKey(0)
    key, kx = jax.random.split(key)
    x = jax.random.normal(kx, (2, 3, 32, 32), jnp.float32)   # NCHW, like PyTorch
    params = init_params(key, in_channels=3, num_classes=num_classes,
                         height=32, width=32)

    out = jax.jit(conv_vgg_forward)(x, params)
    out = jax.block_until_ready(out)
    assert out.shape == (2, num_classes) and out.dtype == jnp.float32
    assert bool(jnp.all(jnp.isfinite(out)))
    print("KERNEL_OK")
</pallas_src>

<mosaic_0001>
module attributes {stable_mosaic.version = 11 : i64} {
  func.func @_vgg_fused_kernel(%arg0: i32, %arg1: memref<2x32x96xf32, #tpu.memory_space<vmem>>, %arg2: memref<288x128xbf16, #tpu.memory_space<vmem>>, %arg3: memref<1x128xf32, #tpu.memory_space<vmem>>, %arg4: memref<384x128xbf16, #tpu.memory_space<vmem>>, %arg5: memref<1x128xf32, #tpu.memory_space<vmem>>, %arg6: memref<192x128xbf16, #tpu.memory_space<vmem>>, %arg7: memref<1x128xf32, #tpu.memory_space<vmem>>, %arg8: memref<384x128xbf16, #tpu.memory_space<vmem>>, %arg9: memref<1x128xf32, #tpu.memory_space<vmem>>, %arg10: memref<192x128xbf16, #tpu.memory_space<vmem>>, %arg11: memref<1x128xf32, #tpu.memory_space<vmem>>, %arg12: memref<384x128xbf16, #tpu.memory_space<vmem>>, %arg13: memref<1x128xf32, #tpu.memory_space<vmem>>, %arg14: memref<384x128xbf16, #tpu.memory_space<vmem>>, %arg15: memref<1x128xf32, #tpu.memory_space<vmem>>, %arg16: memref<192x128xbf16, #tpu.memory_space<vmem>>, %arg17: memref<1x128xf32, #tpu.memory_space<vmem>>, %arg18: memref<384x128xbf16, #tpu.memory_space<vmem>>, %arg19: memref<1x128xf32, #tpu.memory_space<vmem>>, %arg20: memref<384x128xbf16, #tpu.memory_space<vmem>>, %arg21: memref<1x128xf32, #tpu.memory_space<vmem>>, %arg22: memref<192x64xbf16, #tpu.memory_space<vmem>>, %arg23: memref<1x64xf32, #tpu.memory_space<vmem>>, %arg24: memref<192x64xbf16, #tpu.memory_space<vmem>>, %arg25: memref<1x64xf32, #tpu.memory_space<vmem>>, %arg26: memref<192x64xbf16, #tpu.memory_space<vmem>>, %arg27: memref<1x64xf32, #tpu.memory_space<vmem>>, %arg28: memref<64x10xbf16, #tpu.memory_space<vmem>>, %arg29: memref<2x1x10xf32, #tpu.memory_space<vmem>>) attributes {dimension_semantics = [#tpu.dimension_semantics<parallel>], iteration_bounds = array<i64: 1>, scalar_prefetch = 0 : i64, scratch_operands = 0 : i64, tpu.core_type = #tpu.core_type<tc>, window_params = [{transform_indices = @transform_0, window_bounds = array<i64: 2, 32, 96>}, {pipeline_mode = #tpu.pipeline_mode<synchronous>, transform_indices = @transform_1, window_bounds = array<i64: 288, 128>}, {pipeline_mode = #tpu.pipeline_mode<synchronous>, transform_indices = @transform_2, window_bounds = array<i64: 1, 128>}, {pipeline_mode = #tpu.pipeline_mode<synchronous>, transform_indices = @transform_3, window_bounds = array<i64: 384, 128>}, {pipeline_mode = #tpu.pipeline_mode<synchronous>, transform_indices = @transform_4, window_bounds = array<i64: 1, 128>}, {pipeline_mode = #tpu.pipeline_mode<synchronous>, transform_indices = @transform_5, window_bounds = array<i64: 192, 128>}, {pipeline_mode = #tpu.pipeline_mode<synchronous>, transform_indices = @transform_6, window_bounds = array<i64: 1, 128>}, {pipeline_mode = #tpu.pipeline_mode<synchronous>, transform_indices = @transform_7, window_bounds = array<i64: 384, 128>}, {pipeline_mode = #tpu.pipeline_mode<synchronous>, transform_indices = @transform_8, window_bounds = array<i64: 1, 128>}, {pipeline_mode = #tpu.pipeline_mode<synchronous>, transform_indices = @transform_9, window_bounds = array<i64: 192, 128>}, {pipeline_mode = #tpu.pipeline_mode<synchronous>, transform_indices = @transform_10, window_bounds = array<i64: 1, 128>}, {pipeline_mode = #tpu.pipeline_mode<synchronous>, transform_indices = @transform_11, window_bounds = array<i64: 384, 128>}, {pipeline_mode = #tpu.pipeline_mode<synchronous>, transform_indices = @transform_12, window_bounds = array<i64: 1, 128>}, {pipeline_mode = #tpu.pipeline_mode<synchronous>, transform_indices = @transform_13, window_bounds = array<i64: 384, 128>}, {pipeline_mode = #tpu.pipeline_mode<synchronous>, transform_indices = @transform_14, window_bounds = array<i64: 1, 128>}, {pipeline_mode = #tpu.pipeline_mode<synchronous>, transform_indices = @transform_15, window_bounds = array<i64: 192, 128>}, {pipeline_mode = #tpu.pipeline_mode<synchronous>, transform_indices = @transform_16, window_bounds = array<i64: 1, 128>}, {pipeline_mode = #tpu.pipeline_mode<synchronous>, transform_indices = @transform_17, window_bounds = array<i64: 384, 128>}, {pipeline_mode = #tpu.pipeline_mode<synchronous>, transform_indices = @transform_18, window_bounds = array<i64: 1, 128>}, {pipeline_mode = #tpu.pipeline_mode<synchronous>, transform_indices = @transform_19, window_bounds = array<i64: 384, 128>}, {pipeline_mode = #tpu.pipeline_mode<synchronous>, transform_indices = @transform_20, window_bounds = array<i64: 1, 128>}, {pipeline_mode = #tpu.pipeline_mode<synchronous>, transform_indices = @transform_21, window_bounds = array<i64: 192, 64>}, {pipeline_mode = #tpu.pipeline_mode<synchronous>, transform_indices = @transform_22, window_bounds = array<i64: 1, 64>}, {pipeline_mode = #tpu.pipeline_mode<synchronous>, transform_indices = @transform_23, window_bounds = array<i64: 192, 64>}, {pipeline_mode = #tpu.pipeline_mode<synchronous>, transform_indices = @transform_24, window_bounds = array<i64: 1, 64>}, {pipeline_mode = #tpu.pipeline_mode<synchronous>, transform_indices = @transform_25, window_bounds = array<i64: 192, 64>}, {pipeline_mode = #tpu.pipeline_mode<synchronous>, transform_indices = @transform_26, window_bounds = array<i64: 1, 64>}, {pipeline_mode = #tpu.pipeline_mode<synchronous>, transform_indices = @transform_27, window_bounds = array<i64: 64, 10>}, {transform_indices = @transform_28, window_bounds = array<i64: 2, 1, 10>}]} {
    %c0 = arith.constant 0 : index
    %c0_0 = arith.constant 0 : index
    %c0_1 = arith.constant 0 : index
    %0 = vector.load %arg1[%c0, %c0_0, %c0_1] : memref<2x32x96xf32, #tpu.memory_space<vmem>>, vector<2x32x96xf32>
    %1 = vector.shape_cast %0 : vector<2x32x96xf32> to vector<64x96xf32>
    %c0_2 = arith.constant 0 : index
    %c0_3 = arith.constant 0 : index
    %2 = vector.load %arg2[%c0_2, %c0_3] : memref<288x128xbf16, #tpu.memory_space<vmem>>, vector<288x128xbf16>
    %c0_4 = arith.constant 0 : index
    %c0_5 = arith.constant 0 : index
    %3 = vector.load %arg3[%c0_4, %c0_5] : memref<1x128xf32, #tpu.memory_space<vmem>>, vector<1x128xf32>
    %cst = arith.constant 0.000000e+00 : f32
    %4 = vector.broadcast %cst : f32 to vector<1x96xf32>
    %5 = vector.extract_strided_slice %1 {offsets = [0, 0], sizes = [63, 96], strides = [1, 1]} : vector<64x96xf32> to vector<63x96xf32>
    %6 = tpu.concatenate %4, %5 in 0 : vector<1x96xf32>, vector<63x96xf32> -> vector<64x96xf32>
    %7 = vector.extract_strided_slice %1 {offsets = [1, 0], sizes = [63, 96], strides = [1, 1]} : vector<64x96xf32> to vector<63x96xf32>
    %8 = tpu.concatenate %7, %4 in 0 : vector<63x96xf32>, vector<1x96xf32> -> vector<64x96xf32>
    %9 = tpu.iota {dimensions = array<i32: 0>} : vector<64x96xi32>
    %c31_i32 = arith.constant 31 : i32
    %10 = vector.broadcast %c31_i32 : i32 to vector<64x96xi32>
    %11 = arith.andi %9, %10 : vector<64x96xi32>
    %c0_i32 = arith.constant 0 : i32
    %12 = vector.broadcast %c0_i32 : i32 to vector<64x96xi32>
    %13 = arith.cmpi eq, %11, %12 : vector<64x96xi32>
    %cst_6 = arith.constant 0.000000e+00 : f32
    %14 = vector.broadcast %cst_6 : f32 to vector<64x96xf32>
    %15 = arith.select %13, %14, %6 : vector<64x96xi1>, vector<64x96xf32>
    %c31_i32_7 = arith.constant 31 : i32
    %16 = vector.broadcast %c31_i32_7 : i32 to vector<64x96xi32>
    %17 = arith.cmpi eq, %11, %16 : vector<64x96xi32>
    %cst_8 = arith.constant 0.000000e+00 : f32
    %18 = vector.broadcast %cst_8 : f32 to vector<64x96xf32>
    %19 = arith.select %17, %18, %8 : vector<64x96xi1>, vector<64x96xf32>
    %20 = tpu.concatenate %15, %1, %19 in 1 : vector<64x96xf32>, vector<64x96xf32>, vector<64x96xf32> -> vector<64x288xf32>
    %21 = arith.truncf %20 : vector<64x288xf32> to vector<64x288xbf16>
    %cst_9 = arith.constant dense<0.000000e+00> : vector<64x128xf32>
    %22 = tpu.matmul %21, %2, %cst_9 {dimension_numbers = #tpu.dot_dimension_numbers<[1], [0], [0], [1], [0, 0, 1, 1], [], []>} : vector<64x288xbf16>, vector<288x128xbf16>, vector<64x128xf32> -> vector<64x128xf32>
    %23 = vector.broadcast %3 : vector<1x128xf32> to vector<64x128xf32>
    %24 = arith.addf %22, %23 : vector<64x128xf32>
    %cst_10 = arith.constant 0.000000e+00 : f32
    %25 = vector.broadcast %cst_10 : f32 to vector<64x128xf32>
    %26 = arith.maximumf %24, %25 : vector<64x128xf32>
    %c0_11 = arith.constant 0 : index
    %c0_12 = arith.constant 0 : index
    %27 = vector.load %arg4[%c0_11, %c0_12] : memref<384x128xbf16, #tpu.memory_space<vmem>>, vector<384x128xbf16>
    %c0_13 = arith.constant 0 : index
    %c0_14 = arith.constant 0 : index
    %28 = vector.load %arg5[%c0_13, %c0_14] : memref<1x128xf32, #tpu.memory_space<vmem>>, vector<1x128xf32>
    %cst_15 = arith.constant 0.000000e+00 : f32
    %29 = vector.broadcast %cst_15 : f32 to vector<1x128xf32>
    %30 = vector.extract_strided_slice %26 {offsets = [0, 0], sizes = [63, 128], strides = [1, 1]} : vector<64x128xf32> to vector<63x128xf32>
    %31 = tpu.concatenate %29, %30 in 0 : vector<1x128xf32>, vector<63x128xf32> -> vector<64x128xf32>
    %32 = vector.extract_strided_slice %26 {offsets = [1, 0], sizes = [63, 128], strides = [1, 1]} : vector<64x128xf32> to vector<63x128xf32>
    %33 = tpu.concatenate %32, %29 in 0 : vector<63x128xf32>, vector<1x128xf32> -> vector<64x128xf32>
    %34 = tpu.iota {dimensions = array<i32: 0>} : vector<64x128xi32>
    %c31_i32_16 = arith.constant 31 : i32
    %35 = vector.broadcast %c31_i32_16 : i32 to vector<64x128xi32>
    %36 = arith.andi %34, %35 : vector<64x128xi32>
    %c0_i32_17 = arith.constant 0 : i32
    %37 = vector.broadcast %c0_i32_17 : i32 to vector<64x128xi32>
    %38 = arith.cmpi eq, %36, %37 : vector<64x128xi32>
    %cst_18 = arith.constant 0.000000e+00 : f32
    %39 = vector.broadcast %cst_18 : f32 to vector<64x128xf32>
    %40 = arith.select %38, %39, %31 : vector<64x128xi1>, vector<64x128xf32>
    %c31_i32_19 = arith.constant 31 : i32
    %41 = vector.broadcast %c31_i32_19 : i32 to vector<64x128xi32>
    %42 = arith.cmpi eq, %36, %41 : vector<64x128xi32>
    %cst_20 = arith.constant 0.000000e+00 : f32
    %43 = vector.broadcast %cst_20 : f32 to vector<64x128xf32>
    %44 = arith.select %42, %43, %33 : vector<64x128xi1>, vector<64x128xf32>
    %45 = tpu.concatenate %40, %26, %44 in 1 : vector<64x128xf32>, vector<64x128xf32>, vector<64x128xf32> -> vector<64x384xf32>
    %46 = arith.truncf %45 : vector<64x384xf32> to vector<64x384xbf16>
    %cst_21 = arith.constant dense<0.000000e+00> : vector<64x128xf32>
    %47 = tpu.matmul %46, %27, %cst_21 {dimension_numbers = #tpu.dot_dimension_numbers<[1], [0], [0], [1], [0, 0, 1, 1], [], []>} : vector<64x384xbf16>, vector<384x128xbf16>, vector<64x128xf32> -> vector<64x128xf32>
    %48 = vector.broadcast %28 : vector<1x128xf32> to vector<64x128xf32>
    %49 = arith.addf %47, %48 : vector<64x128xf32>
    %cst_22 = arith.constant 0.000000e+00 : f32
    %50 = vector.broadcast %cst_22 : f32 to vector<64x128xf32>
    %51 = arith.maximumf %49, %50 : vector<64x128xf32>
    %52 = vector.extract_strided_slice %51 {offsets = [0, 4], sizes = [64, 124], strides = [1, 1]} : vector<64x128xf32> to vector<64x124xf32>
    %cst_23 = arith.constant 0.000000e+00 : f32
    %53 = vector.broadcast %cst_23 : f32 to vector<64x4xf32>
    %54 = tpu.concatenate %52, %53 in 1 : vector<64x124xf32>, vector<64x4xf32> -> vector<64x128xf32>
    %55 = arith.maximumf %51, %54 : vector<64x128xf32>
    %56 = vector.extract_strided_slice %55 {offsets = [1, 0], sizes = [63, 128], strides = [1, 1]} : vector<64x128xf32> to vector<63x128xf32>
    %cst_24 = arith.constant 0.000000e+00 : f32
    %57 = vector.broadcast %cst_24 : f32 to vector<1x128xf32>
    %58 = tpu.concatenate %56, %57 in 0 : vector<63x128xf32>, vector<1x128xf32> -> vector<64x128xf32>
    %59 = arith.maximumf %55, %58 : vector<64x128xf32>
    %60 = tpu.iota {dimensions = array<i32: 0>} : vector<32x64xi32>
    %61 = tpu.iota {dimensions = array<i32: 1>} : vector<32x64xi32>
    %c2_i32 = arith.constant 2 : i32
    %62 = vector.broadcast %c2_i32 : i32 to vector<32x64xi32>
    %63 = arith.muli %62, %60 : vector<32x64xi32>
    %64 = arith.cmpi eq, %61, %63 : vector<32x64xi32>
    %cst_25 = arith.constant 1.000000e+00 : f32
    %cst_26 = arith.constant 0.000000e+00 : f32
    %65 = vector.broadcast %cst_25 : f32 to vector<32x64xf32>
    %66 = vector.broadcast %cst_26 : f32 to vector<32x64xf32>
    %67 = arith.select %64, %65, %66 : vector<32x64xi1>, vector<32x64xf32>
    %68 = tpu.iota {dimensions = array<i32: 0>} : vector<128x64xi32>
    %69 = tpu.iota {dimensions = array<i32: 1>} : vector<128x64xi32>
    %c2_i32_27 = arith.constant 2 : i32
    %70 = vector.broadcast %c2_i32_27 : i32 to vector<128x64xi32>
    %71 = arith.muli %70, %69 : vector<128x64xi32>
    %c3_i32 = arith.constant 3 : i32
    %72 = vector.broadcast %c3_i32 : i32 to vector<128x64xi32>
    %73 = arith.andi %69, %72 : vector<128x64xi32>
    %74 = arith.subi %71, %73 : vector<128x64xi32>
    %75 = arith.cmpi eq, %68, %74 : vector<128x64xi32>
    %cst_28 = arith.constant 1.000000e+00 : f32
    %cst_29 = arith.constant 0.000000e+00 : f32
    %76 = vector.broadcast %cst_28 : f32 to vector<128x64xf32>
    %77 = vector.broadcast %cst_29 : f32 to vector<128x64xf32>
    %78 = arith.select %75, %76, %77 : vector<128x64xi1>, vector<128x64xf32>
    %cst_30 = arith.constant dense<0.000000e+00> : vector<32x128xf32>
    %79 = tpu.matmul %67, %59, %cst_30 {dimension_numbers = #tpu.dot_dimension_numbers<[1], [0], [0], [1], [0, 0, 1, 1], [], []>} : vector<32x64xf32>, vector<64x128xf32>, vector<32x128xf32> -> vector<32x128xf32>
    %cst_31 = arith.constant dense<0.000000e+00> : vector<32x64xf32>
    %80 = tpu.matmul %79, %78, %cst_31 {dimension_numbers = #tpu.dot_dimension_numbers<[1], [0], [0], [1], [0, 0, 1, 1], [], []>} : vector<32x128xf32>, vector<128x64xf32>, vector<32x64xf32> -> vector<32x64xf32>
    %c0_32 = arith.constant 0 : index
    %c0_33 = arith.constant 0 : index
    %81 = vector.load %arg6[%c0_32, %c0_33] : memref<192x128xbf16, #tpu.memory_space<vmem>>, vector<192x128xbf16>
    %c0_34 = arith.constant 0 : index
    %c0_35 = arith.constant 0 : index
    %82 = vector.load %arg7[%c0_34, %c0_35] : memref<1x128xf32, #tpu.memory_space<vmem>>, vector<1x128xf32>
    %cst_36 = arith.constant 0.000000e+00 : f32
    %83 = vector.broadcast %cst_36 : f32 to vector<1x64xf32>
    %84 = vector.extract_strided_slice %80 {offsets = [0, 0], sizes = [31, 64], strides = [1, 1]} : vector<32x64xf32> to vector<31x64xf32>
    %85 = tpu.concatenate %83, %84 in 0 : vector<1x64xf32>, vector<31x64xf32> -> vector<32x64xf32>
    %86 = vector.extract_strided_slice %80 {offsets = [1, 0], sizes = [31, 64], strides = [1, 1]} : vector<32x64xf32> to vector<31x64xf32>
    %87 = tpu.concatenate %86, %83 in 0 : vector<31x64xf32>, vector<1x64xf32> -> vector<32x64xf32>
    %88 = tpu.iota {dimensions = array<i32: 0>} : vector<32x64xi32>
    %c15_i32 = arith.constant 15 : i32
    %89 = vector.broadcast %c15_i32 : i32 to vector<32x64xi32>
    %90 = arith.andi %88, %89 : vector<32x64xi32>
    %c0_i32_37 = arith.constant 0 : i32
    %91 = vector.broadcast %c0_i32_37 : i32 to vector<32x64xi32>
    %92 = arith.cmpi eq, %90, %91 : vector<32x64xi32>
    %cst_38 = arith.constant 0.000000e+00 : f32
    %93 = vector.broadcast %cst_38 : f32 to vector<32x64xf32>
    %94 = arith.select %92, %93, %85 : vector<32x64xi1>, vector<32x64xf32>
    %c15_i32_39 = arith.constant 15 : i32
    %95 = vector.broadcast %c15_i32_39 : i32 to vector<32x64xi32>
    %96 = arith.cmpi eq, %90, %95 : vector<32x64xi32>
    %cst_40 = arith.constant 0.000000e+00 : f32
    %97 = vector.broadcast %cst_40 : f32 to vector<32x64xf32>
    %98 = arith.select %96, %97, %87 : vector<32x64xi1>, vector<32x64xf32>
    %99 = tpu.concatenate %94, %80, %98 in 1 : vector<32x64xf32>, vector<32x64xf32>, vector<32x64xf32> -> vector<32x192xf32>
    %100 = arith.truncf %99 : vector<32x192xf32> to vector<32x192xbf16>
    %cst_41 = arith.constant dense<0.000000e+00> : vector<32x128xf32>
    %101 = tpu.matmul %100, %81, %cst_41 {dimension_numbers = #tpu.dot_dimension_numbers<[1], [0], [0], [1], [0, 0, 1, 1], [], []>} : vector<32x192xbf16>, vector<192x128xbf16>, vector<32x128xf32> -> vector<32x128xf32>
    %102 = vector.broadcast %82 : vector<1x128xf32> to vector<32x128xf32>
    %103 = arith.addf %101, %102 : vector<32x128xf32>
    %cst_42 = arith.constant 0.000000e+00 : f32
    %104 = vector.broadcast %cst_42 : f32 to vector<32x128xf32>
    %105 = arith.maximumf %103, %104 : vector<32x128xf32>
    %c0_43 = arith.constant 0 : index
    %c0_44 = arith.constant 0 : index
    %106 = vector.load %arg8[%c0_43, %c0_44] : memref<384x128xbf16, #tpu.memory_space<vmem>>, vector<384x128xbf16>
    %c0_45 = arith.constant 0 : index
    %c0_46 = arith.constant 0 : index
    %107 = vector.load %arg9[%c0_45, %c0_46] : memref<1x128xf32, #tpu.memory_space<vmem>>, vector<1x128xf32>
    %cst_47 = arith.constant 0.000000e+00 : f32
    %108 = vector.broadcast %cst_47 : f32 to vector<1x128xf32>
    %109 = vector.extract_strided_slice %105 {offsets = [0, 0], sizes = [31, 128], strides = [1, 1]} : vector<32x128xf32> to vector<31x128xf32>
    %110 = tpu.concatenate %108, %109 in 0 : vector<1x128xf32>, vector<31x128xf32> -> vector<32x128xf32>
    %111 = vector.extract_strided_slice %105 {offsets = [1, 0], sizes = [31, 128], strides = [1, 1]} : vector<32x128xf32> to vector<31x128xf32>
    %112 = tpu.concatenate %111, %108 in 0 : vector<31x128xf32>, vector<1x128xf32> -> vector<32x128xf32>
    %113 = tpu.iota {dimensions = array<i32: 0>} : vector<32x128xi32>
    %c15_i32_48 = arith.constant 15 : i32
    %114 = vector.broadcast %c15_i32_48 : i32 to vector<32x128xi32>
    %115 = arith.andi %113, %114 : vector<32x128xi32>
    %c0_i32_49 = arith.constant 0 : i32
    %116 = vector.broadcast %c0_i32_49 : i32 to vector<32x128xi32>
    %117 = arith.cmpi eq, %115, %116 : vector<32x128xi32>
    %cst_50 = arith.constant 0.000000e+00 : f32
    %118 = vector.broadcast %cst_50 : f32 to vector<32x128xf32>
    %119 = arith.select %117, %118, %110 : vector<32x128xi1>, vector<32x128xf32>
    %c15_i32_51 = arith.constant 15 : i32
    %120 = vector.broadcast %c15_i32_51 : i32 to vector<32x128xi32>
    %121 = arith.cmpi eq, %115, %120 : vector<32x128xi32>
    %cst_52 = arith.constant 0.000000e+00 : f32
    %122 = vector.broadcast %cst_52 : f32 to vector<32x128xf32>
    %123 = arith.select %121, %122, %112 : vector<32x128xi1>, vector<32x128xf32>
    %124 = tpu.concatenate %119, %105, %123 in 1 : vector<32x128xf32>, vector<32x128xf32>, vector<32x128xf32> -> vector<32x384xf32>
    %125 = arith.truncf %124 : vector<32x384xf32> to vector<32x384xbf16>
    %cst_53 = arith.constant dense<0.000000e+00> : vector<32x128xf32>
    %126 = tpu.matmul %125, %106, %cst_53 {dimension_numbers = #tpu.dot_dimension_numbers<[1], [0], [0], [1], [0, 0, 1, 1], [], []>} : vector<32x384xbf16>, vector<384x128xbf16>, vector<32x128xf32> -> vector<32x128xf32>
    %127 = vector.broadcast %107 : vector<1x128xf32> to vector<32x128xf32>
    %128 = arith.addf %126, %127 : vector<32x128xf32>
    %cst_54 = arith.constant 0.000000e+00 : f32
    %129 = vector.broadcast %cst_54 : f32 to vector<32x128xf32>
    %130 = arith.maximumf %128, %129 : vector<32x128xf32>
    %131 = vector.extract_strided_slice %130 {offsets = [0, 8], sizes = [32, 120], strides = [1, 1]} : vector<32x128xf32> to vector<32x120xf32>
    %cst_55 = arith.constant 0.000000e+00 : f32
    %132 = vector.broadcast %cst_55 : f32 to vector<32x8xf32>
    %133 = tpu.concatenate %131, %132 in 1 : vector<32x120xf32>, vector<32x8xf32> -> vector<32x128xf32>
    %134 = arith.maximumf %130, %133 : vector<32x128xf32>
    %135 = vector.extract_strided_slice %134 {offsets = [1, 0], sizes = [31, 128], strides = [1, 1]} : vector<32x128xf32> to vector<31x128xf32>
    %cst_56 = arith.constant 0.000000e+00 : f32
    %136 = vector.broadcast %cst_56 : f32 to vector<1x128xf32>
    %137 = tpu.concatenate %135, %136 in 0 : vector<31x128xf32>, vector<1x128xf32> -> vector<32x128xf32>
    %138 = arith.maximumf %134, %137 : vector<32x128xf32>
    %139 = tpu.iota {dimensions = array<i32: 0>} : vector<16x32xi32>
    %140 = tpu.iota {dimensions = array<i32: 1>} : vector<16x32xi32>
    %c2_i32_57 = arith.constant 2 : i32
    %141 = vector.broadcast %c2_i32_57 : i32 to vector<16x32xi32>
    %142 = arith.muli %141, %139 : vector<16x32xi32>
    %143 = arith.cmpi eq, %140, %142 : vector<16x32xi32>
    %cst_58 = arith.constant 1.000000e+00 : f32
    %cst_59 = arith.constant 0.000000e+00 : f32
    %144 = vector.broadcast %cst_58 : f32 to vector<16x32xf32>
    %145 = vector.broadcast %cst_59 : f32 to vector<16x32xf32>
    %146 = arith.select %143, %144, %145 : vector<16x32xi1>, vector<16x32xf32>
    %147 = tpu.iota {dimensions = array<i32: 0>} : vector<128x64xi32>
    %148 = tpu.iota {dimensions = array<i32: 1>} : vector<128x64xi32>
    %c2_i32_60 = arith.constant 2 : i32
    %149 = vector.broadcast %c2_i32_60 : i32 to vector<128x64xi32>
    %150 = arith.muli %149, %148 : vector<128x64xi32>
    %c7_i32 = arith.constant 7 : i32
    %151 = vector.broadcast %c7_i32 : i32 to vector<128x64xi32>
    %152 = arith.andi %148, %151 : vector<128x64xi32>
    %153 = arith.subi %150, %152 : vector<128x64xi32>
    %154 = arith.cmpi eq, %147, %153 : vector<128x64xi32>
    %cst_61 = arith.constant 1.000000e+00 : f32
    %cst_62 = arith.constant 0.000000e+00 : f32
    %155 = vector.broadcast %cst_61 : f32 to vector<128x64xf32>
    %156 = vector.broadcast %cst_62 : f32 to vector<128x64xf32>
    %157 = arith.select %154, %155, %156 : vector<128x64xi1>, vector<128x64xf32>
    %cst_63 = arith.constant dense<0.000000e+00> : vector<16x128xf32>
    %158 = tpu.matmul %146, %138, %cst_63 {dimension_numbers = #tpu.dot_dimension_numbers<[1], [0], [0], [1], [0, 0, 1, 1], [], []>} : vector<16x32xf32>, vector<32x128xf32>, vector<16x128xf32> -> vector<16x128xf32>
    %cst_64 = arith.constant dense<0.000000e+00> : vector<16x64xf32>
    %159 = tpu.matmul %158, %157, %cst_64 {dimension_numbers = #tpu.dot_dimension_numbers<[1], [0], [0], [1], [0, 0, 1, 1], [], []>} : vector<16x128xf32>, vector<128x64xf32>, vector<16x64xf32> -> vector<16x64xf32>
    %c0_65 = arith.constant 0 : index
    %c0_66 = arith.constant 0 : index
    %160 = vector.load %arg10[%c0_65, %c0_66] : memref<192x128xbf16, #tpu.memory_space<vmem>>, vector<192x128xbf16>
    %c0_67 = arith.constant 0 : index
    %c0_68 = arith.constant 0 : index
    %161 = vector.load %arg11[%c0_67, %c0_68] : memref<1x128xf32, #tpu.memory_space<vmem>>, vector<1x128xf32>
    %cst_69 = arith.constant 0.000000e+00 : f32
    %162 = vector.broadcast %cst_69 : f32 to vector<1x64xf32>
    %163 = vector.extract_strided_slice %159 {offsets = [0, 0], sizes = [15, 64], strides = [1, 1]} : vector<16x64xf32> to vector<15x64xf32>
    %164 = tpu.concatenate %162, %163 in 0 : vector<1x64xf32>, vector<15x64xf32> -> vector<16x64xf32>
    %165 = vector.extract_strided_slice %159 {offsets = [1, 0], sizes = [15, 64], strides = [1, 1]} : vector<16x64xf32> to vector<15x64xf32>
    %166 = tpu.concatenate %165, %162 in 0 : vector<15x64xf32>, vector<1x64xf32> -> vector<16x64xf32>
    %167 = tpu.iota {dimensions = array<i32: 0>} : vector<16x64xi32>
    %c7_i32_70 = arith.constant 7 : i32
    %168 = vector.broadcast %c7_i32_70 : i32 to vector<16x64xi32>
    %169 = arith.andi %167, %168 : vector<16x64xi32>
    %c0_i32_71 = arith.constant 0 : i32
    %170 = vector.broadcast %c0_i32_71 : i32 to vector<16x64xi32>
    %171 = arith.cmpi eq, %169, %170 : vector<16x64xi32>
    %cst_72 = arith.constant 0.000000e+00 : f32
    %172 = vector.broadcast %cst_72 : f32 to vector<16x64xf32>
    %173 = arith.select %171, %172, %164 : vector<16x64xi1>, vector<16x64xf32>
    %c7_i32_73 = arith.constant 7 : i32
    %174 = vector.broadcast %c7_i32_73 : i32 to vector<16x64xi32>
    %175 = arith.cmpi eq, %169, %174 : vector<16x64xi32>
    %cst_74 = arith.constant 0.000000e+00 : f32
    %176 = vector.broadcast %cst_74 : f32 to vector<16x64xf32>
    %177 = arith.select %175, %176, %166 : vector<16x64xi1>, vector<16x64xf32>
    %178 = tpu.concatenate %173, %159, %177 in 1 : vector<16x64xf32>, vector<16x64xf32>, vector<16x64xf32> -> vector<16x192xf32>
    %179 = arith.truncf %178 : vector<16x192xf32> to vector<16x192xbf16>
    %cst_75 = arith.constant dense<0.000000e+00> : vector<16x128xf32>
    %180 = tpu.matmul %179, %160, %cst_75 {dimension_numbers = #tpu.dot_dimension_numbers<[1], [0], [0], [1], [0, 0, 1, 1], [], []>} : vector<16x192xbf16>, vector<192x128xbf16>, vector<16x128xf32> -> vector<16x128xf32>
    %181 = vector.broadcast %161 : vector<1x128xf32> to vector<16x128xf32>
    %182 = arith.addf %180, %181 : vector<16x128xf32>
    %cst_76 = arith.constant 0.000000e+00 : f32
    %183 = vector.broadcast %cst_76 : f32 to vector<16x128xf32>
    %184 = arith.maximumf %182, %183 : vector<16x128xf32>
    %c0_77 = arith.constant 0 : index
    %c0_78 = arith.constant 0 : index
    %185 = vector.load %arg12[%c0_77, %c0_78] : memref<384x128xbf16, #tpu.memory_space<vmem>>, vector<384x128xbf16>
    %c0_79 = arith.constant 0 : index
    %c0_80 = arith.constant 0 : index
    %186 = vector.load %arg13[%c0_79, %c0_80] : memref<1x128xf32, #tpu.memory_space<vmem>>, vector<1x128xf32>
    %cst_81 = arith.constant 0.000000e+00 : f32
    %187 = vector.broadcast %cst_81 : f32 to vector<1x128xf32>
    %188 = vector.extract_strided_slice %184 {offsets = [0, 0], sizes = [15, 128], strides = [1, 1]} : vector<16x128xf32> to vector<15x128xf32>
    %189 = tpu.concatenate %187, %188 in 0 : vector<1x128xf32>, vector<15x128xf32> -> vector<16x128xf32>
    %190 = vector.extract_strided_slice %184 {offsets = [1, 0], sizes = [15, 128], strides = [1, 1]} : vector<16x128xf32> to vector<15x128xf32>
    %191 = tpu.concatenate %190, %187 in 0 : vector<15x128xf32>, vector<1x128xf32> -> vector<16x128xf32>
    %192 = tpu.iota {dimensions = array<i32: 0>} : vector<16x128xi32>
    %c7_i32_82 = arith.constant 7 : i32
    %193 = vector.broadcast %c7_i32_82 : i32 to vector<16x128xi32>
    %194 = arith.andi %192, %193 : vector<16x128xi32>
    %c0_i32_83 = arith.constant 0 : i32
    %195 = vector.broadcast %c0_i32_83 : i32 to vector<16x128xi32>
    %196 = arith.cmpi eq, %194, %195 : vector<16x128xi32>
    %cst_84 = arith.constant 0.000000e+00 : f32
    %197 = vector.broadcast %cst_84 : f32 to vector<16x128xf32>
    %198 = arith.select %196, %197, %189 : vector<16x128xi1>, vector<16x128xf32>
    %c7_i32_85 = arith.constant 7 : i32
    %199 = vector.broadcast %c7_i32_85 : i32 to vector<16x128xi32>
    %200 = arith.cmpi eq, %194, %199 : vector<16x128xi32>
    %cst_86 = arith.constant 0.000000e+00 : f32
    %201 = vector.broadcast %cst_86 : f32 to vector<16x128xf32>
    %202 = arith.select %200, %201, %191 : vector<16x128xi1>, vector<16x128xf32>
    %203 = tpu.concatenate %198, %184, %202 in 1 : vector<16x128xf32>, vector<16x128xf32>, vector<16x128xf32> -> vector<16x384xf32>
    %204 = arith.truncf %203 : vector<16x384xf32> to vector<16x384xbf16>
    %cst_87 = arith.constant dense<0.000000e+00> : vector<16x128xf32>
    %205 = tpu.matmul %204, %185, %cst_87 {dimension_numbers = #tpu.dot_dimension_numbers<[1], [0], [0], [1], [0, 0, 1, 1], [], []>} : vector<16x384xbf16>, vector<384x128xbf16>, vector<16x128xf32> -> vector<16x128xf32>
    %206 = vector.broadcast %186 : vector<1x128xf32> to vector<16x128xf32>
    %207 = arith.addf %205, %206 : vector<16x128xf32>
    %cst_88 = arith.constant 0.000000e+00 : f32
    %208 = vector.broadcast %cst_88 : f32 to vector<16x128xf32>
    %209 = arith.maximumf %207, %208 : vector<16x128xf32>
    %c0_89 = arith.constant 0 : index
    %c0_90 = arith.constant 0 : index
    %210 = vector.load %arg14[%c0_89, %c0_90] : memref<384x128xbf16, #tpu.memory_space<vmem>>, vector<384x128xbf16>
    %c0_91 = arith.constant 0 : index
    %c0_92 = arith.constant 0 : index
    %211 = vector.load %arg15[%c0_91, %c0_92] : memref<1x128xf32, #tpu.memory_space<vmem>>, vector<1x128xf32>
    %cst_93 = arith.constant 0.000000e+00 : f32
    %212 = vector.broadcast %cst_93 : f32 to vector<1x128xf32>
    %213 = vector.extract_strided_slice %209 {offsets = [0, 0], sizes = [15, 128], strides = [1, 1]} : vector<16x128xf32> to vector<15x128xf32>
    %214 = tpu.concatenate %212, %213 in 0 : vector<1x128xf32>, vector<15x128xf32> -> vector<16x128xf32>
    %215 = vector.extract_strided_slice %209 {offsets = [1, 0], sizes = [15, 128], strides = [1, 1]} : vector<16x128xf32> to vector<15x128xf32>
    %216 = tpu.concatenate %215, %212 in 0 : vector<15x128xf32>, vector<1x128xf32> -> vector<16x128xf32>
    %217 = tpu.iota {dimensions = array<i32: 0>} : vector<16x128xi32>
    %c7_i32_94 = arith.constant 7 : i32
    %218 = vector.broadcast %c7_i32_94 : i32 to vector<16x128xi32>
    %219 = arith.andi %217, %218 : vector<16x128xi32>
    %c0_i32_95 = arith.constant 0 : i32
    %220 = vector.broadcast %c0_i32_95 : i32 to vector<16x128xi32>
    %221 = arith.cmpi eq, %219, %220 : vector<16x128xi32>
    %cst_96 = arith.constant 0.000000e+00 : f32
    %222 = vector.broadcast %cst_96 : f32 to vector<16x128xf32>
    %223 = arith.select %221, %222, %214 : vector<16x128xi1>, vector<16x128xf32>
    %c7_i32_97 = arith.constant 7 : i32
    %224 = vector.broadcast %c7_i32_97 : i32 to vector<16x128xi32>
    %225 = arith.cmpi eq, %219, %224 : vector<16x128xi32>
    %cst_98 = arith.constant 0.000000e+00 : f32
    %226 = vector.broadcast %cst_98 : f32 to vector<16x128xf32>
    %227 = arith.select %225, %226, %216 : vector<16x128xi1>, vector<16x128xf32>
    %228 = tpu.concatenate %223, %209, %227 in 1 : vector<16x128xf32>, vector<16x128xf32>, vector<16x128xf32> -> vector<16x384xf32>
    %229 = arith.truncf %228 : vector<16x384xf32> to vector<16x384xbf16>
    %cst_99 = arith.constant dense<0.000000e+00> : vector<16x128xf32>
    %230 = tpu.matmul %229, %210, %cst_99 {dimension_numbers = #tpu.dot_dimension_numbers<[1], [0], [0], [1], [0, 0, 1, 1], [], []>} : vector<16x384xbf16>, vector<384x128xbf16>, vector<16x128xf32> -> vector<16x128xf32>
    %231 = vector.broadcast %211 : vector<1x128xf32> to vector<16x128xf32>
    %232 = arith.addf %230, %231 : vector<16x128xf32>
    %cst_100 = arith.constant 0.000000e+00 : f32
    %233 = vector.broadcast %cst_100 : f32 to vector<16x128xf32>
    %234 = arith.maximumf %232, %233 : vector<16x128xf32>
    %235 = vector.extract_strided_slice %234 {offsets = [0, 16], sizes = [16, 112], strides = [1, 1]} : vector<16x128xf32> to vector<16x112xf32>
    %cst_101 = arith.constant 0.000000e+00 : f32
    %236 = vector.broadcast %cst_101 : f32 to vector<16x16xf32>
    %237 = tpu.concatenate %235, %236 in 1 : vector<16x112xf32>, vector<16x16xf32> -> vector<16x128xf32>
    %238 = arith.maximumf %234, %237 : vector<16x128xf32>
    %239 = vector.extract_strided_slice %238 {offsets = [1, 0], sizes = [15, 128], strides = [1, 1]} : vector<16x128xf32> to vector<15x128xf32>
    %cst_102 = arith.constant 0.000000e+00 : f32
    %240 = vector.broadcast %cst_102 : f32 to vector<1x128xf32>
    %241 = tpu.concatenate %239, %240 in 0 : vector<15x128xf32>, vector<1x128xf32> -> vector<16x128xf32>
    %242 = arith.maximumf %238, %241 : vector<16x128xf32>
    %243 = tpu.iota {dimensions = array<i32: 0>} : vector<8x16xi32>
    %244 = tpu.iota {dimensions = array<i32: 1>} : vector<8x16xi32>
    %c2_i32_103 = arith.constant 2 : i32
    %245 = vector.broadcast %c2_i32_103 : i32 to vector<8x16xi32>
    %246 = arith.muli %245, %243 : vector<8x16xi32>
    %247 = arith.cmpi eq, %244, %246 : vector<8x16xi32>
    %cst_104 = arith.constant 1.000000e+00 : f32
    %cst_105 = arith.constant 0.000000e+00 : f32
    %248 = vector.broadcast %cst_104 : f32 to vector<8x16xf32>
    %249 = vector.broadcast %cst_105 : f32 to vector<8x16xf32>
    %250 = arith.select %247, %248, %249 : vector<8x16xi1>, vector<8x16xf32>
    %251 = tpu.iota {dimensions = array<i32: 0>} : vector<128x64xi32>
    %252 = tpu.iota {dimensions = array<i32: 1>} : vector<128x64xi32>
    %c2_i32_106 = arith.constant 2 : i32
    %253 = vector.broadcast %c2_i32_106 : i32 to vector<128x64xi32>
    %254 = arith.muli %253, %252 : vector<128x64xi32>
    %c15_i32_107 = arith.constant 15 : i32
    %255 = vector.broadcast %c15_i32_107 : i32 to vector<128x64xi32>
    %256 = arith.andi %252, %255 : vector<128x64xi32>
    %257 = arith.subi %254, %256 : vector<128x64xi32>
    %258 = arith.cmpi eq, %251, %257 : vector<128x64xi32>
    %cst_108 = arith.constant 1.000000e+00 : f32
    %cst_109 = arith.constant 0.000000e+00 : f32
    %259 = vector.broadcast %cst_108 : f32 to vector<128x64xf32>
    %260 = vector.broadcast %cst_109 : f32 to vector<128x64xf32>
    %261 = arith.select %258, %259, %260 : vector<128x64xi1>, vector<128x64xf32>
    %cst_110 = arith.constant dense<0.000000e+00> : vector<8x128xf32>
    %262 = tpu.matmul %250, %242, %cst_110 {dimension_numbers = #tpu.dot_dimension_numbers<[1], [0], [0], [1], [0, 0, 1, 1], [], []>} : vector<8x16xf32>, vector<16x128xf32>, vector<8x128xf32> -> vector<8x128xf32>
    %cst_111 = arith.constant dense<0.000000e+00> : vector<8x64xf32>
    %263 = tpu.matmul %262, %261, %cst_111 {dimension_numbers = #tpu.dot_dimension_numbers<[1], [0], [0], [1], [0, 0, 1, 1], [], []>} : vector<8x128xf32>, vector<128x64xf32>, vector<8x64xf32> -> vector<8x64xf32>
    %c0_112 = arith.constant 0 : index
    %c0_113 = arith.constant 0 : index
    %264 = vector.load %arg16[%c0_112, %c0_113] : memref<192x128xbf16, #tpu.memory_space<vmem>>, vector<192x128xbf16>
    %c0_114 = arith.constant 0 : index
    %c0_115 = arith.constant 0 : index
    %265 = vector.load %arg17[%c0_114, %c0_115] : memref<1x128xf32, #tpu.memory_space<vmem>>, vector<1x128xf32>
    %cst_116 = arith.constant 0.000000e+00 : f32
    %266 = vector.broadcast %cst_116 : f32 to vector<1x64xf32>
    %267 = vector.extract_strided_slice %263 {offsets = [0, 0], sizes = [7, 64], strides = [1, 1]} : vector<8x64xf32> to vector<7x64xf32>
    %268 = tpu.concatenate %266, %267 in 0 : vector<1x64xf32>, vector<7x64xf32> -> vector<8x64xf32>
    %269 = vector.extract_strided_slice %263 {offsets = [1, 0], sizes = [7, 64], strides = [1, 1]} : vector<8x64xf32> to vector<7x64xf32>
    %270 = tpu.concatenate %269, %266 in 0 : vector<7x64xf32>, vector<1x64xf32> -> vector<8x64xf32>
    %271 = tpu.iota {dimensions = array<i32: 0>} : vector<8x64xi32>
    %c3_i32_117 = arith.constant 3 : i32
    %272 = vector.broadcast %c3_i32_117 : i32 to vector<8x64xi32>
    %273 = arith.andi %271, %272 : vector<8x64xi32>
    %c0_i32_118 = arith.constant 0 : i32
    %274 = vector.broadcast %c0_i32_118 : i32 to vector<8x64xi32>
    %275 = arith.cmpi eq, %273, %274 : vector<8x64xi32>
    %cst_119 = arith.constant 0.000000e+00 : f32
    %276 = vector.broadcast %cst_119 : f32 to vector<8x64xf32>
    %277 = arith.select %275, %276, %268 : vector<8x64xi1>, vector<8x64xf32>
    %c3_i32_120 = arith.constant 3 : i32
    %278 = vector.broadcast %c3_i32_120 : i32 to vector<8x64xi32>
    %279 = arith.cmpi eq, %273, %278 : vector<8x64xi32>
    %cst_121 = arith.constant 0.000000e+00 : f32
    %280 = vector.broadcast %cst_121 : f32 to vector<8x64xf32>
    %281 = arith.select %279, %280, %270 : vector<8x64xi1>, vector<8x64xf32>
    %282 = tpu.concatenate %277, %263, %281 in 1 : vector<8x64xf32>, vector<8x64xf32>, vector<8x64xf32> -> vector<8x192xf32>
    %283 = arith.truncf %282 : vector<8x192xf32> to vector<8x192xbf16>
    %cst_122 = arith.constant dense<0.000000e+00> : vector<8x128xf32>
    %284 = tpu.matmul %283, %264, %cst_122 {dimension_numbers = #tpu.dot_dimension_numbers<[1], [0], [0], [1], [0, 0, 1, 1], [], []>} : vector<8x192xbf16>, vector<192x128xbf16>, vector<8x128xf32> -> vector<8x128xf32>
    %285 = vector.broadcast %265 : vector<1x128xf32> to vector<8x128xf32>
    %286 = arith.addf %284, %285 : vector<8x128xf32>
    %cst_123 = arith.constant 0.000000e+00 : f32
    %287 = vector.broadcast %cst_123 : f32 to vector<8x128xf32>
    %288 = arith.maximumf %286, %287 : vector<8x128xf32>
    %c0_124 = arith.constant 0 : index
    %c0_125 = arith.constant 0 : index
    %289 = vector.load %arg18[%c0_124, %c0_125] : memref<384x128xbf16, #tpu.memory_space<vmem>>, vector<384x128xbf16>
    %c0_126 = arith.constant 0 : index
    %c0_127 = arith.constant 0 : index
    %290 = vector.load %arg19[%c0_126, %c0_127] : memref<1x128xf32, #tpu.memory_space<vmem>>, vector<1x128xf32>
    %cst_128 = arith.constant 0.000000e+00 : f32
    %291 = vector.broadcast %cst_128 : f32 to vector<1x128xf32>
    %292 = vector.extract_strided_slice %288 {offsets = [0, 0], sizes = [7, 128], strides = [1, 1]} : vector<8x128xf32> to vector<7x128xf32>
    %293 = tpu.concatenate %291, %292 in 0 : vector<1x128xf32>, vector<7x128xf32> -> vector<8x128xf32>
    %294 = vector.extract_strided_slice %288 {offsets = [1, 0], sizes = [7, 128], strides = [1, 1]} : vector<8x128xf32> to vector<7x128xf32>
    %295 = tpu.concatenate %294, %291 in 0 : vector<7x128xf32>, vector<1x128xf32> -> vector<8x128xf32>
    %296 = tpu.iota {dimensions = array<i32: 0>} : vector<8x128xi32>
    %c3_i32_129 = arith.constant 3 : i32
    %297 = vector.broadcast %c3_i32_129 : i32 to vector<8x128xi32>
    %298 = arith.andi %296, %297 : vector<8x128xi32>
    %c0_i32_130 = arith.constant 0 : i32
    %299 = vector.broadcast %c0_i32_130 : i32 to vector<8x128xi32>
    %300 = arith.cmpi eq, %298, %299 : vector<8x128xi32>
    %cst_131 = arith.constant 0.000000e+00 : f32
    %301 = vector.broadcast %cst_131 : f32 to vector<8x128xf32>
    %302 = arith.select %300, %301, %293 : vector<8x128xi1>, vector<8x128xf32>
    %c3_i32_132 = arith.constant 3 : i32
    %303 = vector.broadcast %c3_i32_132 : i32 to vector<8x128xi32>
    %304 = arith.cmpi eq, %298, %303 : vector<8x128xi32>
    %cst_133 = arith.constant 0.000000e+00 : f32
    %305 = vector.broadcast %cst_133 : f32 to vector<8x128xf32>
    %306 = arith.select %304, %305, %295 : vector<8x128xi1>, vector<8x128xf32>
    %307 = tpu.concatenate %302, %288, %306 in 1 : vector<8x128xf32>, vector<8x128xf32>, vector<8x128xf32> -> vector<8x384xf32>
    %308 = arith.truncf %307 : vector<8x384xf32> to vector<8x384xbf16>
    %cst_134 = arith.constant dense<0.000000e+00> : vector<8x128xf32>
    %309 = tpu.matmul %308, %289, %cst_134 {dimension_numbers = #tpu.dot_dimension_numbers<[1], [0], [0], [1], [0, 0, 1, 1], [], []>} : vector<8x384xbf16>, vector<384x128xbf16>, vector<8x128xf32> -> vector<8x128xf32>
    %310 = vector.broadcast %290 : vector<1x128xf32> to vector<8x128xf32>
    %311 = arith.addf %309, %310 : vector<8x128xf32>
    %cst_135 = arith.constant 0.000000e+00 : f32
    %312 = vector.broadcast %cst_135 : f32 to vector<8x128xf32>
    %313 = arith.maximumf %311, %312 : vector<8x128xf32>
    %c0_136 = arith.constant 0 : index
    %c0_137 = arith.constant 0 : index
    %314 = vector.load %arg20[%c0_136, %c0_137] : memref<384x128xbf16, #tpu.memory_space<vmem>>, vector<384x128xbf16>
    %c0_138 = arith.constant 0 : index
    %c0_139 = arith.constant 0 : index
    %315 = vector.load %arg21[%c0_138, %c0_139] : memref<1x128xf32, #tpu.memory_space<vmem>>, vector<1x128xf32>
    %cst_140 = arith.constant 0.000000e+00 : f32
    %316 = vector.broadcast %cst_140 : f32 to vector<1x128xf32>
    %317 = vector.extract_strided_slice %313 {offsets = [0, 0], sizes = [7, 128], strides = [1, 1]} : vector<8x128xf32> to vector<7x128xf32>
    %318 = tpu.concatenate %316, %317 in 0 : vector<1x128xf32>, vector<7x128xf32> -> vector<8x128xf32>
    %319 = vector.extract_strided_slice %313 {offsets = [1, 0], sizes = [7, 128], strides = [1, 1]} : vector<8x128xf32> to vector<7x128xf32>
    %320 = tpu.concatenate %319, %316 in 0 : vector<7x128xf32>, vector<1x128xf32> -> vector<8x128xf32>
    %321 = tpu.iota {dimensions = array<i32: 0>} : vector<8x128xi32>
    %c3_i32_141 = arith.constant 3 : i32
    %322 = vector.broadcast %c3_i32_141 : i32 to vector<8x128xi32>
    %323 = arith.andi %321, %322 : vector<8x128xi32>
    %c0_i32_142 = arith.constant 0 : i32
    %324 = vector.broadcast %c0_i32_142 : i32 to vector<8x128xi32>
    %325 = arith.cmpi eq, %323, %324 : vector<8x128xi32>
    %cst_143 = arith.constant 0.000000e+00 : f32
    %326 = vector.broadcast %cst_143 : f32 to vector<8x128xf32>
    %327 = arith.select %325, %326, %318 : vector<8x128xi1>, vector<8x128xf32>
    %c3_i32_144 = arith.constant 3 : i32
    %328 = vector.broadcast %c3_i32_144 : i32 to vector<8x128xi32>
    %329 = arith.cmpi eq, %323, %328 : vector<8x128xi32>
    %cst_145 = arith.constant 0.000000e+00 : f32
    %330 = vector.broadcast %cst_145 : f32 to vector<8x128xf32>
    %331 = arith.select %329, %330, %320 : vector<8x128xi1>, vector<8x128xf32>
    %332 = tpu.concatenate %327, %313, %331 in 1 : vector<8x128xf32>, vector<8x128xf32>, vector<8x128xf32> -> vector<8x384xf32>
    %333 = arith.truncf %332 : vector<8x384xf32> to vector<8x384xbf16>
    %cst_146 = arith.constant dense<0.000000e+00> : vector<8x128xf32>
    %334 = tpu.matmul %333, %314, %cst_146 {dimension_numbers = #tpu.dot_dimension_numbers<[1], [0], [0], [1], [0, 0, 1, 1], [], []>} : vector<8x384xbf16>, vector<384x128xbf16>, vector<8x128xf32> -> vector<8x128xf32>
    %335 = vector.broadcast %315 : vector<1x128xf32> to vector<8x128xf32>
    %336 = arith.addf %334, %335 : vector<8x128xf32>
    %cst_147 = arith.constant 0.000000e+00 : f32
    %337 = vector.broadcast %cst_147 : f32 to vector<8x128xf32>
    %338 = arith.maximumf %336, %337 : vector<8x128xf32>
    %339 = vector.extract_strided_slice %338 {offsets = [0, 32], sizes = [8, 96], strides = [1, 1]} : vector<8x128xf32> to vector<8x96xf32>
    %cst_148 = arith.constant 0.000000e+00 : f32
    %340 = vector.broadcast %cst_148 : f32 to vector<8x32xf32>
    %341 = tpu.concatenate %339, %340 in 1 : vector<8x96xf32>, vector<8x32xf32> -> vector<8x128xf32>
    %342 = arith.maximumf %338, %341 : vector<8x128xf32>
    %343 = vector.extract_strided_slice %342 {offsets = [1, 0], sizes = [7, 128], strides = [1, 1]} : vector<8x128xf32> to vector<7x128xf32>
    %cst_149 = arith.constant 0.000000e+00 : f32
    %344 = vector.broadcast %cst_149 : f32 to vector<1x128xf32>
    %345 = tpu.concatenate %343, %344 in 0 : vector<7x128xf32>, vector<1x128xf32> -> vector<8x128xf32>
    %346 = arith.maximumf %342, %345 : vector<8x128xf32>
    %347 = tpu.iota {dimensions = array<i32: 0>} : vector<4x8xi32>
    %348 = tpu.iota {dimensions = array<i32: 1>} : vector<4x8xi32>
    %c2_i32_150 = arith.constant 2 : i32
    %349 = vector.broadcast %c2_i32_150 : i32 to vector<4x8xi32>
    %350 = arith.muli %349, %347 : vector<4x8xi32>
    %351 = arith.cmpi eq, %348, %350 : vector<4x8xi32>
    %cst_151 = arith.constant 1.000000e+00 : f32
    %cst_152 = arith.constant 0.000000e+00 : f32
    %352 = vector.broadcast %cst_151 : f32 to vector<4x8xf32>
    %353 = vector.broadcast %cst_152 : f32 to vector<4x8xf32>
    %354 = arith.select %351, %352, %353 : vector<4x8xi1>, vector<4x8xf32>
    %355 = tpu.iota {dimensions = array<i32: 0>} : vector<128x64xi32>
    %356 = tpu.iota {dimensions = array<i32: 1>} : vector<128x64xi32>
    %c2_i32_153 = arith.constant 2 : i32
    %357 = vector.broadcast %c2_i32_153 : i32 to vector<128x64xi32>
    %358 = arith.muli %357, %356 : vector<128x64xi32>
    %c31_i32_154 = arith.constant 31 : i32
    %359 = vector.broadcast %c31_i32_154 : i32 to vector<128x64xi32>
    %360 = arith.andi %356, %359 : vector<128x64xi32>
    %361 = arith.subi %358, %360 : vector<128x64xi32>
    %362 = arith.cmpi eq, %355, %361 : vector<128x64xi32>
    %cst_155 = arith.constant 1.000000e+00 : f32
    %cst_156 = arith.constant 0.000000e+00 : f32
    %363 = vector.broadcast %cst_155 : f32 to vector<128x64xf32>
    %364 = vector.broadcast %cst_156 : f32 to vector<128x64xf32>
    %365 = arith.select %362, %363, %364 : vector<128x64xi1>, vector<128x64xf32>
    %cst_157 = arith.constant dense<0.000000e+00> : vector<4x128xf32>
    %366 = tpu.matmul %354, %346, %cst_157 {dimension_numbers = #tpu.dot_dimension_numbers<[1], [0], [0], [1], [0, 0, 1, 1], [], []>} : vector<4x8xf32>, vector<8x128xf32>, vector<4x128xf32> -> vector<4x128xf32>
    %cst_158 = arith.constant dense<0.000000e+00> : vector<4x64xf32>
    %367 = tpu.matmul %366, %365, %cst_158 {dimension_numbers = #tpu.dot_dimension_numbers<[1], [0], [0], [1], [0, 0, 1, 1], [], []>} : vector<4x128xf32>, vector<128x64xf32>, vector<4x64xf32> -> vector<4x64xf32>
    %c0_159 = arith.constant 0 : index
    %c0_160 = arith.constant 0 : index
    %368 = vector.load %arg22[%c0_159, %c0_160] : memref<192x64xbf16, #tpu.memory_space<vmem>>, vector<192x64xbf16>
    %c0_161 = arith.constant 0 : index
    %c0_162 = arith.constant 0 : index
    %369 = vector.load %arg23[%c0_161, %c0_162] : memref<1x64xf32, #tpu.memory_space<vmem>>, vector<1x64xf32>
    %cst_163 = arith.constant 0.000000e+00 : f32
    %370 = vector.broadcast %cst_163 : f32 to vector<1x64xf32>
    %371 = vector.extract_strided_slice %367 {offsets = [0, 0], sizes = [3, 64], strides = [1, 1]} : vector<4x64xf32> to vector<3x64xf32>
    %372 = tpu.concatenate %370, %371 in 0 : vector<1x64xf32>, vector<3x64xf32> -> vector<4x64xf32>
    %373 = vector.extract_strided_slice %367 {offsets = [1, 0], sizes = [3, 64], strides = [1, 1]} : vector<4x64xf32> to vector<3x64xf32>
    %374 = tpu.concatenate %373, %370 in 0 : vector<3x64xf32>, vector<1x64xf32> -> vector<4x64xf32>
    %375 = tpu.iota {dimensions = array<i32: 0>} : vector<4x64xi32>
    %c1_i32 = arith.constant 1 : i32
    %376 = vector.broadcast %c1_i32 : i32 to vector<4x64xi32>
    %377 = arith.andi %375, %376 : vector<4x64xi32>
    %c0_i32_164 = arith.constant 0 : i32
    %378 = vector.broadcast %c0_i32_164 : i32 to vector<4x64xi32>
    %379 = arith.cmpi eq, %377, %378 : vector<4x64xi32>
    %cst_165 = arith.constant 0.000000e+00 : f32
    %380 = vector.broadcast %cst_165 : f32 to vector<4x64xf32>
    %381 = arith.select %379, %380, %372 : vector<4x64xi1>, vector<4x64xf32>
    %c1_i32_166 = arith.constant 1 : i32
    %382 = vector.broadcast %c1_i32_166 : i32 to vector<4x64xi32>
    %383 = arith.cmpi eq, %377, %382 : vector<4x64xi32>
    %cst_167 = arith.constant 0.000000e+00 : f32
    %384 = vector.broadcast %cst_167 : f32 to vector<4x64xf32>
    %385 = arith.select %383, %384, %374 : vector<4x64xi1>, vector<4x64xf32>
    %386 = tpu.concatenate %381, %367, %385 in 1 : vector<4x64xf32>, vector<4x64xf32>, vector<4x64xf32> -> vector<4x192xf32>
    %387 = arith.truncf %386 : vector<4x192xf32> to vector<4x192xbf16>
    %cst_168 = arith.constant dense<0.000000e+00> : vector<4x64xf32>
    %388 = tpu.matmul %387, %368, %cst_168 {dimension_numbers = #tpu.dot_dimension_numbers<[1], [0], [0], [1], [0, 0, 1, 1], [], []>} : vector<4x192xbf16>, vector<192x64xbf16>, vector<4x64xf32> -> vector<4x64xf32>
    %389 = vector.broadcast %369 : vector<1x64xf32> to vector<4x64xf32>
    %390 = arith.addf %388, %389 : vector<4x64xf32>
    %cst_169 = arith.constant 0.000000e+00 : f32
    %391 = vector.broadcast %cst_169 : f32 to vector<4x64xf32>
    %392 = arith.maximumf %390, %391 : vector<4x64xf32>
    %c0_170 = arith.constant 0 : index
    %c0_171 = arith.constant 0 : index
    %393 = vector.load %arg24[%c0_170, %c0_171] : memref<192x64xbf16, #tpu.memory_space<vmem>>, vector<192x64xbf16>
    %c0_172 = arith.constant 0 : index
    %c0_173 = arith.constant 0 : index
    %394 = vector.load %arg25[%c0_172, %c0_173] : memref<1x64xf32, #tpu.memory_space<vmem>>, vector<1x64xf32>
    %cst_174 = arith.constant 0.000000e+00 : f32
    %395 = vector.broadcast %cst_174 : f32 to vector<1x64xf32>
    %396 = vector.extract_strided_slice %392 {offsets = [0, 0], sizes = [3, 64], strides = [1, 1]} : vector<4x64xf32> to vector<3x64xf32>
    %397 = tpu.concatenate %395, %396 in 0 : vector<1x64xf32>, vector<3x64xf32> -> vector<4x64xf32>
    %398 = vector.extract_strided_slice %392 {offsets = [1, 0], sizes = [3, 64], strides = [1, 1]} : vector<4x64xf32> to vector<3x64xf32>
    %399 = tpu.concatenate %398, %395 in 0 : vector<3x64xf32>, vector<1x64xf32> -> vector<4x64xf32>
    %400 = tpu.iota {dimensions = array<i32: 0>} : vector<4x64xi32>
    %c1_i32_175 = arith.constant 1 : i32
    %401 = vector.broadcast %c1_i32_175 : i32 to vector<4x64xi32>
    %402 = arith.andi %400, %401 : vector<4x64xi32>
    %c0_i32_176 = arith.constant 0 : i32
    %403 = vector.broadcast %c0_i32_176 : i32 to vector<4x64xi32>
    %404 = arith.cmpi eq, %402, %403 : vector<4x64xi32>
    %cst_177 = arith.constant 0.000000e+00 : f32
    %405 = vector.broadcast %cst_177 : f32 to vector<4x64xf32>
    %406 = arith.select %404, %405, %397 : vector<4x64xi1>, vector<4x64xf32>
    %c1_i32_178 = arith.constant 1 : i32
    %407 = vector.broadcast %c1_i32_178 : i32 to vector<4x64xi32>
    %408 = arith.cmpi eq, %402, %407 : vector<4x64xi32>
    %cst_179 = arith.constant 0.000000e+00 : f32
    %409 = vector.broadcast %cst_179 : f32 to vector<4x64xf32>
    %410 = arith.select %408, %409, %399 : vector<4x64xi1>, vector<4x64xf32>
    %411 = tpu.concatenate %406, %392, %410 in 1 : vector<4x64xf32>, vector<4x64xf32>, vector<4x64xf32> -> vector<4x192xf32>
    %412 = arith.truncf %411 : vector<4x192xf32> to vector<4x192xbf16>
    %cst_180 = arith.constant dense<0.000000e+00> : vector<4x64xf32>
    %413 = tpu.matmul %412, %393, %cst_180 {dimension_numbers = #tpu.dot_dimension_numbers<[1], [0], [0], [1], [0, 0, 1, 1], [], []>} : vector<4x192xbf16>, vector<192x64xbf16>, vector<4x64xf32> -> vector<4x64xf32>
    %414 = vector.broadcast %394 : vector<1x64xf32> to vector<4x64xf32>
    %415 = arith.addf %413, %414 : vector<4x64xf32>
    %cst_181 = arith.constant 0.000000e+00 : f32
    %416 = vector.broadcast %cst_181 : f32 to vector<4x64xf32>
    %417 = arith.maximumf %415, %416 : vector<4x64xf32>
    %c0_182 = arith.constant 0 : index
    %c0_183 = arith.constant 0 : index
    %418 = vector.load %arg26[%c0_182, %c0_183] : memref<192x64xbf16, #tpu.memory_space<vmem>>, vector<192x64xbf16>
    %c0_184 = arith.constant 0 : index
    %c0_185 = arith.constant 0 : index
    %419 = vector.load %arg27[%c0_184, %c0_185] : memref<1x64xf32, #tpu.memory_space<vmem>>, vector<1x64xf32>
    %cst_186 = arith.constant 0.000000e+00 : f32
    %420 = vector.broadcast %cst_186 : f32 to vector<1x64xf32>
    %421 = vector.extract_strided_slice %417 {offsets = [0, 0], sizes = [3, 64], strides = [1, 1]} : vector<4x64xf32> to vector<3x64xf32>
    %422 = tpu.concatenate %420, %421 in 0 : vector<1x64xf32>, vector<3x64xf32> -> vector<4x64xf32>
    %423 = vector.extract_strided_slice %417 {offsets = [1, 0], sizes = [3, 64], strides = [1, 1]} : vector<4x64xf32> to vector<3x64xf32>
    %424 = tpu.concatenate %423, %420 in 0 : vector<3x64xf32>, vector<1x64xf32> -> vector<4x64xf32>
    %425 = tpu.iota {dimensions = array<i32: 0>} : vector<4x64xi32>
    %c1_i32_187 = arith.constant 1 : i32
    %426 = vector.broadcast %c1_i32_187 : i32 to vector<4x64xi32>
    %427 = arith.andi %425, %426 : vector<4x64xi32>
    %c0_i32_188 = arith.constant 0 : i32
    %428 = vector.broadcast %c0_i32_188 : i32 to vector<4x64xi32>
    %429 = arith.cmpi eq, %427, %428 : vector<4x64xi32>
    %cst_189 = arith.constant 0.000000e+00 : f32
    %430 = vector.broadcast %cst_189 : f32 to vector<4x64xf32>
    %431 = arith.select %429, %430, %422 : vector<4x64xi1>, vector<4x64xf32>
    %c1_i32_190 = arith.constant 1 : i32
    %432 = vector.broadcast %c1_i32_190 : i32 to vector<4x64xi32>
    %433 = arith.cmpi eq, %427, %432 : vector<4x64xi32>
    %cst_191 = arith.constant 0.000000e+00 : f32
    %434 = vector.broadcast %cst_191 : f32 to vector<4x64xf32>
    %435 = arith.select %433, %434, %424 : vector<4x64xi1>, vector<4x64xf32>
    %436 = tpu.concatenate %431, %417, %435 in 1 : vector<4x64xf32>, vector<4x64xf32>, vector<4x64xf32> -> vector<4x192xf32>
    %437 = arith.truncf %436 : vector<4x192xf32> to vector<4x192xbf16>
    %cst_192 = arith.constant dense<0.000000e+00> : vector<4x64xf32>
    %438 = tpu.matmul %437, %418, %cst_192 {dimension_numbers = #tpu.dot_dimension_numbers<[1], [0], [0], [1], [0, 0, 1, 1], [], []>} : vector<4x192xbf16>, vector<192x64xbf16>, vector<4x64xf32> -> vector<4x64xf32>
    %439 = vector.broadcast %419 : vector<1x64xf32> to vector<4x64xf32>
    %440 = arith.addf %438, %439 : vector<4x64xf32>
    %cst_193 = arith.constant 0.000000e+00 : f32
    %441 = vector.broadcast %cst_193 : f32 to vector<4x64xf32>
    %442 = arith.maximumf %440, %441 : vector<4x64xf32>
    %443 = arith.truncf %442 : vector<4x64xf32> to vector<4x64xbf16>
    %c0_194 = arith.constant 0 : index
    %c0_195 = arith.constant 0 : index
    %444 = vector.load %arg28[%c0_194, %c0_195] : memref<64x10xbf16, #tpu.memory_space<vmem>>, vector<64x10xbf16>
    %cst_196 = arith.constant dense<0.000000e+00> : vector<4x10xf32>
    %445 = tpu.matmul %443, %444, %cst_196 {dimension_numbers = #tpu.dot_dimension_numbers<[1], [0], [0], [1], [0, 0, 1, 1], [], []>} : vector<4x64xbf16>, vector<64x10xbf16>, vector<4x10xf32> -> vector<4x10xf32>
    %446 = tpu.iota {dimensions = array<i32: 0>} : vector<2x4xi32>
    %447 = tpu.iota {dimensions = array<i32: 1>} : vector<2x4xi32>
    %c2_i32_197 = arith.constant 2 : i32
    %448 = vector.broadcast %c2_i32_197 : i32 to vector<2x4xi32>
    %449 = arith.muli %446, %448 : vector<2x4xi32>
    %450 = arith.cmpi sge, %447, %449 : vector<2x4xi32>
    %c1_i32_198 = arith.constant 1 : i32
    %451 = vector.broadcast %c1_i32_198 : i32 to vector<2x4xi32>
    %452 = arith.addi %446, %451 : vector<2x4xi32>
    %c2_i32_199 = arith.constant 2 : i32
    %453 = vector.broadcast %c2_i32_199 : i32 to vector<2x4xi32>
    %454 = arith.muli %452, %453 : vector<2x4xi32>
    %455 = arith.cmpi slt, %447, %454 : vector<2x4xi32>
    %456 = arith.andi %450, %455 : vector<2x4xi1>
    %cst_200 = arith.constant 1.000000e+00 : f32
    %cst_201 = arith.constant 0.000000e+00 : f32
    %457 = vector.broadcast %cst_200 : f32 to vector<2x4xf32>
    %458 = vector.broadcast %cst_201 : f32 to vector<2x4xf32>
    %459 = arith.select %456, %457, %458 : vector<2x4xi1>, vector<2x4xf32>
    %cst_202 = arith.constant dense<0.000000e+00> : vector<2x10xf32>
    %460 = tpu.matmul %459, %445, %cst_202 {dimension_numbers = #tpu.dot_dimension_numbers<[1], [0], [0], [1], [0, 0, 1, 1], [], []>} : vector<2x4xf32>, vector<4x10xf32>, vector<2x10xf32> -> vector<2x10xf32>
    %461 = vector.shape_cast %460 : vector<2x10xf32> to vector<2x1x10xf32>
    %c0_203 = arith.constant 0 : index
    %c0_204 = arith.constant 0 : index
    %c0_205 = arith.constant 0 : index
    %462 = vector.load %arg29[%c0_203, %c0_204, %c0_205] : memref<2x1x10xf32, #tpu.memory_space<vmem>>, vector<2x1x10xf32>
    tpu.vector_store %arg29[%c0_203, %c0_204, %c0_205], %461 {strides = array<i32>} : memref<2x1x10xf32, #tpu.memory_space<vmem>>, vector<2x1x10xf32>,
    return
  }
  func.func @transform_0(%arg0: i32) -> (i32, i32, i32) {
    %c0_i32 = arith.constant 0 : i32
    %c0_i32_0 = arith.constant 0 : i32
    %c0_i32_1 = arith.constant 0 : i32
    return %arg0, %c0_i32, %c0_i32_0 : i32, i32, i32
  }
  func.func @transform_1(%arg0: i32) -> (i32, i32) {
    %c0_i32 = arith.constant 0 : i32
    %c0_i32_0 = arith.constant 0 : i32
    %c0_i32_1 = arith.constant 0 : i32
    return %c0_i32, %c0_i32_0 : i32, i32
  }
  func.func @transform_2(%arg0: i32) -> (i32, i32) {
    %c0_i32 = arith.constant 0 : i32
    %c0_i32_0 = arith.constant 0 : i32
    %c0_i32_1 = arith.constant 0 : i32
    return %c0_i32, %c0_i32_0 : i32, i32
  }
  func.func @transform_3(%arg0: i32) -> (i32, i32) {
    %c0_i32 = arith.constant 0 : i32
    %c0_i32_0 = arith.constant 0 : i32
    %c0_i32_1 = arith.constant 0 : i32
    return %c0_i32, %c0_i32_0 : i32, i32
  }
  func.func @transform_4(%arg0: i32) -> (i32, i32) {
    %c0_i32 = arith.constant 0 : i32
    %c0_i32_0 = arith.constant 0 : i32
    %c0_i32_1 = arith.constant 0 : i32
    return %c0_i32, %c0_i32_0 : i32, i32
  }
  func.func @transform_5(%arg0: i32) -> (i32, i32) {
    %c0_i32 = arith.constant 0 : i32
    %c0_i32_0 = arith.constant 0 : i32
    %c0_i32_1 = arith.constant 0 : i32
    return %c0_i32, %c0_i32_0 : i32, i32
  }
  func.func @transform_6(%arg0: i32) -> (i32, i32) {
    %c0_i32 = arith.constant 0 : i32
    %c0_i32_0 = arith.constant 0 : i32
    %c0_i32_1 = arith.constant 0 : i32
    return %c0_i32, %c0_i32_0 : i32, i32
  }
  func.func @transform_7(%arg0: i32) -> (i32, i32) {
    %c0_i32 = arith.constant 0 : i32
    %c0_i32_0 = arith.constant 0 : i32
    %c0_i32_1 = arith.constant 0 : i32
    return %c0_i32, %c0_i32_0 : i32, i32
  }
  func.func @transform_8(%arg0: i32) -> (i32, i32) {
    %c0_i32 = arith.constant 0 : i32
    %c0_i32_0 = arith.constant 0 : i32
    %c0_i32_1 = arith.constant 0 : i32
    return %c0_i32, %c0_i32_0 : i32, i32
  }
  func.func @transform_9(%arg0: i32) -> (i32, i32) {
    %c0_i32 = arith.constant 0 : i32
    %c0_i32_0 = arith.constant 0 : i32
    %c0_i32_1 = arith.constant 0 : i32
    return %c0_i32, %c0_i32_0 : i32, i32
  }
  func.func @transform_10(%arg0: i32) -> (i32, i32) {
    %c0_i32 = arith.constant 0 : i32
    %c0_i32_0 = arith.constant 0 : i32
    %c0_i32_1 = arith.constant 0 : i32
    return %c0_i32, %c0_i32_0 : i32, i32
  }
  func.func @transform_11(%arg0: i32) -> (i32, i32) {
    %c0_i32 = arith.constant 0 : i32
    %c0_i32_0 = arith.constant 0 : i32
    %c0_i32_1 = arith.constant 0 : i32
    return %c0_i32, %c0_i32_0 : i32, i32
  }
  func.func @transform_12(%arg0: i32) -> (i32, i32) {
    %c0_i32 = arith.constant 0 : i32
    %c0_i32_0 = arith.constant 0 : i32
    %c0_i32_1 = arith.constant 0 : i32
    return %c0_i32, %c0_i32_0 : i32, i32
  }
  func.func @transform_13(%arg0: i32) -> (i32, i32) {
    %c0_i32 = arith.constant 0 : i32
    %c0_i32_0 = arith.constant 0 : i32
    %c0_i32_1 = arith.constant 0 : i32
    return %c0_i32, %c0_i32_0 : i32, i32
  }
  func.func @transform_14(%arg0: i32) -> (i32, i32) {
    %c0_i32 = arith.constant 0 : i32
    %c0_i32_0 = arith.constant 0 : i32
    %c0_i32_1 = arith.constant 0 : i32
    return %c0_i32, %c0_i32_0 : i32, i32
  }
  func.func @transform_15(%arg0: i32) -> (i32, i32) {
    %c0_i32 = arith.constant 0 : i32
    %c0_i32_0 = arith.constant 0 : i32
    %c0_i32_1 = arith.constant 0 : i32
    return %c0_i32, %c0_i32_0 : i32, i32
  }
  func.func @transform_16(%arg0: i32) -> (i32, i32) {
    %c0_i32 = arith.constant 0 : i32
    %c0_i32_0 = arith.constant 0 : i32
    %c0_i32_1 = arith.constant 0 : i32
    return %c0_i32, %c0_i32_0 : i32, i32
  }
  func.func @transform_17(%arg0: i32) -> (i32, i32) {
    %c0_i32 = arith.constant 0 : i32
    %c0_i32_0 = arith.constant 0 : i32
    %c0_i32_1 = arith.constant 0 : i32
    return %c0_i32, %c0_i32_0 : i32, i32
  }
  func.func @transform_18(%arg0: i32) -> (i32, i32) {
    %c0_i32 = arith.constant 0 : i32
    %c0_i32_0 = arith.constant 0 : i32
    %c0_i32_1 = arith.constant 0 : i32
    return %c0_i32, %c0_i32_0 : i32, i32
  }
  func.func @transform_19(%arg0: i32) -> (i32, i32) {
    %c0_i32 = arith.constant 0 : i32
    %c0_i32_0 = arith.constant 0 : i32
    %c0_i32_1 = arith.constant 0 : i32
    return %c0_i32, %c0_i32_0 : i32, i32
  }
  func.func @transform_20(%arg0: i32) -> (i32, i32) {
    %c0_i32 = arith.constant 0 : i32
    %c0_i32_0 = arith.constant 0 : i32
    %c0_i32_1 = arith.constant 0 : i32
    return %c0_i32, %c0_i32_0 : i32, i32
  }
  func.func @transform_21(%arg0: i32) -> (i32, i32) {
    %c0_i32 = arith.constant 0 : i32
    %c0_i32_0 = arith.constant 0 : i32
    %c0_i32_1 = arith.constant 0 : i32
    return %c0_i32, %c0_i32_0 : i32, i32
  }
  func.func @transform_22(%arg0: i32) -> (i32, i32) {
    %c0_i32 = arith.constant 0 : i32
    %c0_i32_0 = arith.constant 0 : i32
    %c0_i32_1 = arith.constant 0 : i32
    return %c0_i32, %c0_i32_0 : i32, i32
  }
  func.func @transform_23(%arg0: i32) -> (i32, i32) {
    %c0_i32 = arith.constant 0 : i32
    %c0_i32_0 = arith.constant 0 : i32
    %c0_i32_1 = arith.constant 0 : i32
    return %c0_i32, %c0_i32_0 : i32, i32
  }
  func.func @transform_24(%arg0: i32) -> (i32, i32) {
    %c0_i32 = arith.constant 0 : i32
    %c0_i32_0 = arith.constant 0 : i32
    %c0_i32_1 = arith.constant 0 : i32
    return %c0_i32, %c0_i32_0 : i32, i32
  }
  func.func @transform_25(%arg0: i32) -> (i32, i32) {
    %c0_i32 = arith.constant 0 : i32
    %c0_i32_0 = arith.constant 0 : i32
    %c0_i32_1 = arith.constant 0 : i32
    return %c0_i32, %c0_i32_0 : i32, i32
  }
  func.func @transform_26(%arg0: i32) -> (i32, i32) {
    %c0_i32 = arith.constant 0 : i32
    %c0_i32_0 = arith.constant 0 : i32
    %c0_i32_1 = arith.constant 0 : i32
    return %c0_i32, %c0_i32_0 : i32, i32
  }
  func.func @transform_27(%arg0: i32) -> (i32, i32) {
    %c0_i32 = arith.constant 0 : i32
    %c0_i32_0 = arith.constant 0 : i32
    %c0_i32_1 = arith.constant 0 : i32
    return %c0_i32, %c0_i32_0 : i32, i32
  }
  func.func @transform_28(%arg0: i32) -> (i32, i32, i32) {
    %c0_i32 = arith.constant 0 : i32
    %c0_i32_0 = arith.constant 0 : i32
    %c0_i32_1 = arith.constant 0 : i32
    return %arg0, %c0_i32, %c0_i32_0 : i32, i32, i32
  }
}

</mosaic_0001>

<bundles_post_ra>
// kernel: conv_vgg_forward.1
= control target key start
LH: loop header
LB: loop body
LE: loop exit
PB: predicated region body
PF: predicated region fallthrough
CT: control target
= control target key end

     0   :  { %s8088_s0 = inlined_call_operand.vmem [shape: f32[2,32,96], index: 0, kind: input, shape index: {}]   ;;  %s8089_s1 = inlined_call_operand.hbm [shape: bf16[288,128], index: 1, kind: input, shape index: {}]   ;;  %s8090_s2 = inlined_call_operand.vmem [shape: f32[1,128], index: 2, kind: input, shape index: {}]   ;;  %s8091_s3 = inlined_call_operand.vmem [shape: bf16[384,128], index: 3, kind: input, shape index: {}]   ;;  %s8092_s4 = inlined_call_operand.vmem [shape: f32[1,128], index: 4, kind: input, shape index: {}]   ;;  %s8093_s5 = inlined_call_operand.hbm [shape: bf16[192,128], index: 5, kind: input, shape index: {}]   ;;  %s8094_s6 = inlined_call_operand.vmem [shape: f32[1,128], index: 6, kind: input, shape index: {}]   ;;  %s8095_s7 = inlined_call_operand.vmem [shape: bf16[384,128], index: 7, kind: input, shape index: {}]   ;;  %s8096_s8 = inlined_call_operand.vmem [shape: f32[1,128], index: 8, kind: input, shape index: {}]   ;;  %s8097_s9 = inlined_call_operand.hbm [shape: bf16[192,128], index: 9, kind: input, shape index: {}]   ;;  %s8098_s10 = inlined_call_operand.vmem [shape: f32[1,128], index: 10, kind: input, shape index: {}]   ;;  %s8099_s11 = inlined_call_operand.vmem [shape: bf16[384,128], index: 11, kind: input, shape index: {}]   ;;  %s8100_s12 = inlined_call_operand.vmem [shape: f32[1,128], index: 12, kind: input, shape index: {}]   ;;  %s8101_s13 = inlined_call_operand.vmem [shape: bf16[384,128], index: 13, kind: input, shape index: {}]   ;;  %s8102_s14 = inlined_call_operand.vmem [shape: f32[1,128], index: 14, kind: input, shape index: {}]   ;;  %s8103_s15 = inlined_call_operand.hbm [shape: bf16[192,128], index: 15, kind: input, shape index: {}]   ;;  %s8104_s16 = inlined_call_operand.vmem [shape: f32[1,128], index: 16, kind: input, shape index: {}]   ;;  %s8105_s17 = inlined_call_operand.vmem [shape: bf16[384,128], index: 17, kind: input, shape index: {}]   ;;  %s8106_s18 = inlined_call_operand.vmem [shape: f32[1,128], index: 18, kind: input, shape index: {}]   ;;  %s8107_s19 = inlined_call_operand.vmem [shape: bf16[384,128], index: 19, kind: input, shape index: {}]   ;;  %s8108_s20 = inlined_call_operand.vmem [shape: f32[1,128], index: 20, kind: input, shape index: {}]   ;;  %s8109_s21 = inlined_call_operand.vmem [shape: bf16[192,64], index: 21, kind: input, shape index: {}]   ;;  %s8110_s22 = inlined_call_operand.vmem [shape: f32[1,64], index: 22, kind: input, shape index: {}]   ;;  %s8111_s23 = inlined_call_operand.vmem [shape: bf16[192,64], index: 23, kind: input, shape index: {}]   ;;  %s8112_s24 = inlined_call_operand.vmem [shape: f32[1,64], index: 24, kind: input, shape index: {}]   ;;  %s8113_s25 = inlined_call_operand.vmem [shape: bf16[192,64], index: 25, kind: input, shape index: {}]   ;;  %s8114_s26 = inlined_call_operand.vmem [shape: f32[1,64], index: 26, kind: input, shape index: {}]   ;;  %s8115_s27 = inlined_call_operand.vmem [shape: bf16[64,10], index: 27, kind: input, shape index: {}]   ;;  %s8116_s28 = inlined_call_operand.hbm [shape: f32[2,1,10], index: 28, kind: output, shape index: {}]  }
   0x1   :  { %8121 = sst [smem:[#allocation15_spill]] %s8088_s0 }
   0x2   :  { %8122 = sst [smem:[#allocation16_spill]] %s8089_s1 }
   0x3   :  { %8123 = sst [smem:[#allocation17_spill]] %s8090_s2 }
   0x4   :  { %8124 = sst [smem:[#allocation18_spill]] %s8091_s3 }
   0x5   :  { %8125 = sst [smem:[#allocation19_spill]] %s8092_s4 }
   0x6   :  { %8126 = sst [smem:[#allocation20_spill]] %s8093_s5 }
   0x7   :  { %8127 = sst [smem:[#allocation21_spill]] %s8094_s6 }
   0x8   :  { %8128 = sst [smem:[#allocation22_spill]] %s8095_s7 }
   0x9   :  { %8129 = sst [smem:[#allocation23_spill]] %s8096_s8 }
   0xa   :  { %8130 = sst [smem:[#allocation24_spill]] %s8097_s9 }
   0xb   :  { %8131 = sst [smem:[#allocation25_spill]] %s8098_s10 }
   0xc   :  { %8132 = sst [smem:[#allocation26_spill]] %s8099_s11 }
   0xd   :  { %8133 = sst [smem:[#allocation27_spill]] %s8100_s12 }
   0xe   :  { %33 = vsyncpa [#allocation3], 0 }
   0xf   :  { %34 = vsyncpa [#allocation6], 0 }
  0x10   :  { %35 = vsyncpa [#allocation9], 0 }
  0x11   :  { %36 = vsyncpa [#allocation4], 0  ;;  %s6361_s8 = smov [#allocation5]   ;;  %s6362_s9 = smov [#allocation2]  }
  0x12   :  { %s62_s5 = sshll.u32 %s6361_s8, 4  ;;  %s44_s30 = sshll.u32 %s6362_s9, 4  ;;  %s63_s5 = int_to_ptr.vmem [resolvable:$true] %s62_s5  ;;  %s45_s30 = int_to_ptr.vmem [resolvable:$true] %s44_s30 }
  0x13   :  { %s6261_s3 = scalar_lea.vmem %s63_s5, 1536  ;;  %p6266_p1 = scmp.lt.s32.totalorder %s63_s5, %s63_s5 }
  0x14   :  { %p6262_p0 = scmp.ne.s32.totalorder %s63_s5, %s6261_s3  ;;  %p6267_p2 = scmp.lt.s32.totalorder %s6261_s3, %s6261_s3 }
  0x16   :  { %p6268_p3 = por %p6267_p2, %p6266_p1 }
  0x18   :  { %p6269_p4 = pnand %p6268_p3, %p6262_p0 }
  0x1a   :  { %6272 = shalt.err (!%p6269_p4)
}
  0x1b   :  { %s6363_s6 = smov 64   ;;  %s6364_s10 = smov 4  }
  0x1c   :  { %s8134_s29 = sld [smem:[#allocation20_spill]]  ;;  %s6281_s2 = scalar_lea.vmem %s45_s30, 2304 }
  0x1d   :  { %p6282_p5 = scmp.ne.s32.totalorder %s45_s30, %s6281_s2  ;;  %p6286_p6 = scmp.lt.s32.totalorder %s45_s30, %s45_s30 }
  0x1e   :  { %p6287_p7 = scmp.lt.s32.totalorder %s6281_s2, %s6281_s2 }
  0x20   :  { %p6288_p8 = por %p6287_p7, %p6286_p6 }
  0x22   :  { %68 = dma.hbm_to_vmem [thread:$0]  %s8134_s29, 1536, %s63_s5, [#allocation6], %s6363_s6, %s6363_s6, %s6364_s10  }
  0x23   :  { %p6289_p9 = pnand %p6288_p8, %p6282_p5 }
  0x25   :  { %6292 = shalt.err (!%p6289_p9)
}
  0x26   :  { %s8135_s1 = sld [smem:[#allocation16_spill]]  ;;  %s6365_s4 = smov [#allocation7]  }
  0x27   :  { %s80_s8 = sshll.u32 %s6365_s4, 4  ;;  %s6366_s9 = smov [#allocation8]   ;;  %s81_s8 = int_to_ptr.vmem [resolvable:$true] %s80_s8 }
  0x28   :  { %s102_s3 = sshll.u32 %s6366_s9, 4  ;;  %s6301_s5 = scalar_lea.vmem %s81_s8, 1536  ;;  %s103_s3 = int_to_ptr.vmem [resolvable:$true] %s102_s3 }
  0x29   :  { %p6302_p10 = scmp.ne.s32.totalorder %s81_s8, %s6301_s5  ;;  %p6306_p11 = scmp.lt.s32.totalorder %s81_s8, %s81_s8 }
  0x2a   :  { %p6307_p12 = scmp.lt.s32.totalorder %s6301_s5, %s6301_s5 }
  0x2c   :  { %50 = dma.hbm_to_vmem [thread:$0]  %s8135_s1, 2304, %s45_s30, [#allocation3], %s6363_s6, %s6363_s6, %s6364_s10  }
  0x2d   :  { %p6308_p13 = por %p6307_p12, %p6306_p11 }
  0x2f   :  { %p6309_p0 = pnand %p6308_p13, %p6302_p10 }
  0x31   :  { %6312 = shalt.err (!%p6309_p0)
}
  0x32   :  { %s8136_s29 = sld [smem:[#allocation24_spill]]  ;;  %s6321_s30 = scalar_lea.vmem %s103_s3, 1536 }
  0x33   :  { %p6322_p1 = scmp.ne.s32.totalorder %s103_s3, %s6321_s30  ;;  %p6326_p2 = scmp.lt.s32.totalorder %s103_s3, %s103_s3 }
  0x34   :  { %p6327_p3 = scmp.lt.s32.totalorder %s6321_s30, %s6321_s30 }
  0x36   :  { %p6328_p4 = por %p6327_p3, %p6326_p2 }
  0x38   :  { %86 = dma.hbm_to_vmem [thread:$0]  %s8136_s29, 1536, %s81_s8, [#allocation6], %s6363_s6, %s6363_s6, %s6364_s10  }
  0x39   :  { %p6329_p5 = pnand %p6328_p4, %p6322_p1 }
  0x3b   :  { %6332 = shalt.err (!%p6329_p5)
}
  0x3c   :  { %108 = dma.hbm_to_vmem [thread:$0]  %s8103_s15, 1536, %s103_s3, [#allocation9], %s6363_s6, %s6363_s6, %s6364_s10  }
  0x3d   :  { %6353 = dma.done.wait [#allocation3], 2304  }
  0x3e   :  { %6354 = vsyncadd [#allocation3], 4294964992 }
  0x3f   :  { %6355 = dma.done.wait [#allocation6], 3072  }
  0x40   :  { %6356 = vsyncadd [#allocation6], 4294964224 }
  0x41   :  { %6357 = dma.done.wait [#allocation9], 1536  }
  0x42   :  { %6358 = vsyncadd [#allocation9], 4294965760  ;;  %v249_v0 = vlaneseq  ;;  %s8137_s10 = sld [smem:[#allocation15_spill]]  ;;  %vm199_vm0 = vcmask 1040384   ;;  %vm224_vm1 = vcmask 1046528   ;;  %s6367_s2 = smov 96  }
  0x43   :  { %v6015_v27 = vld [vmem:[#allocation2 + $0x78] sm:$0xff]   ;;  %v6017_v40 = vld [vmem:[#allocation2 + $0x70] sm:$0xff]   ;;  %v6019_v48 = vld [vmem:[#allocation2 + $0x68] sm:$0xff]   ;;  %s8146_s8 = sld [smem:[#allocation18_spill]]  ;;  %vm354_vm6 = vcmask 785408   ;;  %vm363_vm7 = vcmask 523264  }
  0x44   :  { %v6550_v1 = vshrl.u32 %v249_v0, 7  ;;  %5238 = vmatprep.subr.bf16.mxu0 %v6015_v27  ;;  %v6016_v35 = vld [vmem:[#allocation2 + $0x38] sm:$0xff]   ;;  %v6018_v43 = vld [vmem:[#allocation2 + $0x30] sm:$0xff]   ;;  %v6020_v56 = vld [vmem:[#allocation2 + $0x28] sm:$0xff]   ;;  %vm498_vm8 = vcmask 261120   ;;  %s8147_s15 = sld [smem:[#allocation17_spill]] }
  0x45   :  { %5239 = vmatpush3.bf16.msra.mxu0 %v6016_v35  ;;  %v6021_v58 = vld [vmem:[#allocation2 + $0x60] sm:$0xff]   ;;  %v6023_v62 = vld [vmem:[#allocation2 + $0x58] sm:$0xff]   ;;  %vm6368_vm10 = vmmov 1   ;;  %s6369_s4 = smov 124   ;;  %s8149_s5 = sld [smem:[#allocation22_spill]] }
  0x46   :  { %v6553_v2 = vadd.s32 24, %v6550_v1  ;;  %v6556_v3 = vadd.s32 56, %v6550_v1  ;;  %5240 = vmatprep.subr.bf16.mxu0 %v6017_v40  ;;  %v6022_v61 = vld [vmem:[#allocation2 + $0x20] sm:$0xff]   ;;  %v258_v63 = vand.u32 31, %v6550_v1  ;;  %s8159_s9 = sld [smem:[#allocation23_spill]]  ;;  %s6373_s3 = smov 120  }
  0x47   :  { %s8160_s29 = sld [smem:[#allocation26_spill]] }
  0x48   :  { %v261_v4 = vand.u32 31, %v6553_v2  ;;  %v6562_v5 = vld [vmem:[%s8137_s10] sm:$0xff]  ;;  %v147_v6 = vld [vmem:[%s8137_s10 + $0x8] sm:$0xff]  ;;  %v148_v7 = vld [vmem:[%s8137_s10 + $0x10] sm:$0xff]  ;;  %v265_v12 = vand.u32 31, %v6556_v3  ;;  %vm6653_vm4 = vcmp.eq.s32.totalorder %v258_v63, 0 }
  0x49   :  { %v226_v8 = vrot.slane %v147_v6, 1  ;;  %v5960_v9 = vpack.i.bf16 %v147_v6, %v6562_v5  ;;  %v149_v10 = vld [vmem:[%s8137_s10 + $0x18] sm:$0xff]  ;;  %v150_v11 = vld [vmem:[%s8137_s10 + $0x20] sm:$0xff]  ;;  %v201_v13 = vrot.slane %v147_v6, 7  ;;  %v200_v14 = vrot.slane %v6562_v5, 7  ;;  %v6583_v17 = vld [vmem:[%s8137_s10 + $0x28] sm:$0xff]  ;;  %5241 = vmatpush3.bf16.msra.mxu0 %v6018_v43 }
  0x4a   :  { %v225_v15 = vrot.slane %v6562_v5, 1  ;;  %v228_v16 = vrot.slane %v148_v7, 1  ;;  %v230_v18 = vrot.slane %v149_v10, 1  ;;  %v232_v19 = vrot.slane %v150_v11, 1  ;;  %v6593_v21 = vld [vmem:[%s8137_s10 + $0x30] sm:$0xff]  ;;  %v153_v26 = vld [vmem:[%s8137_s10 + $0x38] sm:$0xff]  ;;  %5242 = vmatprep.subr.bf16.mxu0 %v6019_v48  ;;  %vm4877_vm9 = vmneg %vm6653_vm4 }
  0x4b   :  { %5961 = vrot.lane.b32.xlu0 %v5960_v9, %s6367_s2  ;;  %vm6586_vm2 = vcmp.eq.s32.totalorder %v261_v4, 31  ;;  %v205_v22 = vrot.slane %v149_v10, 7  ;;  %v207_v23 = vrot.slane %v150_v11, 7  ;;  %v203_v30 = vrot.slane %v148_v7, 7  ;;  %v6027_v6 = vld [vmem:[#allocation2 + $0x88] sm:$0xff]   ;;  %v6034_v35 = vld [vmem:[%s8146_s8 + $0x38] sm:$0xff]   ;;  %vm4878_vm11 = vmpackc.low %vm6368_vm10, %vm4877_vm9 }
  0x4c   :  { %v227_v24 = vsel %vm224_vm1, %v225_v15, %v226_v8  ;;  %v229_v25 = vsel %vm224_vm1, %v226_v8, %v228_v16  ;;  %v231_v28 = vsel %vm224_vm1, %v228_v16, %v230_v18  ;;  %v233_v29 = vsel %vm224_vm1, %v230_v18, %v232_v19  ;;  %5600 = vmatprep.subr.bf16.mxu1 %v6027_v6  ;;  %v6028_v18 = vld [vmem:[#allocation2 + $0x48] sm:$0xff]   ;;  %v6035_v40 = vld [vmem:[%s8146_s8 + $0x70] sm:$0xff]   ;;  %vm4885_vm12 = vmneg %vm6586_vm2  ;;  %s8148_s10 = sld [smem:[#allocation19_spill]] }
  0x4d   :  { %v5965_v31 = vpack.i.bf16 %v229_v25, %v227_v24  ;;  %v293_v32 = vsel %vm6586_vm2, 0.0, %v233_v29  ;;  %v209_v33 = vrot.slane %v6583_v17, 7  ;;  %v234_v34 = vrot.slane %v6583_v17, 1  ;;  %5243 = vmatpush3.bf16.msra.mxu0 %v6020_v56  ;;  %5601 = vmatpush3.bf16.msra.mxu1 %v6027_v6  ;;  %v6032_v24 = vld [vmem:[#allocation2] sm:$0xff]   ;;  %vm4886_vm13 = vmpackc.low %vm4885_vm12, %vm6368_vm10  ;;  %s8169_s0 = sld [smem:[#allocation25_spill]] }
  0x4e   :  { %v5970_v36 = vpack.i.bf16 %v293_v32, %v231_v28  ;;  %v5980_v37 = vpack.i.bf16 %v6583_v17, %v150_v11  ;;  %v236_v38 = vrot.slane %v6593_v21, 1  ;;  %v238_v39 = vrot.slane %v153_v26, 1  ;;  %5244 = vmatprep.subr.bf16.mxu0 %v6021_v58  ;;  %v6030_v11 = vld [vmem:[#allocation2 + $0x80] sm:$0xff]   ;;  %v6026_v17 = vld [vmem:[#allocation2 + $0x10] sm:$0xff]  }
  0x4f   :  { %5966 = vrot.lane.b32.xlu0 %v5965_v31, %s6363_s6  ;;  %v5975_v41 = vpack.i.bf16 %v149_v10, %v148_v7  ;;  %vm6609_vm3 = vcmp.eq.s32.totalorder %v265_v12, 31  ;;  %v6616_v44 = vsel %vm199_vm0, %v200_v14, %v201_v13  ;;  %v235_v45 = vsel %vm224_vm1, %v232_v19, %v234_v34  ;;  %v6024_v10 = vld [vmem:[#allocation2 + $0x18] sm:$0xff]   ;;  %5602 = vmatprep.subr.bf16.mxu1 %v6030_v11 }
  0x50   :  { %5971 = vrot.lane.b32.xlu1 %v5970_v36, %s6363_s6  ;;  %v239_v46 = vsel %vm224_vm1, %v236_v38, %v238_v39  ;;  %v248_v47 = vsel %vm224_vm1, %v238_v39, 0.0  ;;  %v6623_v49 = vsel %vm199_vm0, %v201_v13, %v203_v30  ;;  %v237_v50 = vsel %vm224_vm1, %v234_v34, %v236_v38  ;;  %v6025_v13 = vld [vmem:[#allocation2 + $0x50] sm:$0xff]   ;;  %vm4889_vm2 = vmneg %vm6609_vm3 }
  0x51   :  { %v297_v51 = vsel %vm6609_vm3, 0.0, %v248_v47  ;;  %v6629_v52 = vsel %vm199_vm0, %v203_v30, %v205_v22  ;;  %v6632_v53 = vsel %vm199_vm0, %v205_v22, %v207_v23  ;;  %v6636_v55 = vsel %vm199_vm0, %v207_v23, %v209_v33  ;;  %5245 = vmatpush3.bf16.msra.mxu0 %v6022_v61  ;;  %5603 = vmatpush3.bf16.msra.mxu1 %v6030_v11  ;;  %v6029_v22 = vld [vmem:[#allocation2 + $0x8] sm:$0xff]  }
  0x52   :  { %v5990_v54 = vpack.i.bf16 %v297_v51, %v239_v46  ;;  %v5985_v57 = vpack.i.bf16 %v237_v50, %v235_v45  ;;  %v211_v59 = vrot.slane %v6593_v21, 7  ;;  %v213_v60 = vrot.slane %v153_v26, 7  ;;  %5246 = vmatprep.subr.bf16.mxu0 %v6023_v62  ;;  %v6036_v50 = vld [vmem:[%s8146_s8 + $0x30] sm:$0xff]  }
  0x53   :  { %5981 = vrot.lane.b32.xlu0 %v5980_v37, %s6367_s2  ;;  %v5995_v4 = vpack.i.bf16 %v153_v26, %v6593_v21  ;;  %v6645_v7 = vadd.s32 32, %v6550_v1  ;;  %v223_v16 = vsel %vm199_vm0, 0.0, %v200_v14  ;;  %v6033_v21 = vld [vmem:[%s8146_s8 + $0x78] sm:$0xff]   ;;  %v6031_v14 = vld [vmem:[#allocation2 + $0x40] sm:$0xff]  }
  0x54   :  { %5976 = vrot.lane.b32.xlu1 %v5975_v41, %s6367_s2  ;;  %v6648_v8 = vsel %vm199_vm0, %v209_v33, %v211_v59  ;;  %v6651_v9 = vsel %vm199_vm0, %v211_v59, %v213_v60  ;;  %v274_v5 = vsel %vm6653_vm4, 0.0, %v223_v16  ;;  %5284 = vmatprep.subr.bf16.mxu1 %v6033_v21  ;;  %vm4890_vm4 = vmpackc.low %vm4889_vm2, %vm6368_vm10 }
  0x55   :  { %v262_v15 = vand.u32 31, %v6645_v7  ;;  %5247 = vmatpush3.bf16.msra.mxu0 %v6024_v10 }
  0x56   :  { %5248 = vmatprep.subr.bf16.mxu0 %v6025_v13 }
  0x57   :  { %5991 = vrot.lane.b32.xlu0 %v5990_v54, %s6363_s6  ;;  %vm6662_vm5 = vcmp.eq.s32.totalorder %v262_v15, 0 }
  0x58   :  { %5986 = vrot.lane.b32.xlu1 %v5985_v57, %s6363_s6  ;;  %v278_v23 = vsel %vm6662_vm5, 0.0, %v6632_v53  ;;  %v6037_v57 = vld [vmem:[%s8146_s8 + $0x68] sm:$0xff]   ;;  %vm4881_vm14 = vmneg %vm6662_vm5 }
  0x59   :  { %5249 = vmatpush3.bf16.msra.mxu0 %v6026_v17  ;;  %v6038_v17 = vld [vmem:[%s8146_s8 + $0x28] sm:$0xff]   ;;  %vm4882_vm15 = vmpackc.low %vm6368_vm10, %vm4881_vm14 }
  0x5a   :  { %5250 = vmatprep.subr.bf16.mxu0 %v6028_v18 }
  0x5c   :  { %5996 = vrot.lane.b32.xlu1 %v5995_v4, %s6367_s2 }
  0x5d   :  { %5251 = vmatpush3.bf16.msra.mxu0 %v6029_v22 }
  0x5e   :  { %5252 = vmatprep.subr.bf16.mxu0 %v6031_v14 }
  0x61   :  { %5253 = vmatpush3.bf16.msra.mxu0 %v6032_v24 }
  0xbd   :  { %v5962_v25 = vpop.permute.xlu0 %5961 }
  0xbe   :  { %v5964_v26 = vunpack.i.h.bf16 %v5962_v25  ;;  %v5963_v27 = vunpack.i.l.bf16 %v5962_v25 }
  0xc0   :  { %v355_v28 = vsel %vm354_vm6, %v274_v5, %v5963_v27  ;;  %v356_v29 = vsel %vm354_vm6, %v6616_v44, %v5964_v26 }
  0xc1   :  { %v5967_v30 = vpop.permute.xlu0 %5966  ;;  %v372_v31 = vpack.c.bf16 %v356_v29, %v355_v28  ;;  %v6039_v29 = vld [vmem:[%s8146_s8 + $0x60] sm:$0xff]  }
  0xc2   :  { %v5969_v32 = vunpack.i.h.bf16 %v5967_v30  ;;  %v5968_v33 = vunpack.i.l.bf16 %v5967_v30  ;;  %v5972_v34 = vpop.permute.xlu1 %5971  ;;  %v6042_v30 = vld [vmem:[%s8146_s8 + $0x58] sm:$0xff]  }
  0xc3   :  { %v5974_v36 = vunpack.i.h.bf16 %v5972_v34  ;;  %v5973_v37 = vunpack.i.l.bf16 %v5972_v34  ;;  %v6046_v34 = vld [vmem:[%s8146_s8 + $0xa8] sm:$0xff]  }
  0xc4   :  { %v374_v38 = vpack.c.bf16 %v5969_v32, %v5968_v33  ;;  %v364_v39 = vsel %vm363_vm7, %v5963_v27, %v5968_v33  ;;  %v365_v41 = vsel %vm363_vm7, %v5964_v26, %v5969_v32  ;;  %v6044_v32 = vld [vmem:[%s8146_s8 + $0x18] sm:$0xff]   ;;  %v6045_v33 = vld [vmem:[%s8146_s8 + $0x50] sm:$0xff]  }
  0xc5   :  { %v5982_v43 = vpop.permute.xlu0 %5981  ;;  %v377_v44 = vpack.c.bf16 %v5974_v36, %v5973_v37  ;;  %v373_v45 = vpack.c.bf16 %v365_v41, %v364_v39  ;;  %v6051_v39 = vld [vmem:[%s8146_s8 + $0x40] sm:$0xff]  }
  0xc6   :  { %5604 = vmatprep.mubr.msk.bf16.mxu1 %vm498_vm8, %v374_v38  ;;  %v5984_v46 = vunpack.i.h.bf16 %v5982_v43  ;;  %v5983_v47 = vunpack.i.l.bf16 %v5982_v43  ;;  %v5977_v48 = vpop.permute.xlu1 %5976  ;;  %v6050_v38 = vld [vmem:[%s8146_s8 + $0x8] sm:$0xff]   ;;  %v6053_v41 = vld [vmem:[%s8146_s8] sm:$0xff]   ;;  %v6054_v43 = vld [vmem:[%s8146_s8 + $0x90] sm:$0xff]  }
  0xc7   :  { %v5979_v51 = vunpack.i.h.bf16 %v5977_v48  ;;  %v5978_v53 = vunpack.i.l.bf16 %v5977_v48  ;;  %543 = vmatprep.mubr.bf16.mxu0 %v373_v45  ;;  %5605 = vmatmul.mubr.msk.bf16.vlgmr.msra.gmra.mxu1 %vm498_vm8, %v377_v44  ;;  %v6055_v44 = vld [vmem:[%s8146_s8 + $0x88] sm:$0xff]   ;;  %v6056_v45 = vld [vmem:[%s8146_s8 + $0x80] sm:$0xff]  }
  0xc8   :  { %v359_v54 = vsel %vm354_vm6, %v278_v23, %v5983_v47  ;;  %v360_v56 = vsel %vm354_vm6, %v6636_v55, %v5984_v46  ;;  %544 = vmatmul.mubr.bf16.vlgmr.msra.gmra.mxu0 %v372_v31  ;;  %5285 = vmatpush3.bf16.msra.mxu1 %v6034_v35  ;;  %v6043_v31 = vld [vmem:[%s8146_s8 + $0xb0] sm:$0xff]  }
  0xc9   :  { %v5992_v58 = vpop.permute.xlu0 %5991  ;;  %v378_v59 = vpack.c.bf16 %v360_v56, %v359_v54  ;;  %v366_v60 = vsel %vm363_vm7, %v5978_v53, %v5973_v37  ;;  %v367_v61 = vsel %vm363_vm7, %v5979_v51, %v5974_v36  ;;  %v357_v62 = vsel %vm354_vm6, %v6623_v49, %v5978_v53  ;;  %5286 = vmatprep.subr.bf16.mxu1 %v6035_v40  ;;  %v6047_v35 = vld [vmem:[%s8146_s8 + $0x10] sm:$0xff]   ;;  %v6048_v36 = vld [vmem:[%s8146_s8 + $0x48] sm:$0xff]   ;;  %v6049_v37 = vld [vmem:[%s8146_s8 + $0xa0] sm:$0xff]  }
  0xca   :  { %v358_v63 = vsel %vm354_vm6, %v6629_v52, %v5979_v51  ;;  %v376_v55 = vpack.c.bf16 %v367_v61, %v366_v60  ;;  %v5987_v4 = vpop.permute.xlu1 %5986  ;;  %v5994_v10 = vunpack.i.h.bf16 %v5992_v58  ;;  %v5993_v11 = vunpack.i.l.bf16 %v5992_v58  ;;  %v6052_v40 = vld [vmem:[%s8146_s8 + $0x98] sm:$0xff]  }
  0xcb   :  { %v375_v6 = vpack.c.bf16 %v358_v63, %v357_v62  ;;  %v5989_v13 = vunpack.i.h.bf16 %v5987_v4  ;;  %v5988_v15 = vunpack.i.l.bf16 %v5987_v4 }
  0xcc   :  { %551 = vmatprep.mubr.bf16.mxu0 %v376_v55  ;;  %v383_v16 = vpack.c.bf16 %v5994_v10, %v5993_v11  ;;  %5287 = vmatpush3.bf16.msra.mxu1 %v6036_v50  ;;  %v6772_v50 = vld [vmem:[%s8147_s15] ss:$0 sm:$0xff] }
  0xcd   :  { %v380_v18 = vpack.c.bf16 %v5989_v13, %v5988_v15  ;;  %v368_v49 = vsel %vm363_vm7, %v5983_v47, %v5988_v15  ;;  %v369_v52 = vsel %vm363_vm7, %v5984_v46, %v5989_v13  ;;  %5288 = vmatprep.subr.bf16.mxu1 %v6037_v57 }
  0xce   :  { %v5997_v21 = vpop.permute.xlu1 %5996  ;;  %v379_v22 = vpack.c.bf16 %v369_v52, %v368_v49 }
  0xcf   :  { %5608 = vmatprep.mubr.msk.bf16.mxu1 %vm498_vm8, %v380_v18  ;;  %v5999_v5 = vunpack.i.h.bf16 %v5997_v21  ;;  %v5998_v14 = vunpack.i.l.bf16 %v5997_v21 }
  0xd0   :  { %552 = vmatmul.mubr.bf16.gmra.mxu0 %v375_v6  ;;  %5609 = vmatmul.mubr.msk.bf16.gmra.mxu1 %vm498_vm8, %v383_v16 }
  0xd1   :  { %559 = vmatprep.mubr.bf16.mxu0 %v379_v22  ;;  %v361_v23 = vsel %vm354_vm6, %v6648_v8, %v5998_v14  ;;  %v362_v24 = vsel %vm354_vm6, %v6651_v9, %v5999_v5  ;;  %v370_v25 = vsel %vm363_vm7, %v5998_v14, %v5993_v11  ;;  %v371_v26 = vsel %vm363_vm7, %v5999_v5, %v5994_v10  ;;  %v6040_v8 = vld [vmem:[%s8146_s8 + $0xb8] sm:$0xff]   ;;  %v6041_v9 = vld [vmem:[%s8146_s8 + $0x20] sm:$0xff]   ;;  %s8174_s8 = sld [smem:[#allocation27_spill]] }
  0xd2   :  { %v381_v27 = vpack.c.bf16 %v362_v24, %v361_v23  ;;  %5289 = vmatpush3.bf16.msra.mxu1 %v6038_v17  ;;  %v382_v28 = vpack.c.bf16 %v371_v26, %v370_v25  ;;  %5612 = vmatprep.subr.bf16.mxu0 %v6040_v8 }
  0xd3   :  { %5290 = vmatprep.subr.bf16.mxu1 %v6039_v29  ;;  %5613 = vmatpush3.bf16.msra.mxu0 %v6040_v8 }
  0xd4   :  { %5614 = vmatprep.subr.bf16.mxu0 %v6043_v31 }
  0xd6   :  { %5291 = vmatpush3.bf16.msra.mxu1 %v6041_v9 }
  0xd7   :  { %5292 = vmatprep.subr.bf16.mxu1 %v6042_v30  ;;  %5615 = vmatpush3.bf16.msra.mxu0 %v6043_v31 }
  0xd8   :  { %560 = vmatmul.mubr.bf16.gmra.mxu0 %v378_v59  ;;  %5616 = vmatprep.subr.bf16.mxu0 %v6046_v34 }
  0xd9   :  { %567 = vmatprep.mubr.bf16.mxu0 %v382_v28 }
  0xda   :  { %5293 = vmatpush3.bf16.msra.mxu1 %v6044_v32 }
  0xdb   :  { %5294 = vmatprep.subr.bf16.mxu1 %v6045_v33  ;;  %5617 = vmatpush3.bf16.msra.mxu0 %v6046_v34 }
  0xdc   :  { %5618 = vmatprep.subr.bf16.mxu0 %v6049_v37 }
  0xde   :  { %5295 = vmatpush3.bf16.msra.mxu1 %v6047_v35 }
  0xdf   :  { %5296 = vmatprep.subr.bf16.mxu1 %v6048_v36  ;;  %5619 = vmatpush3.bf16.msra.mxu0 %v6049_v37 }
  0xe0   :  { %568 = vmatmul.mubr.bf16.gmra.mxu0 %v381_v27  ;;  %5620 = vmatprep.subr.bf16.mxu0 %v6052_v40 }
  0xe2   :  { %5297 = vmatpush3.bf16.msra.mxu1 %v6050_v38 }
  0xe3   :  { %5298 = vmatprep.subr.bf16.mxu1 %v6051_v39  ;;  %5621 = vmatpush3.bf16.msra.mxu0 %v6052_v40 }
  0xe4   :  { %5622 = vmatprep.subr.bf16.mxu0 %v6054_v43 }
  0xe6   :  { %5299 = vmatpush3.bf16.msra.mxu1 %v6053_v41 }
  0xe7   :  { %5623 = vmatpush3.bf16.msra.mxu0 %v6054_v43 }
  0xe8   :  { %5624 = vmatprep.subr.bf16.mxu0 %v6055_v44 }
  0xeb   :  { %5625 = vmatpush3.bf16.msra.mxu0 %v6055_v44 }
  0xec   :  { %5626 = vmatprep.subr.bf16.mxu0 %v6056_v45 }
  0xef   :  { %5627 = vmatpush3.bf16.msra.mxu0 %v6056_v45 }
 0x187   :  { %v5606_v46 = vpop.f32.mrf.mxu1 }
 0x188   :  { %v5254_v47 = vpop.f32.mrf.mxu0 }
 0x189   :  { %v610_v48 = vpop.f32.mrf.mxu1 }
 0x18a   :  { %v5255_v51 = vpop.f32.mrf.mxu0 }
 0x18b   :  { %v5256_v53 = vadd.f32 %v5255_v51, %v5254_v47  ;;  %v5607_v57 = vpop.f32.mrf.mxu1 }
 0x18c   :  { %v5257_v54 = vpop.f32.mrf.mxu0 }
 0x18d   :  { %v546_v56 = vadd.f32 %v5256_v53, %v6772_v50  ;;  %v613_v55 = vpop.f32.mrf.mxu1 }
 0x18e   :  { %v5258_v58 = vpop.f32.mrf.mxu0 }
 0x18f   :  { %v611_v59 = vadd.f32 %v610_v48, %v546_v56  ;;  %v5259_v60 = vadd.f32 %v5258_v58, %v5257_v54 }
 0x190   :  { %v5260_v61 = vpop.f32.mrf.mxu0  ;;  %v5610_v18 = vpop.f32.mrf.mxu1 }
 0x191   :  { %v641_v62 = vmax.f32 %v611_v59, 0.0  ;;  %v549_v63 = vadd.f32 %v5259_v60, %v6772_v50 }
 0x192   :  { %v5261_v4 = vpop.f32.mrf.mxu0  ;;  %v626_v27 = vpop.f32.mrf.mxu1 }
 0x193   :  { %v614_v6 = vadd.f32 %v613_v55, %v549_v63  ;;  %v5262_v10 = vadd.f32 %v5261_v4, %v5260_v61  ;;  %v706_v11 = vrot.slane %v641_v62, 7  ;;  %v730_v9 = vrot.slane %v641_v62, 1 }
 0x194   :  { %v5263_v13 = vpop.f32.mrf.mxu0  ;;  %v5611_v36 = vpop.f32.mrf.mxu1 }
 0x195   :  { %v642_v15 = vmax.f32 %v614_v6, 0.0  ;;  %v554_v16 = vadd.f32 %v5262_v10, %v6772_v50  ;;  %v729_v5 = vsel %vm199_vm0, 0.0, %v706_v11 }
 0x196   :  { %v5264_v17 = vpop.f32.mrf.mxu0  ;;  %v629_v51 = vpop.f32.mrf.mxu1 }
 0x197   :  { %v707_v49 = vrot.slane %v642_v15, 7  ;;  %v619_v52 = vadd.f32 %v5606_v46, %v554_v16  ;;  %v5265_v21 = vadd.f32 %v5264_v17, %v5263_v13  ;;  %v771_v22 = vpack.c.bf16 %v642_v15, %v641_v62 }
 0x198   :  { %v5266_v14 = vpop.f32.mrf.mxu0  ;;  %v731_v12 = vrot.slane %v642_v15, 1 }
 0x199   :  { %v708_v23 = vsel %vm199_vm0, %v706_v11, %v707_v49  ;;  %v643_v24 = vmax.f32 %v619_v52, 0.0  ;;  %v557_v25 = vadd.f32 %v5265_v21, %v6772_v50  ;;  %964 = vmatprep.mubr.bf16.mxu1 %v771_v22 }
 0x19a   :  { %v4879_v26 = vpack.c.bf16 %v708_v23, %v729_v5  ;;  %v5267_v28 = vpop.f32.mrf.mxu0  ;;  %v732_v34 = vsel %vm224_vm1, %v730_v9, %v731_v12 }
 0x19b   :  { %v622_v29 = vadd.f32 %v5607_v57, %v557_v25  ;;  %v5268_v8 = vadd.f32 %v5267_v28, %v5266_v14  ;;  %v733_v30 = vrot.slane %v643_v24, 1  ;;  %v709_v43 = vrot.slane %v643_v24, 7 }
 0x19c   :  { %v5269_v31 = vpop.f32.mrf.mxu0  ;;  %4880 = vmatmul.mubr.msk.bf16.vlgmr.msra.gmra.mxu1 %vm4878_vm11, %v4879_v26 }
 0x19d   :  { %v644_v32 = vmax.f32 %v622_v29, 0.0  ;;  %v562_v33 = vadd.f32 %v5268_v8, %v6772_v50  ;;  %v734_v35 = vsel %vm224_vm1, %v731_v12, %v733_v30  ;;  %v710_v59 = vsel %vm199_vm0, %v707_v49, %v709_v43 }
 0x19e   :  { %v5270_v37 = vpop.f32.mrf.mxu0  ;;  %v772_v38 = vpack.c.bf16 %v734_v35, %v732_v34 }
 0x19f   :  { %v627_v39 = vadd.f32 %v626_v27, %v562_v33  ;;  %v5271_v40 = vadd.f32 %v5270_v37, %v5269_v31  ;;  %v774_v41 = vpack.c.bf16 %v644_v32, %v643_v24  ;;  %v711_v45 = vrot.slane %v644_v32, 7 }
 0x1a0   :  { %v5272_v44 = vpop.f32.mrf.mxu0  ;;  %5628 = vmatprep.mubr.bf16.mxu0 %v772_v38  ;;  %v735_v46 = vrot.slane %v644_v32, 1 }
 0x1a1   :  { %v645_v47 = vmax.f32 %v627_v39, 0.0  ;;  %v565_v48 = vadd.f32 %v5271_v40, %v6772_v50  ;;  %972 = vmatprep.mubr.bf16.mxu1 %v774_v41  ;;  %v712_v54 = vsel %vm199_vm0, %v709_v43, %v711_v45 }
 0x1a2   :  { %v5273_v53 = vpop.f32.mrf.mxu0  ;;  %v773_v62 = vpack.c.bf16 %v712_v54, %v710_v59  ;;  %v736_v20 = vsel %vm224_vm1, %v733_v30, %v735_v46  ;;  %v4852_v59 = vld [vmem:[%s8148_s10] ss:$0 sm:$0xff]  ;;  %s8158_s10 = sld [smem:[#allocation21_spill]] }
 0x1a3   :  { %v737_v56 = vrot.slane %v645_v47, 1  ;;  %v630_v57 = vadd.f32 %v629_v51, %v565_v48  ;;  %v5274_v58 = vadd.f32 %v5273_v53, %v5272_v44  ;;  %v713_v60 = vrot.slane %v645_v47, 7 }
 0x1a4   :  { %v5275_v61 = vpop.f32.mrf.mxu0  ;;  %973 = vmatmul.mubr.bf16.gmra.mxu1 %v773_v62 }
 0x1a5   :  { %v738_v63 = vsel %vm224_vm1, %v735_v46, %v737_v56  ;;  %v646_v55 = vmax.f32 %v630_v57, 0.0  ;;  %v570_v4 = vadd.f32 %v5274_v58, %v6772_v50  ;;  %v714_v17 = vsel %vm199_vm0, %v711_v45, %v713_v60 }
 0x1a6   :  { %v4887_v6 = vpack.c.bf16 %v738_v63, %v736_v20  ;;  %v5276_v10 = vpop.f32.mrf.mxu0 }
 0x1a7   :  { %v715_v11 = vrot.slane %v646_v55, 7  ;;  %v635_v13 = vadd.f32 %v5610_v18, %v570_v4  ;;  %v5277_v15 = vadd.f32 %v5276_v10, %v5275_v61  ;;  %v777_v16 = vpack.c.bf16 %v646_v55, %v645_v47 }
 0x1a8   :  { %5629 = vmatmul.mubr.msk.bf16.vlgmr.msra.gmra.mxu0 %vm4886_vm13, %v4887_v6  ;;  %v739_v22 = vrot.slane %v646_v55, 1 }
 0x1a9   :  { %v647_v49 = vmax.f32 %v635_v13, 0.0  ;;  %v573_v52 = vadd.f32 %v5277_v15, %v6772_v50  ;;  %980 = vmatprep.mubr.bf16.mxu1 %v777_v16  ;;  %v716_v21 = vsel %vm199_vm0, %v713_v60, %v715_v11 }
 0x1aa   :  { %v4883_v5 = vpack.c.bf16 %v716_v21, %v714_v17  ;;  %v740_v24 = vsel %vm224_vm1, %v737_v56, %v739_v22 }
 0x1ab   :  { %v638_v14 = vadd.f32 %v5611_v36, %v573_v52  ;;  %v741_v18 = vrot.slane %v647_v49, 1  ;;  %v717_v12 = vrot.slane %v647_v49, 7 }
 0x1ac   :  { %4884 = vmatmul.mubr.msk.bf16.gmra.mxu1 %vm4882_vm15, %v4883_v5 }
 0x1ad   :  { %v648_v23 = vmax.f32 %v638_v14, 0.0  ;;  %v742_v25 = vsel %vm224_vm1, %v739_v22, %v741_v18  ;;  %v718_v28 = vsel %vm199_vm0, %v715_v11, %v717_v12 }
 0x1ae   :  { %v778_v19 = vpack.c.bf16 %v742_v25, %v740_v24 }
 0x1af   :  { %v743_v50 = vrot.slane %v648_v23, 1  ;;  %v780_v26 = vpack.c.bf16 %v648_v23, %v647_v49  ;;  %v719_v27 = vrot.slane %v648_v23, 7 }
 0x1b0   :  { %5632 = vmatprep.mubr.bf16.mxu0 %v778_v19 }
 0x1b1   :  { %988 = vmatprep.mubr.bf16.mxu1 %v780_v26  ;;  %v720_v29 = vsel %vm199_vm0, %v717_v12, %v719_v27  ;;  %v744_v8 = vsel %vm224_vm1, %v741_v18, %v743_v50  ;;  %v753_v9 = vsel %vm224_vm1, %v743_v50, 0.0 }
 0x1b2   :  { %v779_v30 = vpack.c.bf16 %v720_v29, %v718_v28  ;;  %v4891_v31 = vpack.c.bf16 %v753_v9, %v744_v8  ;;  %v6852_v9 = vand.u32 127, %v249_v0 }
 0x1b4   :  { %5633 = vmatmul.mubr.msk.bf16.gmra.mxu0 %vm4890_vm4, %v4891_v31  ;;  %989 = vmatmul.mubr.bf16.gmra.mxu1 %v779_v30  ;;  %v1161_v30 = vmul.u32 2, %v6550_v1  ;;  %v6370_v31 = vmov 0.0  }
 0x1b6   :  { %vm1165_vm3 = vcmp.eq.s32.totalorder %v6852_v9, %v1161_v30 }
 0x25c   :  { %v5300_v42 = vpop.f32.mrf.mxu1 }
 0x25e   :  { %v5301_v32 = vpop.f32.mrf.mxu1 }
 0x25f   :  { %v5302_v17 = vadd.f32 %v5301_v32, %v5300_v42  ;;  %v6865_v42 = vsel %vm1165_vm3, 1.0, %v6370_v31  ;;  %v6869_v32 = vmul.u32 2, %v6852_v9 }
 0x260   :  { %v5303_v33 = vpop.f32.mrf.mxu1  ;;  %5652 = vmatprep.mubr.msk.f32.mxu1 %vm363_vm7, %v6865_v42 }
 0x261   :  { %v967_v24 = vadd.f32 %v5302_v17, %v4852_v59 }
 0x262   :  { %v5304_v34 = vpop.f32.mrf.mxu1 }
 0x263   :  { %v5305_v25 = vadd.f32 %v5304_v34, %v5303_v33  ;;  %v1182_v33 = vand.u32 3, %v6852_v9 }
 0x264   :  { %v5306_v35 = vpop.f32.mrf.mxu1 }
 0x265   :  { %v970_v27 = vadd.f32 %v5305_v25, %v4852_v59  ;;  %v6878_v34 = vsub.s32 %v6869_v32, %v1182_v33 }
 0x266   :  { %v5307_v36 = vpop.f32.mrf.mxu1 }
 0x267   :  { %v5308_v58 = vadd.f32 %v5307_v36, %v5306_v35  ;;  %v6881_v35 = vadd.s32 120, %v6550_v1  ;;  %v6884_v36 = vadd.s32 112, %v6550_v1  ;;  %vm1191_vm4 = vcmp.eq.s32.totalorder %v6556_v3, %v6878_v34 }
 0x268   :  { %v5630_v37 = vpop.f32.mrf.mxu0  ;;  %v5309_v38 = vpop.f32.mrf.mxu1 }
 0x269   :  { %v975_v10 = vadd.f32 %v5308_v58, %v4852_v59  ;;  %vm1199_vm5 = vcmp.eq.s32.totalorder %v6881_v35, %v6878_v34  ;;  %vm1198_vm9 = vcmp.eq.s32.totalorder %v6884_v36, %v6878_v34 }
 0x26a   :  { %v1031_v39 = vpop.f32.mrf.mxu0  ;;  %v5310_v40 = vpop.f32.mrf.mxu1 }
 0x26b   :  { %v5311_v11 = vadd.f32 %v5310_v40, %v5309_v38  ;;  %v6823_v22 = vadd.f32 %v5630_v37, %v975_v10  ;;  %v6835_v12 = vadd.f32 %v1031_v39, %v967_v24  ;;  %v6887_v37 = vadd.s32 104, %v6550_v1 }
 0x26c   :  { %v5312_v41 = vpop.f32.mrf.mxu1  ;;  %v5631_v43 = vpop.f32.mrf.mxu0  ;;  %v6894_v38 = vadd.s32 96, %v6550_v1  ;;  %v6371_v39 = vmov 1.0   ;;  %v6901_v40 = vadd.s32 88, %v6550_v1 }
 0x26d   :  { %v978_v5 = vadd.f32 %v5311_v11, %v4852_v59  ;;  %v1064_v19 = vmax.f32 %v6823_v22, 0.0  ;;  %v1062_v28 = vmax.f32 %v6835_v12, 0.0  ;;  %5658 = vmatprep.subr.msk.mxu0 %vm1199_vm5, %v6371_v39  ;;  %vm1197_vm11 = vcmp.eq.s32.totalorder %v6887_v37, %v6878_v34 }
 0x26e   :  { %v5313_v44 = vpop.f32.mrf.mxu1  ;;  %v1034_v45 = vpop.f32.mrf.mxu0  ;;  %5659 = vmatpush3.msk.msra.mxu0 %vm1199_vm5, %v6371_v39  ;;  %vm1196_vm12 = vcmp.eq.s32.totalorder %v6894_v38, %v6878_v34  ;;  %vm1195_vm13 = vcmp.eq.s32.totalorder %v6901_v40, %v6878_v34  ;;  %v6993_v22 = vadd.s32 8, %v6550_v1 }
 0x26f   :  { %v5314_v56 = vadd.f32 %v5313_v44, %v5312_v41  ;;  %v6838_v50 = vadd.f32 %v5631_v43, %v978_v5  ;;  %v6849_v8 = vadd.f32 %v1034_v45, %v970_v27  ;;  %5660 = vmatprep.subr.msk.mxu0 %vm1198_vm9, %v6371_v39  ;;  %v6908_v41 = vadd.s32 80, %v6550_v1 }
 0x270   :  { %v5315_v46 = vpop.f32.mrf.mxu1  ;;  %5661 = vmatpush3.msk.msra.mxu0 %vm1198_vm9, %v6371_v39  ;;  %v6915_v43 = vadd.s32 72, %v6550_v1  ;;  %v6922_v44 = vadd.s32 64, %v6550_v1  ;;  %v6933_v45 = vadd.s32 48, %v6550_v1  ;;  %vm1188_vm9 = vcmp.eq.s32.totalorder %v6645_v7, %v6878_v34 }
 0x271   :  { %v983_v20 = vadd.f32 %v5314_v56, %v4852_v59  ;;  %v1065_v29 = vmax.f32 %v6838_v50, 0.0  ;;  %v1063_v0 = vmax.f32 %v6849_v8, 0.0  ;;  %5662 = vmatprep.subr.msk.mxu0 %vm1197_vm11, %v6371_v39  ;;  %vm1194_vm14 = vcmp.eq.s32.totalorder %v6908_v41, %v6878_v34 }
 0x272   :  { %v5316_v47 = vpop.f32.mrf.mxu1  ;;  %5663 = vmatpush3.msk.msra.mxu0 %vm1197_vm11, %v6371_v39  ;;  %vm1193_vm15 = vcmp.eq.s32.totalorder %v6915_v43, %v6878_v34  ;;  %vm1192_vm2 = vcmp.eq.s32.totalorder %v6922_v44, %v6878_v34  ;;  %vm1190_vm3 = vcmp.eq.s32.totalorder %v6933_v45, %v6878_v34  ;;  %vm1187_vm11 = vcmp.eq.s32.totalorder %v6553_v2, %v6878_v34 }
 0x273   :  { %v5317_v55 = vadd.f32 %v5316_v47, %v5315_v46  ;;  %5664 = vmatprep.subr.msk.mxu0 %vm1196_vm12, %v6371_v39  ;;  %v6940_v46 = vadd.s32 40, %v6550_v1  ;;  %v6956_v47 = vadd.s32 16, %v6550_v1 }
 0x274   :  { %v5634_v48 = vpop.f32.mrf.mxu0  ;;  %v5318_v51 = vpop.f32.mrf.mxu1  ;;  %5665 = vmatpush3.msk.msra.mxu0 %vm1196_vm12, %v6371_v39 }
 0x275   :  { %v986_v52 = vadd.f32 %v5317_v55, %v4852_v59  ;;  %5666 = vmatprep.subr.msk.mxu0 %vm1195_vm13, %v6371_v39  ;;  %vm1189_vm5 = vcmp.eq.s32.totalorder %v6940_v46, %v6878_v34  ;;  %vm1186_vm12 = vcmp.eq.s32.totalorder %v6956_v47, %v6878_v34 }
 0x276   :  { %v5319_v53 = vpop.f32.mrf.mxu1  ;;  %v1047_v54 = vpop.f32.mrf.mxu0  ;;  %5667 = vmatpush3.msk.msra.mxu0 %vm1195_vm13, %v6371_v39  ;;  %vm1102_vm13 = vcmask 1014784  }
 0x277   :  { %v5320_v57 = vadd.f32 %v5319_v53, %v5318_v51  ;;  %v6815_v13 = vadd.f32 %v1047_v54, %v983_v20  ;;  %5668 = vmatprep.subr.msk.mxu0 %vm1194_vm14, %v6371_v39 }
 0x278   :  { %v5321_v60 = vpop.f32.mrf.mxu1  ;;  %v5635_v62 = vpop.f32.mrf.mxu0  ;;  %5669 = vmatpush3.msk.msra.mxu0 %vm1194_vm14, %v6371_v39 }
 0x279   :  { %v991_v61 = vadd.f32 %v5320_v57, %v4852_v59  ;;  %v1066_v14 = vmax.f32 %v6815_v13, 0.0  ;;  %5670 = vmatprep.subr.msk.mxu0 %vm1193_vm15, %v6371_v39 }
 0x27a   :  { %v5322_v63 = vpop.f32.mrf.mxu1  ;;  %v1050_v49 = vpop.f32.mrf.mxu0  ;;  %5671 = vmatpush3.msk.msra.mxu0 %vm1193_vm15, %v6371_v39 }
 0x27b   :  { %v5323_v4 = vadd.f32 %v5322_v63, %v5321_v60  ;;  %v6813_v6 = vadd.f32 %v5634_v48, %v991_v61  ;;  %v6826_v18 = vadd.f32 %v1050_v49, %v986_v52  ;;  %5672 = vmatprep.subr.msk.mxu0 %vm1192_vm2, %v6371_v39 }
 0x27c   :  { %5673 = vmatpush3.msk.msra.mxu0 %vm1192_vm2, %v6371_v39 }
 0x27d   :  { %v994_v15 = vadd.f32 %v5323_v4, %v4852_v59  ;;  %v1068_v16 = vmax.f32 %v6813_v6, 0.0  ;;  %v1067_v26 = vmax.f32 %v6826_v18, 0.0  ;;  %5674 = vmatprep.subr.msk.mxu0 %vm1191_vm4, %v6371_v39 }
 0x27e   :  { %5675 = vmatpush3.msk.msra.mxu0 %vm1191_vm4, %v6371_v39  ;;  %vm1185_vm4 = vcmp.eq.s32.totalorder %v6993_v22, %v6878_v34 }
 0x27f   :  { %1090 = vrot.lane.b32.xlu1 %v1068_v16, %s6369_s4  ;;  %v6821_v21 = vadd.f32 %v5635_v62, %v994_v15  ;;  %5676 = vmatprep.subr.msk.mxu0 %vm1190_vm3, %v6371_v39 }
 0x280   :  { %5677 = vmatpush3.msk.msra.mxu0 %vm1190_vm3, %v6371_v39  ;;  %vm1184_vm3 = vcmp.eq.s32.totalorder %v6550_v1, %v6878_v34  ;;  %v6059_v34 = vld [vmem:[#allocation5 + $0x28] sm:$0xff]  }
 0x281   :  { %v1069_v23 = vmax.f32 %v6821_v21, 0.0  ;;  %5678 = vmatprep.subr.msk.mxu0 %vm1189_vm5, %v6371_v39 }
 0x282   :  { %5679 = vmatpush3.msk.msra.mxu0 %vm1189_vm5, %v6371_v39 }
 0x283   :  { %1092 = vrot.lane.b32.xlu0 %v1069_v23, %s6369_s4  ;;  %1086 = vrot.lane.b32.xlu1 %v1066_v14, %s6369_s4 }
 0x284   :  { %5680 = vmatprep.subr.msk.mxu0 %vm1188_vm9, %v6371_v39 }
 0x285   :  { %5681 = vmatpush3.msk.msra.mxu0 %vm1188_vm9, %v6371_v39 }
 0x286   :  { %5682 = vmatprep.subr.msk.mxu0 %vm1187_vm11, %v6371_v39 }
 0x287   :  { %1088 = vrot.lane.b32.xlu0 %v1067_v26, %s6369_s4  ;;  %1082 = vrot.lane.b32.xlu1 %v1064_v19, %s6369_s4 }
 0x288   :  { %5683 = vmatpush3.msk.msra.mxu0 %vm1187_vm11, %v6371_v39 }
 0x289   :  { %5684 = vmatprep.subr.msk.mxu0 %vm1186_vm12, %v6371_v39 }
 0x28a   :  { %5685 = vmatpush3.msk.msra.mxu0 %vm1186_vm12, %v6371_v39 }
 0x28b   :  { %1084 = vrot.lane.b32.xlu0 %v1065_v29, %s6369_s4  ;;  %1078 = vrot.lane.b32.xlu1 %v1062_v28, %s6369_s4 }
 0x28c   :  { %5686 = vmatprep.subr.msk.mxu0 %vm1185_vm4, %v6371_v39 }
 0x28d   :  { %5687 = vmatpush3.msk.msra.mxu0 %vm1185_vm4, %v6371_v39 }
 0x28e   :  { %5688 = vmatprep.subr.msk.mxu0 %vm1184_vm3, %v6371_v39 }
 0x28f   :  { %1080 = vrot.lane.b32.xlu0 %v1063_v0, %s6369_s4  ;;  %5689 = vmatpush3.msk.msra.mxu0 %vm1184_vm3, %v6371_v39 }
 0x2f1   :  { %v1091_v48 = vpop.permute.xlu1 %1090 }
 0x2f2   :  { %v1109_v51 = vsel %vm1102_vm13, %v1091_v48, 0.0 }
 0x2f3   :  { %v1117_v53 = vmax.f32 %v1068_v16, %v1109_v51 }
 0x2f5   :  { %v1093_v54 = vpop.permute.xlu0 %1092  ;;  %v1087_v56 = vpop.permute.xlu1 %1086  ;;  %v1138_v60 = vrot.slane %v1117_v53, 1 }
 0x2f6   :  { %v1110_v57 = vsel %vm1102_vm13, %v1093_v54, 0.0  ;;  %v1107_v58 = vsel %vm1102_vm13, %v1087_v56, 0.0  ;;  %v1162_v56 = vmul.u32 2, %v6993_v22 }
 0x2f7   :  { %v1118_v59 = vmax.f32 %v1069_v23, %v1110_v57  ;;  %v1115_v62 = vmax.f32 %v1066_v14, %v1107_v58  ;;  %v1163_v57 = vmul.u32 2, %v6956_v47 }
 0x2f8   :  { %vm1166_vm14 = vcmp.eq.s32.totalorder %v6852_v9, %v1162_v56 }
 0x2f9   :  { %v1140_v61 = vrot.slane %v1118_v59, 1  ;;  %v1089_v63 = vpop.permute.xlu0 %1088  ;;  %v1083_v55 = vpop.permute.xlu1 %1082  ;;  %v1134_v16 = vrot.slane %v1115_v62, 1  ;;  %vm1167_vm15 = vcmp.eq.s32.totalorder %v6852_v9, %v1163_v57 }
 0x2fa   :  { %v1108_v20 = vsel %vm1102_vm13, %v1089_v63, 0.0  ;;  %v1105_v4 = vsel %vm1102_vm13, %v1083_v55, 0.0  ;;  %v1171_v63 = vsel %vm1167_vm15, 1.0, %v6370_v31 }
 0x2fb   :  { %v1150_v6 = vsel %vm224_vm1, %v1140_v61, 0.0  ;;  %v1116_v10 = vmax.f32 %v1067_v26, %v1108_v20  ;;  %v1141_v11 = vsel %vm224_vm1, %v1138_v60, %v1140_v61  ;;  %v1113_v13 = vmax.f32 %v1064_v19, %v1105_v4 }
 0x2fc   :  { %v1158_v15 = vmax.f32 %v1118_v59, %v1150_v6  ;;  %v1157_v14 = vmax.f32 %v1117_v53, %v1141_v11  ;;  %v6057_v11 = vld [vmem:[#allocation5 + $0x38] sm:$0xff]  }
 0x2fd   :  { %v1136_v17 = vrot.slane %v1116_v10, 1  ;;  %v1085_v49 = vpop.permute.xlu0 %1084  ;;  %v1079_v52 = vpop.permute.xlu1 %1078  ;;  %v1130_v19 = vrot.slane %v1113_v13, 1 }
 0x2fe   :  { %v1106_v21 = vsel %vm1102_vm13, %v1085_v49, 0.0  ;;  %v1103_v5 = vsel %vm1102_vm13, %v1079_v52, 0.0  ;;  %5636 = vmatprep.subr.mxu1 %v1158_v15  ;;  %v6062_v49 = vld [vmem:[#allocation5 + $0x10] sm:$0xff]   ;;  %v6063_v52 = vld [vmem:[#allocation5 + $0x8] sm:$0xff]  }
 0x2ff   :  { %v1139_v23 = vsel %vm224_vm1, %v1136_v17, %v1138_v60  ;;  %v1114_v18 = vmax.f32 %v1065_v29, %v1106_v21  ;;  %5637 = vmatpush3.msra.mxu1 %v1158_v15  ;;  %v1137_v24 = vsel %vm224_vm1, %v1134_v16, %v1136_v17  ;;  %v1111_v27 = vmax.f32 %v1062_v28, %v1103_v5  ;;  %v6060_v17 = vld [vmem:[#allocation5 + $0x20] sm:$0xff]   ;;  %v6065_v5 = vld [vmem:[#allocation5 + $0x58] sm:$0xff]  }
 0x300   :  { %v1156_v25 = vmax.f32 %v1116_v10, %v1139_v23  ;;  %5638 = vmatprep.subr.mxu1 %v1157_v14  ;;  %v1155_v50 = vmax.f32 %v1115_v62, %v1137_v24  ;;  %v1164_v60 = vmul.u32 2, %v6553_v2  ;;  %v7010_v62 = vsel %vm1166_vm14, 1.0, %v6370_v31  ;;  %v6064_v21 = vld [vmem:[#allocation5] sm:$0xff]   ;;  %v6067_v23 = vld [vmem:[#allocation5 + $0x48] sm:$0xff]  }
 0x301   :  { %v1132_v26 = vrot.slane %v1114_v18, 1  ;;  %5639 = vmatpush3.msra.mxu1 %v1157_v14  ;;  %v1081_v33 = vpop.permute.xlu0 %1080  ;;  %v1127_v12 = vrot.slane %v1111_v27, 1  ;;  %v6372_v15 = vmov 0   ;;  %v6066_v14 = vld [vmem:[#allocation5 + $0x50] sm:$0xff]  }
 0x302   :  { %v1104_v48 = vsel %vm1102_vm13, %v1081_v33, 0.0  ;;  %5640 = vmatprep.subr.mxu1 %v1156_v25  ;;  %vm1168_vm2 = vcmp.eq.s32.totalorder %v6852_v9, %v1164_v60 }
 0x303   :  { %v1135_v29 = vsel %vm224_vm1, %v1132_v26, %v1134_v16  ;;  %v1112_v51 = vmax.f32 %v1063_v0, %v1104_v48  ;;  %5641 = vmatpush3.msra.mxu1 %v1156_v25  ;;  %v1133_v53 = vsel %vm224_vm1, %v1130_v19, %v1132_v26  ;;  %v1172_v55 = vsel %vm1168_vm2, 1.0, %v6370_v31  ;;  %v6058_v16 = vld [vmem:[#allocation5 + $0x30] sm:$0xff]  }
 0x304   :  { %v1154_v54 = vmax.f32 %v1114_v18, %v1135_v29  ;;  %5642 = vmatprep.subr.mxu1 %v1155_v50  ;;  %v1153_v58 = vmax.f32 %v1113_v13, %v1133_v53  ;;  %v6061_v13 = vld [vmem:[#allocation5 + $0x18] sm:$0xff]   ;;  %v6068_v18 = vld [vmem:[#allocation5 + $0x40] sm:$0xff]   ;;  %v1452_v48 = vand.u32 15, %v6993_v22  ;;  %v6070_v53 = vld [vmem:[%s8149_s5 + $0x38] sm:$0xff]  }
 0x305   :  { %v1128_v28 = vrot.slane %v1112_v51, 1  ;;  %5643 = vmatpush3.msra.mxu1 %v1155_v50 }
 0x306   :  { %5644 = vmatprep.subr.mxu1 %v1154_v54  ;;  %vm7063_vm9 = vcmp.eq.s32.totalorder %v1452_v48, 15 }
 0x307   :  { %v1131_v59 = vsel %vm224_vm1, %v1128_v28, %v1130_v19  ;;  %5645 = vmatpush3.msra.mxu1 %v1154_v54  ;;  %v1129_v8 = vsel %vm224_vm1, %v1127_v12, %v1128_v28  ;;  %v1454_v19 = vand.u32 15, %v6553_v2  ;;  %v6071_v54 = vld [vmem:[%s8149_s5 + $0x70] sm:$0xff]   ;;  %vm4961_vm15 = vmneg %vm7063_vm9 }
 0x308   :  { %v1152_v0 = vmax.f32 %v1112_v51, %v1131_v59  ;;  %5646 = vmatprep.subr.mxu1 %v1153_v58  ;;  %v1151_v61 = vmax.f32 %v1111_v27, %v1129_v8  ;;  %v6069_v51 = vld [vmem:[%s8149_s5 + $0x78] sm:$0xff]   ;;  %vm4962_vm2 = vmpackc.low %vm4961_vm15, %vm6368_vm10 }
 0x309   :  { %5647 = vmatpush3.msra.mxu1 %v1153_v58  ;;  %vm7055_vm5 = vcmp.eq.s32.totalorder %v1454_v19, 15  ;;  %v6074_v58 = vld [vmem:[%s8149_s5 + $0xb8] sm:$0xff]   ;;  %5368 = vmatprep.subr.bf16.mxu0 %v6069_v51 }
 0x30a   :  { %5648 = vmatprep.subr.mxu1 %v1152_v0  ;;  %vm4965_vm3 = vmneg %vm7055_vm5 }
 0x30b   :  { %5649 = vmatpush3.msra.mxu1 %v1152_v0 }
 0x30c   :  { %5650 = vmatprep.subr.mxu1 %v1151_v61 }
 0x30d   :  { %5651 = vmatpush3.msra.mxu1 %v1151_v61 }
 0x30e   :  { %5653 = vmatmul.mubr.msk.f32.vlgmr.msra.gmra.mxu1 %vm363_vm7, %v7010_v62  ;;  %1575 = vmatprep.subr.bf16.mxu1 %v6372_v15 }
 0x30f   :  { %5655 = vmatprep.mubr.msk.f32.mxu1 %vm363_vm7, %v1171_v63  ;;  %1576 = vmatpush1.bf16.msra.mxu1 %v6057_v11  ;;  %v6072_v63 = vld [vmem:[%s8149_s5 + $0x30] sm:$0xff]  }
 0x310   :  { %1577 = vmatprep.subr.bf16.mxu1 %v6372_v15 }
 0x312   :  { %5656 = vmatmul.mubr.msk.f32.gmra.mxu1 %vm363_vm7, %v1172_v55 }
 0x313   :  { %1578 = vmatpush1.bf16.msra.mxu1 %v6058_v16 }
 0x314   :  { %1579 = vmatprep.subr.bf16.mxu1 %v6372_v15 }
 0x317   :  { %1580 = vmatpush1.bf16.msra.mxu1 %v6059_v34 }
 0x318   :  { %1581 = vmatprep.subr.bf16.mxu1 %v6372_v15 }
 0x31b   :  { %1582 = vmatpush1.bf16.msra.mxu1 %v6060_v17  ;;  %v6075_v17 = vld [vmem:[%s8149_s5 + $0x28] sm:$0xff]  }
 0x31c   :  { %1583 = vmatprep.subr.bf16.mxu1 %v6372_v15 }
 0x31f   :  { %1584 = vmatpush1.bf16.msra.mxu1 %v6061_v13  ;;  %v6076_v13 = vld [vmem:[%s8149_s5 + $0x60] sm:$0xff]  }
 0x320   :  { %1585 = vmatprep.subr.bf16.mxu1 %v6372_v15 }
 0x323   :  { %1586 = vmatpush1.bf16.msra.mxu1 %v6062_v49  ;;  %v6078_v49 = vld [vmem:[%s8149_s5 + $0x20] sm:$0xff]  }
 0x324   :  { %1587 = vmatprep.subr.bf16.mxu1 %v6372_v15 }
 0x327   :  { %1588 = vmatpush1.bf16.msra.mxu1 %v6063_v52  ;;  %v6079_v52 = vld [vmem:[%s8149_s5 + $0x58] sm:$0xff]  }
 0x328   :  { %1589 = vmatprep.subr.bf16.mxu1 %v6372_v15 }
 0x32b   :  { %1590 = vmatpush1.bf16.msra.mxu1 %v6064_v21  ;;  %v6081_v21 = vld [vmem:[%s8149_s5 + $0x18] sm:$0xff]  }
 0x32c   :  { %1599 = vmatprep.subr.bf16.mxu1 %v6372_v15 }
 0x32f   :  { %1600 = vmatpush2.bf16.msra.mxu1 %v6065_v5  ;;  %v1451_v5 = vand.u32 15, %v6550_v1 }
 0x330   :  { %1601 = vmatprep.subr.bf16.mxu1 %v6372_v15 }
 0x331   :  { %vm7100_vm11 = vcmp.eq.s32.totalorder %v1451_v5, 0 }
 0x332   :  { %vm4953_vm13 = vmneg %vm7100_vm11 }
 0x333   :  { %1602 = vmatpush2.bf16.msra.mxu1 %v6066_v14  ;;  %vm4954_vm14 = vmpackc.low %vm6368_vm10, %vm4953_vm13 }
 0x334   :  { %1603 = vmatprep.subr.bf16.mxu1 %v6372_v15 }
 0x337   :  { %1604 = vmatpush2.bf16.msra.mxu1 %v6067_v23 }
 0x338   :  { %1605 = vmatprep.subr.bf16.mxu1 %v6372_v15 }
 0x33b   :  { %1606 = vmatpush2.bf16.msra.mxu1 %v6068_v18 }
 0x33c   :  { %5696 = vmatprep.subr.bf16.mxu1 %v6074_v58 }
 0x3ce   :  { %v5654_v20 = vpop.f32.mrf.mxu1 }
 0x3d0   :  { %v1294_v4 = vpop.f32.mrf.mxu1 }
 0x3d1   :  { %5690 = vmatprep.mubr.f32.mxu0 %v1294_v4 }
 0x3d2   :  { %v5657_v6 = vpop.f32.mrf.mxu1  ;;  %5691 = vmatmul.mubr.f32.vlgmr.msra.gmra.mxu0 %v5654_v20 }
 0x3d3   :  { %5369 = vmatpush3.bf16.msra.mxu0 %v6070_v53 }
 0x3d4   :  { %v1304_v10 = vpop.f32.mrf.mxu1  ;;  %5370 = vmatprep.subr.bf16.mxu0 %v6071_v54 }
 0x3d5   :  { %5693 = vmatprep.mubr.f32.mxu0 %v1304_v10 }
 0x3d6   :  { %5694 = vmatmul.mubr.f32.gmra.mxu0 %v5657_v6  ;;  %v6073_v6 = vld [vmem:[%s8149_s5 + $0x68] sm:$0xff]  }
 0x3d7   :  { %5371 = vmatpush3.bf16.msra.mxu0 %v6072_v63 }
 0x3d8   :  { %5372 = vmatprep.subr.bf16.mxu0 %v6073_v6  ;;  %v6085_v6 = vld [vmem:[%s8149_s5 + $0x48] sm:$0xff]  }
 0x3db   :  { %5373 = vmatpush3.bf16.msra.mxu0 %v6075_v17  ;;  %v6090_v17 = vld [vmem:[%s8149_s5] sm:$0xff]  }
 0x3dc   :  { %5374 = vmatprep.subr.bf16.mxu0 %v6076_v13  ;;  %v6091_v13 = vld [vmem:[%s8149_s5 + $0x88] sm:$0xff]  }
 0x3df   :  { %5375 = vmatpush3.bf16.msra.mxu0 %v6078_v49  ;;  %v6092_v49 = vld [vmem:[%s8149_s5 + $0x80] sm:$0xff]  }
 0x3e0   :  { %5376 = vmatprep.subr.bf16.mxu0 %v6079_v52  ;;  %v4913_v52 = vld [vmem:[%s8158_s10] ss:$0 sm:$0xff]  ;;  %s6375_s10 = smov 112  }
 0x3e3   :  { %5377 = vmatpush3.bf16.msra.mxu0 %v6081_v21 }
 0x492   :  { %v5692_v24 = vpop.f32.mrf.mxu0 }
 0x493   :  { %v1428_v26 = vrot.slane %v5692_v24, 7  ;;  %v1440_v59 = vrot.slane %v5692_v24, 1 }
 0x494   :  { %v1379_v25 = vpop.f32.mrf.mxu0 }
 0x495   :  { %v1427_v27 = vrot.slane %v1379_v25, 7  ;;  %v6000_v33 = vpack.i.bf16 %v5692_v24, %v1379_v25  ;;  %v1439_v56 = vrot.slane %v1379_v25, 1  ;;  %v1453_v24 = vand.u32 15, %v6956_v47 }
 0x496   :  { %v7041_v50 = vpop.f32.mrf.mxu0 }
 0x497   :  { %v1429_v29 = vsel %vm199_vm0, %v1427_v27, %v1428_v26  ;;  %6001 = vrot.lane.b32.xlu0 %v6000_v33, %s6363_s6  ;;  %v1444_v12 = vrot.slane %v7041_v50, 1  ;;  %v1441_v10 = vsel %vm224_vm1, %v1439_v56, %v1440_v59  ;;  %v1438_v14 = vsel %vm199_vm0, 0.0, %v1427_v27 }
 0x498   :  { %v1389_v57 = vpop.f32.mrf.mxu0  ;;  %v1459_v48 = vsel %vm7100_vm11, 0.0, %v1438_v14  ;;  %v1432_v51 = vrot.slane %v7041_v50, 7  ;;  %vm7111_vm12 = vcmp.eq.s32.totalorder %v1453_v24, 0  ;;  %vm4966_vm11 = vmpackc.low %vm4965_vm3, %vm6368_vm10 }
 0x499   :  { %v1442_v8 = vrot.slane %v1389_v57, 1  ;;  %v6005_v0 = vpack.i.bf16 %v7041_v50, %v1389_v57  ;;  %v1450_v61 = vsel %vm224_vm1, %v1444_v12, 0.0  ;;  %v1430_v18 = vrot.slane %v1389_v57, 7  ;;  %vm4957_vm4 = vmneg %vm7111_vm12 }
 0x49a   :  { %v1470_v55 = vsel %vm7055_vm5, 0.0, %v1450_v61 }
 0x49b   :  { %v1443_v20 = vsel %vm224_vm1, %v1440_v59, %v1442_v8  ;;  %v1445_v4 = vsel %vm224_vm1, %v1442_v8, %v1444_v12  ;;  %6006 = vrot.lane.b32.xlu1 %v6005_v0, %s6363_s6  ;;  %v1431_v53 = vsel %vm199_vm0, %v1428_v26, %v1430_v18  ;;  %v6077_v59 = vld [vmem:[%s8149_s5 + $0xb0] sm:$0xff]   ;;  %v1433_v50 = vsel %vm199_vm0, %v1430_v18, %v1432_v51 }
 0x49c   :  { %v1468_v11 = vsel %vm7063_vm9, 0.0, %v1443_v20  ;;  %v1490_v16 = vpack.c.bf16 %v1470_v55, %v1445_v4  ;;  %v1461_v26 = vsel %vm7111_vm12, 0.0, %v1431_v53  ;;  %v6080_v55 = vld [vmem:[%s8149_s5 + $0xa8] sm:$0xff]   ;;  %v6082_v20 = vld [vmem:[%s8149_s5 + $0x50] sm:$0xff]   ;;  %v6083_v4 = vld [vmem:[%s8149_s5 + $0xa0] sm:$0xff]  }
 0x49d   :  { %v1488_v34 = vpack.c.bf16 %v1468_v11, %v1441_v10  ;;  %5378 = vmatprep.subr.bf16.mxu0 %v6082_v20  ;;  %v6086_v10 = vld [vmem:[%s8149_s5 + $0x98] sm:$0xff]   ;;  %v6087_v11 = vld [vmem:[%s8149_s5 + $0x8] sm:$0xff]   ;;  %vm4958_vm9 = vmpackc.low %vm6368_vm10, %vm4957_vm4 }
 0x49f   :  { %4926 = vmatprep.mubr.msk.bf16.mxu1 %vm363_vm7, %v1488_v34  ;;  %v6089_v34 = vld [vmem:[%s8149_s5 + $0x90] sm:$0xff]  }
 0x509   :  { %v6002_v25 = vpop.permute.xlu0 %6001 }
 0x50a   :  { %v6004_v19 = vunpack.i.h.bf16 %v6002_v25  ;;  %v6003_v33 = vunpack.i.l.bf16 %v6002_v25 }
 0x50c   :  { %v1483_v54 = vsel %vm363_vm7, %v1459_v48, %v6003_v33  ;;  %v1484_v27 = vsel %vm363_vm7, %v1429_v29, %v6004_v19 }
 0x50d   :  { %v1487_v12 = vpack.c.bf16 %v1484_v27, %v1483_v54  ;;  %v6007_v57 = vpop.permute.xlu1 %6006 }
 0x50e   :  { %v6009_v8 = vunpack.i.h.bf16 %v6007_v57  ;;  %v6008_v0 = vunpack.i.l.bf16 %v6007_v57 }
 0x50f   :  { %1608 = vmatmul.mubr.bf16.vlgmr.msra.gmra.mxu1 %v1487_v12 }
 0x510   :  { %4927 = vmatprep.mubr.msk.bf16.mxu1 %vm363_vm7, %v1490_v16  ;;  %v1485_v29 = vsel %vm363_vm7, %v1461_v26, %v6008_v0  ;;  %v1486_v61 = vsel %vm363_vm7, %v1433_v50, %v6009_v8  ;;  %5697 = vmatpush3.bf16.msra.mxu1 %v6074_v58  ;;  %v6084_v58 = vld [vmem:[%s8149_s5 + $0x10] sm:$0xff]   ;;  %v6088_v16 = vld [vmem:[%s8149_s5 + $0x40] sm:$0xff]  }
 0x511   :  { %v1489_v63 = vpack.c.bf16 %v1486_v61, %v1485_v29  ;;  %5698 = vmatprep.subr.bf16.mxu1 %v6077_v59  ;;  %5379 = vmatpush3.bf16.msra.mxu0 %v6084_v58 }
 0x512   :  { %5380 = vmatprep.subr.bf16.mxu0 %v6085_v6 }
 0x514   :  { %5699 = vmatpush3.bf16.msra.mxu1 %v6077_v59 }
 0x515   :  { %5700 = vmatprep.subr.bf16.mxu1 %v6080_v55  ;;  %5381 = vmatpush3.bf16.msra.mxu0 %v6087_v11 }
 0x516   :  { %5382 = vmatprep.subr.bf16.mxu0 %v6088_v16 }
 0x517   :  { %1616 = vmatmul.mubr.bf16.gmra.mxu1 %v1489_v63 }
 0x518   :  { %5701 = vmatpush3.bf16.msra.mxu1 %v6080_v55 }
 0x519   :  { %5702 = vmatprep.subr.bf16.mxu1 %v6083_v4  ;;  %5383 = vmatpush3.bf16.msra.mxu0 %v6090_v17 }
 0x51c   :  { %5703 = vmatpush3.bf16.msra.mxu1 %v6083_v4 }
 0x51d   :  { %5704 = vmatprep.subr.bf16.mxu1 %v6086_v10 }
 0x520   :  { %5705 = vmatpush3.bf16.msra.mxu1 %v6086_v10 }
 0x521   :  { %5706 = vmatprep.subr.bf16.mxu1 %v6089_v34 }
 0x524   :  { %5707 = vmatpush3.bf16.msra.mxu1 %v6089_v34 }
 0x525   :  { %5708 = vmatprep.subr.bf16.mxu1 %v6091_v13 }
 0x528   :  { %5709 = vmatpush3.bf16.msra.mxu1 %v6091_v13 }
 0x529   :  { %5710 = vmatprep.subr.bf16.mxu1 %v6092_v49 }
 0x52c   :  { %5711 = vmatpush3.bf16.msra.mxu1 %v6092_v49 }
 0x5cf   :  { %v1609_v21 = vpop.f32.mrf.mxu1 }
 0x5d0   :  { %v1610_v5 = vadd.f32 %v4913_v52, %v1609_v21 }
 0x5d1   :  { %v1611_v14 = vpop.f32.mrf.mxu1 }
 0x5d2   :  { %v1624_v18 = vmax.f32 %v1610_v5, 0.0 }
 0x5d3   :  { %v1612_v24 = vpop.f32.mrf.mxu1 }
 0x5d4   :  { %v1613_v25 = vadd.f32 %v4913_v52, %v1612_v24  ;;  %v1681_v33 = vrot.slane %v1624_v18, 7  ;;  %v1693_v26 = vrot.slane %v1624_v18, 1 }
 0x5d5   :  { %v1614_v19 = vpop.f32.mrf.mxu1 }
 0x5d6   :  { %v1625_v48 = vmax.f32 %v1613_v25, 0.0  ;;  %v1692_v57 = vsel %vm199_vm0, 0.0, %v1681_v33 }
 0x5d7   :  { %v1617_v51 = vpop.f32.mrf.mxu1 }
 0x5d8   :  { %v1682_v53 = vrot.slane %v1625_v48, 7  ;;  %v1618_v54 = vadd.f32 %v4913_v52, %v1617_v51  ;;  %v1714_v27 = vpack.c.bf16 %v1625_v48, %v1624_v18  ;;  %v1694_v8 = vrot.slane %v1625_v48, 1  ;;  %v4928_v48 = vld [vmem:[%s8159_s9] ss:$0 sm:$0xff] }
 0x5d9   :  { %v1619_v12 = vpop.f32.mrf.mxu1 }
 0x5da   :  { %v1683_v59 = vsel %vm199_vm0, %v1681_v33, %v1682_v53  ;;  %v1626_v0 = vmax.f32 %v1618_v54, 0.0  ;;  %1901 = vmatprep.mubr.bf16.mxu0 %v1714_v27  ;;  %v1695_v4 = vsel %vm224_vm1, %v1693_v26, %v1694_v8  ;;  %v2016_v26 = vand.u32 7, %v6852_v9 }
 0x5db   :  { %v4955_v23 = vpack.c.bf16 %v1683_v59, %v1692_v57  ;;  %v1620_v50 = vpop.f32.mrf.mxu1 }
 0x5dc   :  { %v1696_v29 = vrot.slane %v1626_v0, 1  ;;  %v1621_v61 = vadd.f32 %v4913_v52, %v1620_v50  ;;  %v1684_v55 = vrot.slane %v1626_v0, 7 }
 0x5dd   :  { %v1622_v63 = vpop.f32.mrf.mxu1  ;;  %4956 = vmatmul.mubr.msk.bf16.vlgmr.msra.gmra.mxu0 %vm4954_vm14, %v4955_v23 }
 0x5de   :  { %v1627_v20 = vmax.f32 %v1621_v61, 0.0  ;;  %v1697_v58 = vsel %vm224_vm1, %v1694_v8, %v1696_v29  ;;  %v1685_v17 = vsel %vm199_vm0, %v1682_v53, %v1684_v55 }
 0x5df   :  { %v4963_v60 = vpack.c.bf16 %v1697_v58, %v1695_v4  ;;  %v7198_v58 = vsub.s32 %v6869_v32, %v2016_v26  ;;  %v6099_v26 = vld [vmem:[#allocation7 + $0x8] sm:$0xff]  }
 0x5e0   :  { %v1686_v6 = vrot.slane %v1627_v20, 7  ;;  %v1698_v10 = vrot.slane %v1627_v20, 1  ;;  %v1717_v11 = vpack.c.bf16 %v1627_v20, %v1626_v0 }
 0x5e1   :  { %5712 = vmatprep.mubr.msk.bf16.mxu1 %vm4962_vm2, %v4963_v60  ;;  %vm2033_vm10 = vcmp.eq.s32.totalorder %v6881_v35, %v7198_v58  ;;  %vm2032_vm5 = vcmp.eq.s32.totalorder %v6884_v36, %v7198_v58  ;;  %vm2031_vm12 = vcmp.eq.s32.totalorder %v6887_v37, %v7198_v58  ;;  %vm2030_vm13 = vcmp.eq.s32.totalorder %v6894_v38, %v7198_v58 }
 0x5e2   :  { %v1699_v16 = vsel %vm224_vm1, %v1696_v29, %v1698_v10  ;;  %v1704_v34 = vsel %vm224_vm1, %v1698_v10, 0.0  ;;  %1909 = vmatprep.mubr.bf16.mxu0 %v1717_v11  ;;  %v1687_v56 = vsel %vm199_vm0, %v1684_v55, %v1686_v6  ;;  %5727 = vmatprep.subr.msk.mxu0 %vm2033_vm10, %v6371_v39  ;;  %vm2029_vm14 = vcmp.eq.s32.totalorder %v6901_v40, %v7198_v58 }
 0x5e3   :  { %v4967_v28 = vpack.c.bf16 %v1704_v34, %v1699_v16  ;;  %v4959_v13 = vpack.c.bf16 %v1687_v56, %v1685_v17  ;;  %5728 = vmatpush3.msk.msra.mxu0 %vm2033_vm10, %v6371_v39  ;;  %vm2028_vm15 = vcmp.eq.s32.totalorder %v6908_v41, %v7198_v58  ;;  %vm2027_vm2 = vcmp.eq.s32.totalorder %v6915_v43, %v7198_v58 }
 0x5e4   :  { %5729 = vmatprep.subr.msk.mxu0 %vm2032_vm5, %v6371_v39  ;;  %vm2026_vm4 = vcmp.eq.s32.totalorder %v6922_v44, %v7198_v58  ;;  %vm2025_vm3 = vcmp.eq.s32.totalorder %v6556_v3, %v7198_v58  ;;  %vm2022_vm10 = vcmp.eq.s32.totalorder %v6645_v7, %v7198_v58 }
 0x5e5   :  { %4960 = vmatmul.mubr.msk.bf16.gmra.mxu0 %vm4958_vm9, %v4959_v13  ;;  %5713 = vmatmul.mubr.msk.bf16.vlgmr.msra.gmra.mxu1 %vm4966_vm11, %v4967_v28  ;;  %vm2024_vm9 = vcmp.eq.s32.totalorder %v6933_v45, %v7198_v58  ;;  %vm2023_vm11 = vcmp.eq.s32.totalorder %v6940_v46, %v7198_v58 }
 0x5e6   :  { %5724 = vmatprep.mubr.msk.f32.mxu1 %vm498_vm8, %v6865_v42  ;;  %5730 = vmatpush3.msk.msra.mxu0 %vm2032_vm5, %v6371_v39  ;;  %vm2021_vm5 = vcmp.eq.s32.totalorder %v6553_v2, %v7198_v58 }
 0x5e7   :  { %5731 = vmatprep.subr.msk.mxu0 %vm2031_vm12, %v6371_v39 }
 0x5e8   :  { %5732 = vmatpush3.msk.msra.mxu0 %vm2031_vm12, %v6371_v39  ;;  %vm2020_vm12 = vcmp.eq.s32.totalorder %v6956_v47, %v7198_v58 }
 0x5e9   :  { %5733 = vmatprep.subr.msk.mxu0 %vm2030_vm13, %v6371_v39 }
 0x5ea   :  { %5734 = vmatpush3.msk.msra.mxu0 %vm2030_vm13, %v6371_v39  ;;  %vm1987_vm13 = vcmask 982016  }
 0x5eb   :  { %5735 = vmatprep.subr.msk.mxu0 %vm2029_vm14, %v6371_v39 }
 0x5ec   :  { %5736 = vmatpush3.msk.msra.mxu0 %vm2029_vm14, %v6371_v39  ;;  %vm2019_vm14 = vcmp.eq.s32.totalorder %v6993_v22, %v7198_v58 }
 0x5ed   :  { %5737 = vmatprep.subr.msk.mxu0 %vm2028_vm15, %v6371_v39 }
 0x5ee   :  { %5738 = vmatpush3.msk.msra.mxu0 %vm2028_vm15, %v6371_v39  ;;  %vm2018_vm15 = vcmp.eq.s32.totalorder %v6550_v1, %v7198_v58  ;;  %v6106_v58 = vld [vmem:[%s8160_s29 + $0x38] sm:$0xff]  }
 0x5ef   :  { %5739 = vmatprep.subr.msk.mxu0 %vm2027_vm2, %v6371_v39 }
 0x5f0   :  { %5740 = vmatpush3.msk.msra.mxu0 %vm2027_vm2, %v6371_v39 }
 0x5f1   :  { %5741 = vmatprep.subr.msk.mxu0 %vm2026_vm4, %v6371_v39 }
 0x5f2   :  { %5742 = vmatpush3.msk.msra.mxu0 %vm2026_vm4, %v6371_v39 }
 0x5f3   :  { %5743 = vmatprep.subr.msk.mxu0 %vm2025_vm3, %v6371_v39 }
 0x5f4   :  { %5744 = vmatpush3.msk.msra.mxu0 %vm2025_vm3, %v6371_v39 }
 0x5f5   :  { %5745 = vmatprep.subr.msk.mxu0 %vm2024_vm9, %v6371_v39 }
 0x5f6   :  { %5746 = vmatpush3.msk.msra.mxu0 %vm2024_vm9, %v6371_v39  ;;  %vm6374_vm9 = vmmov 0  }
 0x5f7   :  { %5747 = vmatprep.subr.msk.mxu0 %vm2023_vm11, %v6371_v39 }
 0x5f8   :  { %5748 = vmatpush3.msk.msra.mxu0 %vm2023_vm11, %v6371_v39 }
 0x5f9   :  { %5749 = vmatprep.subr.msk.mxu0 %vm2022_vm10, %v6371_v39 }
 0x5fa   :  { %5750 = vmatpush3.msk.msra.mxu0 %vm2022_vm10, %v6371_v39 }
 0x5fb   :  { %5751 = vmatprep.subr.msk.mxu0 %vm2021_vm5, %v6371_v39 }
 0x5fc   :  { %5752 = vmatpush3.msk.msra.mxu0 %vm2021_vm5, %v6371_v39 }
 0x5fd   :  { %5753 = vmatprep.subr.msk.mxu0 %vm2020_vm12, %v6371_v39 }
 0x5fe   :  { %5754 = vmatpush3.msk.msra.mxu0 %vm2020_vm12, %v6371_v39 }
 0x5ff   :  { %5755 = vmatprep.subr.msk.mxu0 %vm2019_vm14, %v6371_v39 }
 0x600   :  { %5756 = vmatpush3.msk.msra.mxu0 %vm2019_vm14, %v6371_v39 }
 0x601   :  { %5757 = vmatprep.subr.msk.mxu0 %vm2018_vm15, %v6371_v39 }
 0x602   :  { %5758 = vmatpush3.msk.msra.mxu0 %vm2018_vm15, %v6371_v39  ;;  %vm3003_vm15 = vcmask 916480  }
 0x69d   :  { %v5384_v49 = vpop.f32.mrf.mxu0 }
 0x69f   :  { %v5385_v52 = vpop.f32.mrf.mxu0 }
 0x6a0   :  { %v5386_v19 = vadd.f32 %v5385_v52, %v5384_v49 }
 0x6a1   :  { %v5387_v21 = vpop.f32.mrf.mxu0 }
 0x6a2   :  { %v1904_v57 = vadd.f32 %v5386_v19, %v4928_v48 }
 0x6a3   :  { %v5388_v5 = vpop.f32.mrf.mxu0 }
 0x6a4   :  { %v5389_v12 = vadd.f32 %v5388_v5, %v5387_v21 }
 0x6a5   :  { %v5390_v14 = vpop.f32.mrf.mxu0  ;;  %v5714_v18 = vpop.f32.mrf.mxu1 }
 0x6a6   :  { %v1907_v61 = vadd.f32 %v5389_v12, %v4928_v48 }
 0x6a7   :  { %v5391_v24 = vpop.f32.mrf.mxu0  ;;  %v1952_v25 = vpop.f32.mrf.mxu1 }
 0x6a8   :  { %v5392_v33 = vadd.f32 %v5391_v24, %v5390_v14  ;;  %v7190_v0 = vadd.f32 %v1952_v25, %v1904_v57 }
 0x6a9   :  { %v5393_v51 = vpop.f32.mrf.mxu0  ;;  %v5715_v54 = vpop.f32.mrf.mxu1 }
 0x6aa   :  { %v1912_v53 = vadd.f32 %v5392_v33, %v4928_v48  ;;  %v1967_v55 = vmax.f32 %v7190_v0, 0.0  ;;  %v6096_v0 = vld [vmem:[#allocation7 + $0x20] sm:$0xff]  }
 0x6ab   :  { %v5394_v27 = vpop.f32.mrf.mxu0  ;;  %v1955_v29 = vpop.f32.mrf.mxu1 }
 0x6ac   :  { %v5395_v59 = vadd.f32 %v5394_v27, %v5393_v51  ;;  %v7188_v8 = vadd.f32 %v5714_v18, %v1912_v53  ;;  %v7195_v20 = vadd.f32 %v1955_v29, %v1907_v61  ;;  %v6100_v29 = vld [vmem:[#allocation7] sm:$0xff]   ;;  %v6101_v61 = vld [vmem:[#allocation7 + $0x58] sm:$0xff]  }
 0x6ae   :  { %v1915_v23 = vadd.f32 %v5395_v59, %v4928_v48  ;;  %v1969_v50 = vmax.f32 %v7188_v8, 0.0  ;;  %v1968_v60 = vmax.f32 %v7195_v20, 0.0  ;;  %v6094_v59 = vld [vmem:[#allocation7 + $0x30] sm:$0xff]   ;;  %v6095_v8 = vld [vmem:[#allocation7 + $0x28] sm:$0xff]   ;;  %v6104_v20 = vld [vmem:[#allocation7 + $0x40] sm:$0xff]  }
 0x6b0   :  { %1979 = vrot.lane.b32.xlu1 %v1969_v50, %s6373_s3  ;;  %v1964_v63 = vadd.f32 %v5715_v54, %v1915_v23  ;;  %v6097_v23 = vld [vmem:[#allocation7 + $0x18] sm:$0xff]  }
 0x6b2   :  { %v1970_v4 = vmax.f32 %v1964_v63, 0.0  ;;  %v6102_v63 = vld [vmem:[#allocation7 + $0x50] sm:$0xff]  }
 0x6b4   :  { %1981 = vrot.lane.b32.xlu0 %v1970_v4, %s6373_s3  ;;  %1975 = vrot.lane.b32.xlu1 %v1967_v55, %s6373_s3 }
 0x6b8   :  { %1977 = vrot.lane.b32.xlu0 %v1968_v60, %s6373_s3 }
 0x722   :  { %v1980_v6 = vpop.permute.xlu1 %1979 }
 0x723   :  { %v1990_v10 = vsel %vm1987_vm13, %v1980_v6, 0.0  ;;  %v6108_v6 = vld [vmem:[%s8160_s29 + $0x70] sm:$0xff]  }
 0x724   :  { %v1994_v11 = vmax.f32 %v1969_v50, %v1990_v10  ;;  %v6098_v50 = vld [vmem:[#allocation7 + $0x10] sm:$0xff]   ;;  %v2243_v10 = vand.u32 7, %v6550_v1 }
 0x726   :  { %v1982_v16 = vpop.permute.xlu0 %1981  ;;  %v1976_v34 = vpop.permute.xlu1 %1975  ;;  %v2003_v13 = vrot.slane %v1994_v11, 1  ;;  %vm7306_vm2 = vcmp.eq.s32.totalorder %v2243_v10, 7  ;;  %vm7334_vm4 = vcmp.eq.s32.totalorder %v2243_v10, 0  ;;  %v6122_v10 = vld [vmem:[%s8160_s29 + $0x90] sm:$0xff]  }
 0x727   :  { %v1991_v17 = vsel %vm1987_vm13, %v1982_v16, 0.0  ;;  %v1988_v56 = vsel %vm1987_vm13, %v1976_v34, 0.0  ;;  %v6109_v16 = vld [vmem:[%s8160_s29 + $0x30] sm:$0xff]   ;;  %vm5027_vm10 = vmneg %vm7334_vm4 }
 0x728   :  { %v1995_v28 = vmax.f32 %v1970_v4, %v1991_v17  ;;  %v1992_v52 = vmax.f32 %v1967_v55, %v1988_v56  ;;  %v6103_v55 = vld [vmem:[#allocation7 + $0x48] sm:$0xff]   ;;  %vm5032_vm12 = vmneg %vm7306_vm2 }
 0x729   :  { %v6105_v4 = vld [vmem:[%s8160_s29 + $0x78] sm:$0xff]  }
 0x72a   :  { %v2005_v49 = vrot.slane %v1995_v28, 1  ;;  %v1978_v21 = vpop.permute.xlu0 %1977  ;;  %v2000_v19 = vrot.slane %v1992_v52, 1  ;;  %5430 = vmatprep.subr.bf16.mxu0 %v6105_v4  ;;  %v6116_v4 = vld [vmem:[%s8160_s29 + $0xa0] sm:$0xff]  }
 0x72b   :  { %v1989_v5 = vsel %vm1987_vm13, %v1978_v21, 0.0 }
 0x72c   :  { %v2011_v14 = vsel %vm224_vm1, %v2005_v49, 0.0  ;;  %v1993_v18 = vmax.f32 %v1968_v60, %v1989_v5  ;;  %v2006_v24 = vsel %vm224_vm1, %v2003_v13, %v2005_v49  ;;  %v2244_v60 = vand.u32 7, %v6993_v22  ;;  %v6112_v5 = vld [vmem:[%s8160_s29 + $0x28] sm:$0xff]  }
 0x72d   :  { %v2015_v25 = vmax.f32 %v1995_v28, %v2011_v14  ;;  %v2014_v48 = vmax.f32 %v1994_v11, %v2006_v24  ;;  %v6111_v28 = vld [vmem:[%s8160_s29 + $0x68] sm:$0xff]  }
 0x72e   :  { %v2001_v33 = vrot.slane %v1993_v18, 1  ;;  %vm7338_vm3 = vcmp.eq.s32.totalorder %v2244_v60, 0 }
 0x72f   :  { %5716 = vmatprep.subr.mxu1 %v2015_v25  ;;  %vm5026_vm11 = vmneg %vm7338_vm3 }
 0x730   :  { %v2004_v51 = vsel %vm224_vm1, %v2001_v33, %v2003_v13  ;;  %5717 = vmatpush3.msra.mxu1 %v2015_v25  ;;  %v2002_v53 = vsel %vm224_vm1, %v2000_v19, %v2001_v33  ;;  %v6114_v25 = vld [vmem:[%s8160_s29 + $0x60] sm:$0xff]   ;;  %vm7414_vm13 = vmpackc.low %vm5026_vm11, %vm5027_vm10 }
 0x731   :  { %v2013_v54 = vmax.f32 %v1993_v18, %v2004_v51  ;;  %5718 = vmatprep.subr.mxu1 %v2014_v48  ;;  %v2012_v27 = vmax.f32 %v1992_v52, %v2002_v53  ;;  %v6115_v33 = vld [vmem:[%s8160_s29 + $0x20] sm:$0xff]   ;;  %v6118_v51 = vld [vmem:[%s8160_s29 + $0x18] sm:$0xff]  }
 0x732   :  { %5719 = vmatpush3.msra.mxu1 %v2014_v48  ;;  %v6117_v48 = vld [vmem:[%s8160_s29 + $0x58] sm:$0xff]  }
 0x733   :  { %5720 = vmatprep.subr.mxu1 %v2013_v54 }
 0x734   :  { %5721 = vmatpush3.msra.mxu1 %v2013_v54 }
 0x735   :  { %5722 = vmatprep.subr.mxu1 %v2012_v27 }
 0x736   :  { %5723 = vmatpush3.msra.mxu1 %v2012_v27 }
 0x737   :  { %5725 = vmatmul.mubr.msk.f32.vlgmr.msra.gmra.mxu1 %vm498_vm8, %v7010_v62  ;;  %2344 = vmatprep.subr.bf16.mxu1 %v6372_v15  ;;  %v6093_v62 = vld [vmem:[#allocation7 + $0x38] sm:$0xff]   ;;  %vm7298_vm8 = vcmp.eq.s32.totalorder %v2244_v60, 7  ;;  %v6120_v60 = vld [vmem:[%s8160_s29 + $0x50] sm:$0xff]  }
 0x738   :  { %2345 = vmatpush1.bf16.msra.mxu1 %v6093_v62  ;;  %vm5031_vm5 = vmneg %vm7298_vm8 }
 0x739   :  { %2346 = vmatprep.subr.bf16.mxu1 %v6372_v15  ;;  %vm7422_vm14 = vmpackc.low %vm5031_vm5, %vm5032_vm12 }
 0x73c   :  { %2347 = vmatpush1.bf16.msra.mxu1 %v6094_v59 }
 0x73d   :  { %2348 = vmatprep.subr.bf16.mxu1 %v6372_v15 }
 0x740   :  { %2349 = vmatpush1.bf16.msra.mxu1 %v6095_v8 }
 0x741   :  { %2350 = vmatprep.subr.bf16.mxu1 %v6372_v15 }
 0x744   :  { %2351 = vmatpush1.bf16.msra.mxu1 %v6096_v0 }
 0x745   :  { %2352 = vmatprep.subr.bf16.mxu1 %v6372_v15 }
 0x748   :  { %2353 = vmatpush1.bf16.msra.mxu1 %v6097_v23 }
 0x749   :  { %2354 = vmatprep.subr.bf16.mxu1 %v6372_v15 }
 0x74c   :  { %2355 = vmatpush1.bf16.msra.mxu1 %v6098_v50 }
 0x74d   :  { %2356 = vmatprep.subr.bf16.mxu1 %v6372_v15 }
 0x750   :  { %2357 = vmatpush1.bf16.msra.mxu1 %v6099_v26 }
 0x751   :  { %2358 = vmatprep.subr.bf16.mxu1 %v6372_v15 }
 0x754   :  { %2359 = vmatpush1.bf16.msra.mxu1 %v6100_v29 }
 0x755   :  { %2368 = vmatprep.subr.bf16.mxu1 %v6372_v15 }
 0x758   :  { %2369 = vmatpush2.bf16.msra.mxu1 %v6101_v61  ;;  %v6107_v61 = vld [vmem:[%s8160_s29 + $0xb8] sm:$0xff]  }
 0x759   :  { %2370 = vmatprep.subr.bf16.mxu1 %v6372_v15 }
 0x75c   :  { %2371 = vmatpush2.bf16.msra.mxu1 %v6102_v63 }
 0x75d   :  { %2372 = vmatprep.subr.bf16.mxu1 %v6372_v15 }
 0x760   :  { %2373 = vmatpush2.bf16.msra.mxu1 %v6103_v55  ;;  %v6110_v55 = vld [vmem:[%s8160_s29 + $0xb0] sm:$0xff]  }
 0x761   :  { %2374 = vmatprep.subr.bf16.mxu1 %v6372_v15 }
 0x764   :  { %2375 = vmatpush2.bf16.msra.mxu1 %v6104_v20  ;;  %v6113_v20 = vld [vmem:[%s8160_s29 + $0xa8] sm:$0xff]  }
 0x765   :  { %5762 = vmatprep.subr.bf16.mxu1 %v6370_v31 }
 0x7f7   :  { %v5726_v12 = vpop.f32.mrf.mxu1 }
 0x7f9   :  { %v2120_v57 = vpop.f32.mrf.mxu1 }
 0x7fa   :  { %5759 = vmatprep.mubr.f32.mxu0 %v2120_v57 }
 0x7fb   :  { %5760 = vmatmul.mubr.f32.vlgmr.msra.gmra.mxu0 %v5726_v12 }
 0x7fc   :  { %5431 = vmatpush3.bf16.msra.mxu0 %v6106_v58  ;;  %v6119_v58 = vld [vmem:[%s8160_s29 + $0x98] sm:$0xff]  }
 0x7fd   :  { %5432 = vmatprep.subr.bf16.mxu0 %v6108_v6  ;;  %v6121_v6 = vld [vmem:[%s8160_s29 + $0x10] sm:$0xff]  }
 0x800   :  { %5433 = vmatpush3.bf16.msra.mxu0 %v6109_v16  ;;  %v6124_v16 = vld [vmem:[%s8160_s29 + $0x8] sm:$0xff]  }
 0x801   :  { %5434 = vmatprep.subr.bf16.mxu0 %v6111_v28  ;;  %v6127_v28 = vld [vmem:[%s8160_s29] sm:$0xff]  }
 0x804   :  { %5435 = vmatpush3.bf16.msra.mxu0 %v6112_v5 }
 0x805   :  { %5436 = vmatprep.subr.bf16.mxu0 %v6114_v25 }
 0x808   :  { %5437 = vmatpush3.bf16.msra.mxu0 %v6115_v33 }
 0x809   :  { %5438 = vmatprep.subr.bf16.mxu0 %v6117_v48 }
 0x80c   :  { %5439 = vmatpush3.bf16.msra.mxu0 %v6118_v51 }
 0x80d   :  { %5440 = vmatprep.subr.bf16.mxu0 %v6120_v60  ;;  %v6139_v60 = vld [vmem:[%s8101_s13 + $0x20] sm:$0xff]  }
 0x810   :  { %5441 = vmatpush3.bf16.msra.mxu0 %v6121_v6  ;;  %v6140_v6 = vld [vmem:[%s8101_s13 + $0xa0] sm:$0xff]  }
 0x8bb   :  { %v5761_v11 = vpop.f32.mrf.mxu0 }
 0x8bc   :  { %v2238_v34 = vrot.slane %v5761_v11, 1  ;;  %v2232_v54 = vrot.slane %v5761_v11, 7 }
 0x8bd   :  { %v2195_v56 = vpop.f32.mrf.mxu0 }
 0x8be   :  { %v2242_v13 = vsel %vm224_vm1, %v2238_v34, 0.0  ;;  %v2237_v49 = vrot.slane %v2195_v56, 1  ;;  %v6010_v52 = vpack.i.bf16 %v5761_v11, %v2195_v56  ;;  %v2231_v53 = vrot.slane %v2195_v56, 7  ;;  %v6123_v11 = vld [vmem:[%s8160_s29 + $0x48] sm:$0xff]   ;;  %v6126_v56 = vld [vmem:[%s8160_s29 + $0x40] sm:$0xff]  }
 0x8bf   :  { %v2252_v18 = vsel %vm7298_vm8, 0.0, %v2242_v13  ;;  %5442 = vmatprep.subr.bf16.mxu0 %v6123_v11  ;;  %v6128_v13 = vld [vmem:[%s8160_s29 + $0x80] sm:$0xff]   ;;  %v6142_v11 = vld [vmem:[%s8101_s13 + $0x18] sm:$0xff]   ;;  %vm3052_vm8 = vcmask 130048  }
 0x8c0   :  { %v2239_v14 = vsel %vm224_vm1, %v2237_v49, %v2238_v34  ;;  %6011 = vrot.lane.b32.xlu0 %v6010_v52, %s6363_s6  ;;  %v2233_v27 = vsel %vm199_vm0, %v2231_v53, %v2232_v54  ;;  %v2236_v12 = vsel %vm199_vm0, 0.0, %v2231_v53  ;;  %v6125_v34 = vld [vmem:[%s8160_s29 + $0x88] sm:$0xff]   ;;  %5443 = vmatpush3.bf16.msra.mxu0 %v6124_v16  ;;  %v6129_v49 = vld [vmem:[%s8101_s13 + $0x78] sm:$0xff]   ;;  %v4987_v52 = vld [vmem:[%s8169_s0] ss:$0 sm:$0xff] }
 0x8c1   :  { %v2251_v24 = vsel %vm7306_vm2, 0.0, %v2239_v14  ;;  %v2247_v23 = vsel %vm7334_vm4, 0.0, %v2236_v12  ;;  %v2248_v50 = vsel %vm7338_vm3, 0.0, %v2233_v27  ;;  %5444 = vmatprep.subr.bf16.mxu0 %v6126_v56  ;;  %v6143_v16 = vld [vmem:[%s8101_s13 + $0x98] sm:$0xff]   ;;  %v6145_v56 = vld [vmem:[%s8101_s13 + $0x10] sm:$0xff]  }
 0x8c2   :  { %v2262_v19 = vpack.c.bf16 %v2252_v18, %v2251_v24 }
 0x8c4   :  { %5000 = vmatprep.mubr.msk.bf16.mxu1 %vm363_vm7, %v2262_v19  ;;  %5445 = vmatpush3.bf16.msra.mxu0 %v6127_v28  ;;  %v6146_v28 = vld [vmem:[%s8101_s13 + $0x90] sm:$0xff]  }
 0x8c5   :  { %5461 = vmatprep.subr.bf16.mxu0 %v6129_v49  ;;  %v6148_v49 = vld [vmem:[%s8101_s13 + $0x8] sm:$0xff]  }
 0x932   :  { %v6012_v59 = vpop.permute.xlu0 %6011 }
 0x933   :  { %v6014_v8 = vunpack.i.h.bf16 %v6012_v59  ;;  %v6013_v0 = vunpack.i.l.bf16 %v6012_v59 }
 0x935   :  { %v2259_v26 = vsel %vm363_vm7, %v2247_v23, %v6013_v0  ;;  %v2260_v29 = vsel %vm363_vm7, %v2248_v50, %v6014_v8  ;;  %v6130_v0 = vld [vmem:[%s8101_s13 + $0x38] sm:$0xff]  }
 0x936   :  { %v2261_v63 = vpack.c.bf16 %v2260_v29, %v2259_v26  ;;  %v6131_v23 = vld [vmem:[%s8101_s13 + $0xb8] sm:$0xff]   ;;  %v6132_v29 = vld [vmem:[%s8101_s13 + $0x70] sm:$0xff]  }
 0x938   :  { %2377 = vmatmul.mubr.bf16.vlgmr.msra.gmra.mxu1 %v2261_v63  ;;  %v6134_v63 = vld [vmem:[%s8101_s13 + $0xb0] sm:$0xff]  }
 0x939   :  { %5763 = vmatpush3.bf16.msra.mxu1 %v6107_v61  ;;  %5778 = vmatprep.mubr.msk.bf16.mxu1 %vm6374_vm9, %v6370_v31  ;;  %v6133_v61 = vld [vmem:[%s8101_s13 + $0x30] sm:$0xff]  }
 0x93a   :  { %5764 = vmatprep.subr.bf16.mxu1 %v6370_v31 }
 0x93d   :  { %5765 = vmatpush3.bf16.msra.mxu1 %v6110_v55  ;;  %v6135_v55 = vld [vmem:[%s8101_s13 + $0x68] sm:$0xff]  }
 0x93e   :  { %5766 = vmatprep.subr.bf16.mxu1 %v6370_v31 }
 0x941   :  { %5767 = vmatpush3.bf16.msra.mxu1 %v6113_v20  ;;  %v6136_v20 = vld [vmem:[%s8101_s13 + $0x28] sm:$0xff]  }
 0x942   :  { %5768 = vmatprep.subr.bf16.mxu1 %v6370_v31 }
 0x945   :  { %5769 = vmatpush3.bf16.msra.mxu1 %v6116_v4  ;;  %v6137_v4 = vld [vmem:[%s8101_s13 + $0xa8] sm:$0xff]  }
 0x946   :  { %5770 = vmatprep.subr.bf16.mxu1 %v6370_v31 }
 0x949   :  { %5771 = vmatpush3.bf16.msra.mxu1 %v6119_v58  ;;  %v6138_v58 = vld [vmem:[%s8101_s13 + $0x60] sm:$0xff]  }
 0x94a   :  { %5772 = vmatprep.subr.bf16.mxu1 %v6370_v31 }
 0x94d   :  { %5773 = vmatpush3.bf16.msra.mxu1 %v6122_v10  ;;  %v6141_v10 = vld [vmem:[%s8101_s13 + $0x58] sm:$0xff]  }
 0x94e   :  { %5774 = vmatprep.subr.bf16.mxu1 %v6370_v31 }
 0x951   :  { %5775 = vmatpush3.bf16.msra.mxu1 %v6125_v34  ;;  %v6144_v34 = vld [vmem:[%s8101_s13 + $0x50] sm:$0xff]  }
 0x952   :  { %5776 = vmatprep.subr.bf16.mxu1 %v6370_v31 }
 0x955   :  { %5777 = vmatpush3.bf16.msra.mxu1 %v6128_v13  ;;  %v6147_v13 = vld [vmem:[%s8101_s13 + $0x48] sm:$0xff]  }
 0x956   :  { %5782 = vmatprep.subr.bf16.mxu1 %v6370_v31 }
 0x9f8   :  { %v2378_v5 = vpop.f32.mrf.mxu1 }
 0x9f9   :  { %v2379_v14 = vadd.f32 %v4987_v52, %v2378_v5  ;;  %v6150_v5 = vld [vmem:[%s8101_s13 + $0x40] sm:$0xff]  }
 0x9fa   :  { %v2380_v18 = vpop.f32.mrf.mxu1 }
 0x9fb   :  { %v2385_v24 = vmax.f32 %v2379_v14, 0.0  ;;  %v6151_v14 = vld [vmem:[%s8101_s13] sm:$0xff]  }
 0x9fc   :  { %v2381_v25 = vpop.f32.mrf.mxu1  ;;  %v6152_v18 = vld [vmem:[%s8101_s13 + $0x80] sm:$0xff]  }
 0x9fd   :  { %v2382_v19 = vadd.f32 %v4987_v52, %v2381_v25  ;;  %v2438_v48 = vrot.slane %v2385_v24, 7  ;;  %v2444_v53 = vrot.slane %v2385_v24, 1  ;;  %v6149_v52 = vld [vmem:[%s8101_s13 + $0x88] sm:$0xff]  }
 0x9fe   :  { %v2383_v33 = vpop.f32.mrf.mxu1 }
 0x9ff   :  { %v2386_v51 = vmax.f32 %v2382_v19, 0.0  ;;  %v2443_v62 = vsel %vm199_vm0, 0.0, %v2438_v48  ;;  %v5001_v19 = vld [vmem:[%s8174_s8] ss:$0 sm:$0xff] }
 0xa01   :  { %v2439_v54 = vrot.slane %v2386_v51, 7  ;;  %v2445_v27 = vrot.slane %v2386_v51, 1  ;;  %v2455_v12 = vpack.c.bf16 %v2386_v51, %v2385_v24 }
 0xa03   :  { %v2440_v57 = vsel %vm199_vm0, %v2438_v48, %v2439_v54  ;;  %v2446_v8 = vsel %vm224_vm1, %v2444_v53, %v2445_v27  ;;  %v2449_v17 = vsel %vm224_vm1, %v2445_v27, 0.0  ;;  %2639 = vmatprep.mubr.bf16.mxu0 %v2455_v12 }
 0xa04   :  { %v5029_v50 = vpack.c.bf16 %v2440_v57, %v2443_v62  ;;  %v5034_v26 = vpack.c.bf16 %v2449_v17, %v2446_v8 }
 0xa06   :  { %5030 = vmatmul.mubr.msk.bf16.vlgmr.msra.gmra.mxu0 %vm7414_vm13, %v5029_v50  ;;  %5779 = vmatmul.mubr.msk.bf16.vlgmr.msra.gmra.mxu1 %vm7422_vm14, %v5034_v26 }
 0xa07   :  { %5462 = vmatpush3.bf16.msra.mxu0 %v6130_v0  ;;  %5783 = vmatpush3.bf16.msra.mxu1 %v6131_v23 }
 0xa08   :  { %5463 = vmatprep.subr.bf16.mxu0 %v6132_v29  ;;  %5784 = vmatprep.subr.bf16.mxu1 %v6370_v31 }
 0xa09   :  { %5798 = vmatprep.mubr.msk.bf16.mxu1 %vm6374_vm9, %v6370_v31 }
 0xa0b   :  { %5464 = vmatpush3.bf16.msra.mxu0 %v6133_v61  ;;  %5785 = vmatpush3.bf16.msra.mxu1 %v6134_v63 }
 0xa0c   :  { %5465 = vmatprep.subr.bf16.mxu0 %v6135_v55  ;;  %5786 = vmatprep.subr.bf16.mxu1 %v6370_v31 }
 0xa0f   :  { %5466 = vmatpush3.bf16.msra.mxu0 %v6136_v20  ;;  %5787 = vmatpush3.bf16.msra.mxu1 %v6137_v4 }
 0xa10   :  { %5788 = vmatprep.subr.bf16.mxu1 %v6370_v31  ;;  %5467 = vmatprep.subr.bf16.mxu0 %v6138_v58 }
 0xa13   :  { %5468 = vmatpush3.bf16.msra.mxu0 %v6139_v60  ;;  %5789 = vmatpush3.bf16.msra.mxu1 %v6140_v6 }
 0xa14   :  { %5790 = vmatprep.subr.bf16.mxu1 %v6370_v31  ;;  %5469 = vmatprep.subr.bf16.mxu0 %v6141_v10 }
 0xa17   :  { %5470 = vmatpush3.bf16.msra.mxu0 %v6142_v11  ;;  %5791 = vmatpush3.bf16.msra.mxu1 %v6143_v16 }
 0xa18   :  { %5792 = vmatprep.subr.bf16.mxu1 %v6370_v31  ;;  %5471 = vmatprep.subr.bf16.mxu0 %v6144_v34  ;;  %v5036_v34 = vld [vmem:[%s8102_s14] ss:$0 sm:$0xff] }
 0xa1b   :  { %5472 = vmatpush3.bf16.msra.mxu0 %v6145_v56  ;;  %5793 = vmatpush3.bf16.msra.mxu1 %v6146_v28 }
 0xa1c   :  { %5794 = vmatprep.subr.bf16.mxu1 %v6370_v31  ;;  %5473 = vmatprep.subr.bf16.mxu0 %v6147_v13 }
 0xa1f   :  { %5474 = vmatpush3.bf16.msra.mxu0 %v6148_v49  ;;  %5795 = vmatpush3.bf16.msra.mxu1 %v6149_v52 }
 0xa20   :  { %5796 = vmatprep.subr.bf16.mxu1 %v6370_v31  ;;  %5475 = vmatprep.subr.bf16.mxu0 %v6150_v5 }
 0xa23   :  { %5476 = vmatpush3.bf16.msra.mxu0 %v6151_v14  ;;  %5797 = vmatpush3.bf16.msra.mxu1 %v6152_v18 }
 0xa24   :  { %5802 = vmatprep.subr.mxu0 %v6370_v31  ;;  %3319 = vmatprep.subr.bf16.mxu1 %v6372_v15 }
 0xac6   :  { %v5446_v24 = vpop.f32.mrf.mxu0  ;;  %v2682_v25 = vpop.f32.mrf.mxu1 }
 0xac8   :  { %v5447_v33 = vpop.f32.mrf.mxu0  ;;  %v5780_v48 = vpop.f32.mrf.mxu1 }
 0xac9   :  { %v5448_v51 = vadd.f32 %v5447_v33, %v5446_v24 }
 0xaca   :  { %v5449_v53 = vpop.f32.mrf.mxu0  ;;  %v2685_v54 = vpop.f32.mrf.mxu1 }
 0xacb   :  { %v2642_v27 = vadd.f32 %v5448_v51, %v5001_v19 }
 0xacc   :  { %v5450_v12 = vpop.f32.mrf.mxu0  ;;  %v5781_v62 = vpop.f32.mrf.mxu1 }
 0xacd   :  { %v2683_v57 = vadd.f32 %v2682_v25, %v2642_v27  ;;  %v5451_v8 = vadd.f32 %v5450_v12, %v5449_v53  ;;  %v3018_v12 = vand.u32 15, %v6852_v9 }
 0xacf   :  { %v2689_v17 = vmax.f32 %v2683_v57, 0.0  ;;  %v2645_v0 = vadd.f32 %v5451_v8, %v5001_v19 }
 0xad1   :  { %v2686_v23 = vadd.f32 %v2685_v54, %v2645_v0  ;;  %v2742_v50 = vrot.slane %v2689_v17, 7  ;;  %v2748_v29 = vrot.slane %v2689_v17, 1 }
 0xad3   :  { %v2690_v26 = vmax.f32 %v2686_v23, 0.0  ;;  %v2747_v20 = vsel %vm199_vm0, 0.0, %v2742_v50 }
 0xad5   :  { %v2743_v61 = vrot.slane %v2690_v26, 7  ;;  %v2749_v63 = vrot.slane %v2690_v26, 1  ;;  %v2759_v55 = vpack.c.bf16 %v2690_v26, %v2689_v17  ;;  %v3019_v17 = vsub.s32 %v6869_v32, %v3018_v12  ;;  %v6175_v12 = vld [vmem:[%s8105_s17 + $0x50] sm:$0xff]  }
 0xad7   :  { %v2753_v4 = vsel %vm224_vm1, %v2749_v63, 0.0  ;;  %2943 = vmatprep.mubr.bf16.mxu0 %v2759_v55  ;;  %v2744_v58 = vsel %vm199_vm0, %v2742_v50, %v2743_v61  ;;  %v2750_v60 = vsel %vm224_vm1, %v2748_v29, %v2749_v63  ;;  %vm3035_vm2 = vcmp.eq.s32.totalorder %v6881_v35, %v3019_v17  ;;  %v6153_v63 = vld [vmem:[#allocation8 + $0x38] sm:$0xff]   ;;  %v6154_v55 = vld [vmem:[#allocation8 + $0x30] sm:$0xff]  }
 0xad8   :  { %v5064_v6 = vpack.c.bf16 %v2744_v58, %v2747_v20  ;;  %v5069_v10 = vpack.c.bf16 %v2753_v4, %v2750_v60  ;;  %vm3034_vm4 = vcmp.eq.s32.totalorder %v6884_v36, %v3019_v17  ;;  %vm3033_vm3 = vcmp.eq.s32.totalorder %v6887_v37, %v3019_v17  ;;  %v6155_v20 = vld [vmem:[#allocation8 + $0x28] sm:$0xff]   ;;  %v6156_v4 = vld [vmem:[#allocation8 + $0x20] sm:$0xff]   ;;  %v6157_v58 = vld [vmem:[#allocation8 + $0x18] sm:$0xff]  }
 0xad9   :  { %vm3032_vm11 = vcmp.eq.s32.totalorder %v6894_v38, %v3019_v17  ;;  %vm3031_vm10 = vcmp.eq.s32.totalorder %v6901_v40, %v3019_v17  ;;  %vm3030_vm5 = vcmp.eq.s32.totalorder %v6908_v41, %v3019_v17  ;;  %vm3029_vm12 = vcmp.eq.s32.totalorder %v6915_v43, %v3019_v17  ;;  %v6158_v60 = vld [vmem:[#allocation8 + $0x10] sm:$0xff]  }
 0xada   :  { %5065 = vmatmul.mubr.msk.bf16.vlgmr.msra.gmra.mxu0 %vm7414_vm13, %v5064_v6  ;;  %5799 = vmatmul.mubr.msk.bf16.vlgmr.msra.gmra.mxu1 %vm7422_vm14, %v5069_v10  ;;  %vm3028_vm13 = vcmp.eq.s32.totalorder %v6922_v44, %v3019_v17  ;;  %vm3027_vm14 = vcmp.eq.s32.totalorder %v6556_v3, %v3019_v17  ;;  %v6159_v6 = vld [vmem:[#allocation8 + $0x8] sm:$0xff]   ;;  %v6160_v10 = vld [vmem:[#allocation8] sm:$0xff]  }
 0xadb   :  { %5806 = vmatprep.mubr.msk.f32.mxu0 %vm6374_vm9, %v6370_v31  ;;  %3320 = vmatpush1.bf16.msra.mxu1 %v6153_v63  ;;  %v6179_v63 = vld [vmem:[%s8105_s17 + $0x40] sm:$0xff]  }
 0xadc   :  { %3321 = vmatprep.subr.bf16.mxu1 %v6372_v15 }
 0xadf   :  { %3322 = vmatpush1.bf16.msra.mxu1 %v6154_v55  ;;  %v6180_v55 = vld [vmem:[%s8105_s17] sm:$0xff]  }
 0xae0   :  { %3323 = vmatprep.subr.bf16.mxu1 %v6372_v15 }
 0xae3   :  { %3324 = vmatpush1.bf16.msra.mxu1 %v6155_v20  ;;  %v5088_v20 = vld [vmem:[%s8104_s16] ss:$0 sm:$0xff] }
 0xae4   :  { %3325 = vmatprep.subr.bf16.mxu1 %v6372_v15 }
 0xae7   :  { %3326 = vmatpush1.bf16.msra.mxu1 %v6156_v4 }
 0xae8   :  { %3327 = vmatprep.subr.bf16.mxu1 %v6372_v15 }
 0xaeb   :  { %3328 = vmatpush1.bf16.msra.mxu1 %v6157_v58 }
 0xaec   :  { %3329 = vmatprep.subr.bf16.mxu1 %v6372_v15 }
 0xaef   :  { %3330 = vmatpush1.bf16.msra.mxu1 %v6158_v60 }
 0xaf0   :  { %3331 = vmatprep.subr.bf16.mxu1 %v6372_v15 }
 0xaf3   :  { %3332 = vmatpush1.bf16.msra.mxu1 %v6159_v6 }
 0xaf4   :  { %3333 = vmatprep.subr.bf16.mxu1 %v6372_v15 }
 0xaf7   :  { %3334 = vmatpush1.bf16.msra.mxu1 %v6160_v10 }
 0xaf8   :  { %3343 = vmatprep.subr.bf16.mxu1 %v6372_v15 }
 0xb9a   :  { %v5477_v11 = vpop.f32.mrf.mxu0  ;;  %v2986_v16 = vpop.f32.mrf.mxu1 }
 0xb9c   :  { %v5478_v56 = vpop.f32.mrf.mxu0  ;;  %v5800_v28 = vpop.f32.mrf.mxu1 }
 0xb9d   :  { %v5479_v13 = vadd.f32 %v5478_v56, %v5477_v11  ;;  %v6161_v11 = vld [vmem:[#allocation8 + $0x58] sm:$0xff]   ;;  %v6164_v56 = vld [vmem:[#allocation8 + $0x40] sm:$0xff]   ;;  %v6165_v28 = vld [vmem:[%s8105_s17 + $0x78] sm:$0xff]  }
 0xb9e   :  { %v5480_v49 = vpop.f32.mrf.mxu0  ;;  %v2989_v52 = vpop.f32.mrf.mxu1  ;;  %3344 = vmatpush2.bf16.msra.mxu1 %v6161_v11 }
 0xb9f   :  { %v2946_v5 = vadd.f32 %v5479_v13, %v5036_v34  ;;  %3345 = vmatprep.subr.bf16.mxu1 %v6372_v15  ;;  %v6166_v13 = vld [vmem:[%s8105_s17 + $0x38] sm:$0xff]  }
 0xba0   :  { %v5481_v59 = vpop.f32.mrf.mxu0  ;;  %v5801_v14 = vpop.f32.mrf.mxu1 }
 0xba1   :  { %v5482_v18 = vadd.f32 %v5481_v59, %v5480_v49  ;;  %v2987_v21 = vadd.f32 %v2986_v16, %v2946_v5  ;;  %v6162_v16 = vld [vmem:[#allocation8 + $0x50] sm:$0xff]   ;;  %v6167_v49 = vld [vmem:[%s8105_s17 + $0x70] sm:$0xff]   ;;  %v6169_v5 = vld [vmem:[%s8105_s17 + $0x68] sm:$0xff]   ;;  %v3227_v59 = vand.u32 3, %v6550_v1 }
 0xba2   :  { %3346 = vmatpush2.bf16.msra.mxu1 %v6162_v16  ;;  %v6170_v14 = vld [vmem:[%s8105_s17 + $0x28] sm:$0xff]  }
 0xba3   :  { %v2949_v24 = vadd.f32 %v5482_v18, %v5036_v34  ;;  %v2993_v25 = vmax.f32 %v2987_v21, 0.0  ;;  %v6163_v34 = vld [vmem:[#allocation8 + $0x48] sm:$0xff]   ;;  %3347 = vmatprep.subr.bf16.mxu1 %v6372_v15  ;;  %v6171_v18 = vld [vmem:[%s8105_s17 + $0x60] sm:$0xff]  }
 0xba5   :  { %2997 = vrot.lane.b32.xlu0 %v2993_v25, %s6375_s10  ;;  %v2990_v19 = vadd.f32 %v2989_v52, %v2949_v24  ;;  %v6168_v52 = vld [vmem:[%s8105_s17 + $0x30] sm:$0xff]  }
 0xba6   :  { %3348 = vmatpush2.bf16.msra.mxu1 %v6163_v34 }
 0xba7   :  { %v2994_v33 = vmax.f32 %v2990_v19, 0.0  ;;  %3349 = vmatprep.subr.bf16.mxu1 %v6372_v15 }
 0xba9   :  { %2999 = vrot.lane.b32.xlu1 %v2994_v33, %s6375_s10 }
 0xbaa   :  { %3350 = vmatpush2.bf16.msra.mxu1 %v6164_v56 }
 0xc17   :  { %v2998_v48 = vpop.permute.xlu0 %2997 }
 0xc18   :  { %v3004_v51 = vsel %vm3003_vm15, %v2998_v48, 0.0 }
 0xc19   :  { %v3006_v53 = vmax.f32 %v2993_v25, %v3004_v51  ;;  %v6173_v51 = vld [vmem:[%s8105_s17 + $0x58] sm:$0xff]  }
 0xc1a   :  { %v6189_v25 = vld [vmem:[%s8107_s19 + $0x78] sm:$0xff]  }
 0xc1b   :  { %v3000_v54 = vpop.permute.xlu1 %2999  ;;  %v3010_v57 = vrot.slane %v3006_v53, 1  ;;  %5543 = vmatprep.subr.bf16.mxu1 %v6189_v25 }
 0xc1c   :  { %v3005_v27 = vsel %vm3003_vm15, %v3000_v54, 0.0  ;;  %vm3026_vm15 = vcmp.eq.s32.totalorder %v6933_v45, %v3019_v17 }
 0xc1d   :  { %v3007_v62 = vmax.f32 %v2994_v33, %v3005_v27  ;;  %v6172_v33 = vld [vmem:[%s8105_s17 + $0x20] sm:$0xff]   ;;  %v6174_v27 = vld [vmem:[%s8105_s17 + $0x18] sm:$0xff]  }
 0xc1f   :  { %v3011_v8 = vrot.slane %v3007_v62, 1 }
 0xc21   :  { %v3012_v0 = vsel %vm224_vm1, %v3010_v57, %v3011_v8  ;;  %v3015_v23 = vsel %vm224_vm1, %v3011_v8, 0.0  ;;  %v6197_v8 = vld [vmem:[%s8107_s19 + $0xa8] sm:$0xff]  }
 0xc22   :  { %v3017_v50 = vmax.f32 %v3007_v62, %v3015_v23  ;;  %v3016_v26 = vmax.f32 %v3006_v53, %v3012_v0  ;;  %v6176_v62 = vld [vmem:[%s8105_s17 + $0x10] sm:$0xff]  }
 0xc24   :  { %5803 = vmatpush3.msra.mxu0 %v3017_v50 }
 0xc25   :  { %5804 = vmatprep.subr.mxu0 %v6370_v31 }
 0xc26   :  { %5805 = vmatpush3.msra.mxu0 %v3016_v26 }
 0xc27   :  { %5807 = vmatmul.mubr.msk.f32.vlgmr.msra.gmra.mxu0 %vm3052_vm8, %v6865_v42  ;;  %5809 = vmatprep.subr.mxu0 %v6370_v31  ;;  %vm3025_vm8 = vcmp.eq.s32.totalorder %v6940_v46, %v3019_v17 }
 0xc28   :  { %5810 = vmatpush3.msk.msra.mxu0 %vm3035_vm2, %v6371_v39  ;;  %5841 = vmatprep.mubr.msk.f32.mxu0 %vm6374_vm9, %v6370_v31  ;;  %vm3024_vm2 = vcmp.eq.s32.totalorder %v6645_v7, %v3019_v17 }
 0xc29   :  { %5811 = vmatprep.subr.mxu0 %v6370_v31 }
 0xc2a   :  { %5812 = vmatpush3.msk.msra.mxu0 %vm3034_vm4, %v6371_v39  ;;  %vm3023_vm4 = vcmp.eq.s32.totalorder %v6553_v2, %v3019_v17 }
 0xc2b   :  { %5813 = vmatprep.subr.mxu0 %v6370_v31 }
 0xc2c   :  { %5814 = vmatpush3.msk.msra.mxu0 %vm3033_vm3, %v6371_v39  ;;  %vm3022_vm3 = vcmp.eq.s32.totalorder %v6956_v47, %v3019_v17 }
 0xc2d   :  { %5815 = vmatprep.subr.mxu0 %v6370_v31 }
 0xc2e   :  { %5816 = vmatpush3.msk.msra.mxu0 %vm3032_vm11, %v6371_v39  ;;  %vm3021_vm11 = vcmp.eq.s32.totalorder %v6993_v22, %v3019_v17 }
 0xc2f   :  { %5817 = vmatprep.subr.mxu0 %v6370_v31 }
 0xc30   :  { %5818 = vmatpush3.msk.msra.mxu0 %vm3031_vm10, %v6371_v39  ;;  %vm3020_vm10 = vcmp.eq.s32.totalorder %v6550_v1, %v3019_v17 }
 0xc31   :  { %5819 = vmatprep.subr.mxu0 %v6370_v31 }
 0xc32   :  { %5820 = vmatpush3.msk.msra.mxu0 %vm3030_vm5, %v6371_v39  ;;  %vm7615_vm5 = vcmp.eq.s32.totalorder %v3227_v59, 3 }
 0xc33   :  { %5821 = vmatprep.subr.mxu0 %v6370_v31 }
 0xc34   :  { %5822 = vmatpush3.msk.msra.mxu0 %vm3029_vm12, %v6371_v39  ;;  %vm7639_vm12 = vcmp.eq.s32.totalorder %v3227_v59, 0  ;;  %v6184_v59 = vld [vmem:[%s8105_s17 + $0xa0] sm:$0xff]  }
 0xc35   :  { %5823 = vmatprep.subr.mxu0 %v6370_v31 }
 0xc36   :  { %5824 = vmatpush3.msk.msra.mxu0 %vm3028_vm13, %v6371_v39  ;;  %vm5127_vm13 = vmneg %vm7639_vm12 }
 0xc37   :  { %5825 = vmatprep.subr.mxu0 %v6370_v31 }
 0xc38   :  { %5826 = vmatpush3.msk.msra.mxu0 %vm3027_vm14, %v6371_v39  ;;  %vm7666_vm14 = vmpackc.low %vm5127_vm13, %vm5127_vm13 }
 0xc39   :  { %5827 = vmatprep.subr.mxu0 %v6370_v31 }
 0xc3a   :  { %5828 = vmatpush3.msk.msra.mxu0 %vm3026_vm15, %v6371_v39  ;;  %vm5132_vm15 = vmneg %vm7615_vm5 }
 0xc3b   :  { %5829 = vmatprep.subr.mxu0 %v6370_v31 }
 0xc3c   :  { %5830 = vmatpush3.msk.msra.mxu0 %vm3025_vm8, %v6371_v39  ;;  %vm7708_vm8 = vmpackc.low %vm5132_vm15, %vm5132_vm15 }
 0xc3d   :  { %5831 = vmatprep.subr.mxu0 %v6370_v31 }
 0xc3e   :  { %5832 = vmatpush3.msk.msra.mxu0 %vm3024_vm2, %v6371_v39  ;;  %vm3989_vm2 = vcmask 64512  }
 0xc3f   :  { %5833 = vmatprep.subr.mxu0 %v6370_v31 }
 0xc40   :  { %5834 = vmatpush3.msk.msra.mxu0 %vm3023_vm4, %v6371_v39 }
 0xc41   :  { %5835 = vmatprep.subr.mxu0 %v6370_v31 }
 0xc42   :  { %5836 = vmatpush3.msk.msra.mxu0 %vm3022_vm3, %v6371_v39 }
 0xc43   :  { %5837 = vmatprep.subr.mxu0 %v6370_v31 }
 0xc44   :  { %5838 = vmatpush3.msk.msra.mxu0 %vm3021_vm11, %v6371_v39 }
 0xc45   :  { %5839 = vmatprep.subr.mxu0 %v6370_v31 }
 0xc46   :  { %5840 = vmatpush3.msk.msra.mxu0 %vm3020_vm10, %v6371_v39 }
 0xc47   :  { %5512 = vmatprep.subr.bf16.mxu0 %v6165_v28 }
 0xce7   :  { %v3121_v29 = vpop.f32.mrf.mxu0 }
 0xce8   :  { %5842 = vmatmul.mubr.f32.vlgmr.msra.gmra.mxu0 %v3121_v29  ;;  %v6177_v29 = vld [vmem:[%s8105_s17 + $0x48] sm:$0xff]  }
 0xce9   :  { %v5808_v61 = vpop.f32.mrf.mxu0  ;;  %5513 = vmatpush3.bf16.msra.mxu0 %v6166_v13  ;;  %v6181_v13 = vld [vmem:[%s8105_s17 + $0xb8] sm:$0xff]  }
 0xcea   :  { %5514 = vmatprep.subr.bf16.mxu0 %v6167_v49  ;;  %v6178_v61 = vld [vmem:[%s8105_s17 + $0x8] sm:$0xff]  }
 0xced   :  { %5515 = vmatpush3.bf16.msra.mxu0 %v6168_v52  ;;  %v6182_v52 = vld [vmem:[%s8105_s17 + $0xb0] sm:$0xff]  }
 0xcee   :  { %5516 = vmatprep.subr.bf16.mxu0 %v6169_v5  ;;  %v6183_v5 = vld [vmem:[%s8105_s17 + $0xa8] sm:$0xff]  }
 0xcf1   :  { %5517 = vmatpush3.bf16.msra.mxu0 %v6170_v14  ;;  %v6185_v14 = vld [vmem:[%s8105_s17 + $0x98] sm:$0xff]  }
 0xcf2   :  { %5518 = vmatprep.subr.bf16.mxu0 %v6171_v18  ;;  %v6186_v18 = vld [vmem:[%s8105_s17 + $0x90] sm:$0xff]  }
 0xcf5   :  { %5519 = vmatpush3.bf16.msra.mxu0 %v6172_v33 }
 0xcf6   :  { %5520 = vmatprep.subr.bf16.mxu0 %v6173_v51 }
 0xcf9   :  { %5521 = vmatpush3.bf16.msra.mxu0 %v6174_v27  ;;  %v6192_v27 = vld [vmem:[%s8107_s19 + $0x70] sm:$0xff]  }
 0xcfa   :  { %5522 = vmatprep.subr.bf16.mxu0 %v6175_v12  ;;  %v6194_v12 = vld [vmem:[%s8107_s19 + $0xb0] sm:$0xff]  }
 0xcfd   :  { %5523 = vmatpush3.bf16.msra.mxu0 %v6176_v62  ;;  %v6193_v62 = vld [vmem:[%s8107_s19 + $0x30] sm:$0xff]  }
 0xcfe   :  { %5524 = vmatprep.subr.bf16.mxu0 %v6177_v29  ;;  %v6203_v29 = vld [vmem:[%s8107_s19 + $0x98] sm:$0xff]  }
 0xd01   :  { %5525 = vmatpush3.bf16.msra.mxu0 %v6178_v61  ;;  %v6202_v61 = vld [vmem:[%s8107_s19 + $0x18] sm:$0xff]  }
 0xd02   :  { %5526 = vmatprep.subr.bf16.mxu0 %v6179_v63  ;;  %v6204_v63 = vld [vmem:[%s8107_s19 + $0x50] sm:$0xff]  }
 0xd05   :  { %5527 = vmatpush3.bf16.msra.mxu0 %v6180_v55  ;;  %v6206_v55 = vld [vmem:[%s8107_s19 + $0x90] sm:$0xff]  }
 0xd06   :  { %5844 = vmatprep.subr.bf16.mxu0 %v6370_v31 }
 0xda8   :  { %v3191_v21 = vpop.f32.mrf.mxu0 }
 0xda9   :  { %v3224_v24 = vrot.slane %v3191_v21, 1  ;;  %3232 = vrot.lane.b32.xlu1 %v3191_v21, %s6363_s6  ;;  %v3221_v57 = vrot.slane %v3191_v21, 7  ;;  %v6187_v21 = vld [vmem:[%s8105_s17 + $0x88] sm:$0xff]  }
 0xdaa   :  { %v5843_v19 = vpop.f32.mrf.mxu0 }
 0xdab   :  { %v3226_v48 = vsel %vm224_vm1, %v3224_v24, 0.0  ;;  %v3223_v17 = vsel %vm199_vm0, 0.0, %v3221_v57  ;;  %v6188_v19 = vld [vmem:[%s8105_s17 + $0x80] sm:$0xff]   ;;  %v6195_v57 = vld [vmem:[%s8107_s19 + $0x68] sm:$0xff]  }
 0xdac   :  { %v3231_v53 = vsel %vm7615_vm5, 0.0, %v3226_v48  ;;  %v3229_v23 = vsel %vm7639_vm12, 0.0, %v3223_v17  ;;  %v6196_v17 = vld [vmem:[%s8107_s19 + $0x28] sm:$0xff]  }
 0xdad   :  { %v3237_v54 = vpack.c.bf16 %v3231_v53, %v3231_v53  ;;  %v6190_v53 = vld [vmem:[%s8107_s19 + $0x38] sm:$0xff]  }
 0xdaf   :  { %5101 = vmatprep.mubr.msk.bf16.mxu1 %vm363_vm7, %v3237_v54  ;;  %v6191_v54 = vld [vmem:[%s8107_s19 + $0xb8] sm:$0xff]  }
 0xe1b   :  { %v3233_v0 = vpop.permute.xlu1 %3232 }
 0xe1c   :  { %v3235_v50 = vsel %vm363_vm7, %v3229_v23, %v3233_v0  ;;  %v6198_v0 = vld [vmem:[%s8107_s19 + $0x60] sm:$0xff]  }
 0xe1d   :  { %v3236_v26 = vpack.c.bf16 %v3235_v50, %v3235_v50  ;;  %v6200_v23 = vld [vmem:[%s8107_s19 + $0xa0] sm:$0xff]  }
 0xe1e   :  { %v6199_v50 = vld [vmem:[%s8107_s19 + $0x20] sm:$0xff]  }
 0xe1f   :  { %3352 = vmatmul.mubr.bf16.vlgmr.msra.gmra.mxu1 %v3236_v26  ;;  %v6201_v26 = vld [vmem:[%s8107_s19 + $0x58] sm:$0xff]  }
 0xe20   :  { %5544 = vmatpush3.bf16.msra.mxu1 %v6190_v53 }
 0xe21   :  { %5545 = vmatprep.subr.bf16.mxu1 %v6192_v27 }
 0xe24   :  { %5546 = vmatpush3.bf16.msra.mxu1 %v6193_v62 }
 0xe25   :  { %5547 = vmatprep.subr.bf16.mxu1 %v6195_v57 }
 0xe28   :  { %5548 = vmatpush3.bf16.msra.mxu1 %v6196_v17 }
 0xe29   :  { %5549 = vmatprep.subr.bf16.mxu1 %v6198_v0 }
 0xe2c   :  { %5550 = vmatpush3.bf16.msra.mxu1 %v6199_v50 }
 0xe2d   :  { %5551 = vmatprep.subr.bf16.mxu1 %v6201_v26 }
 0xe30   :  { %5552 = vmatpush3.bf16.msra.mxu1 %v6202_v61 }
 0xe31   :  { %5553 = vmatprep.subr.bf16.mxu1 %v6204_v63 }
 0xedf   :  { %v3353_v4 = vpop.f32.mrf.mxu1 }
 0xee0   :  { %v3354_v58 = vadd.f32 %v5088_v20, %v3353_v4  ;;  %v6205_v20 = vld [vmem:[%s8107_s19 + $0x10] sm:$0xff]   ;;  %v6207_v4 = vld [vmem:[%s8107_s19 + $0x48] sm:$0xff]  }
 0xee1   :  { %v3355_v60 = vpop.f32.mrf.mxu1  ;;  %5554 = vmatpush3.bf16.msra.mxu1 %v6205_v20 }
 0xee2   :  { %v3359_v6 = vmax.f32 %v3354_v58, 0.0  ;;  %v6208_v58 = vld [vmem:[%s8107_s19 + $0x8] sm:$0xff]   ;;  %5555 = vmatprep.subr.bf16.mxu1 %v6207_v4 }
 0xee3   :  { %v3356_v10 = vpop.f32.mrf.mxu1  ;;  %v6209_v60 = vld [vmem:[%s8107_s19 + $0x88] sm:$0xff]  }
 0xee4   :  { %v3410_v11 = vrot.slane %v3359_v6, 7  ;;  %v3419_v16 = vpack.c.bf16 %v3359_v6, %v3359_v6  ;;  %v3413_v24 = vrot.slane %v3359_v6, 1  ;;  %v6210_v6 = vld [vmem:[%s8107_s19 + $0x40] sm:$0xff]  }
 0xee5   :  { %v3357_v34 = vpop.f32.mrf.mxu1  ;;  %5556 = vmatpush3.bf16.msra.mxu1 %v6208_v58  ;;  %v6211_v10 = vld [vmem:[%s8107_s19] sm:$0xff]  }
 0xee6   :  { %v3412_v56 = vsel %vm199_vm0, 0.0, %v3410_v11  ;;  %3603 = vmatprep.mubr.bf16.mxu0 %v3419_v16  ;;  %v3415_v33 = vsel %vm224_vm1, %v3413_v24, 0.0  ;;  %v6212_v11 = vld [vmem:[%s8107_s19 + $0x80] sm:$0xff]   ;;  %5557 = vmatprep.subr.bf16.mxu1 %v6210_v6 }
 0xee7   :  { %v5130_v49 = vpack.c.bf16 %v3412_v56, %v3412_v56  ;;  %v5135_v51 = vpack.c.bf16 %v3415_v33, %v3415_v33 }
 0xee9   :  { %5131 = vmatmul.mubr.msk.bf16.vlgmr.msra.gmra.mxu0 %vm7666_vm14, %v5130_v49  ;;  %5558 = vmatpush3.bf16.msra.mxu1 %v6211_v10 }
 0xeea   :  { %5845 = vmatpush3.bf16.msra.mxu0 %v6181_v13  ;;  %5860 = vmatprep.mubr.msk.bf16.mxu0 %vm6374_vm9, %v6370_v31 }
 0xeeb   :  { %5846 = vmatprep.subr.bf16.mxu0 %v6370_v31  ;;  %5884 = vmatprep.subr.mxu1 %v6370_v31 }
 0xeee   :  { %5847 = vmatpush3.bf16.msra.mxu0 %v6182_v52  ;;  %v5102_v52 = vld [vmem:[%s8106_s18] ss:$0 sm:$0xff] }
 0xeef   :  { %5848 = vmatprep.subr.bf16.mxu0 %v6370_v31 }
 0xef2   :  { %5849 = vmatpush3.bf16.msra.mxu0 %v6183_v5 }
 0xef3   :  { %5850 = vmatprep.subr.bf16.mxu0 %v6370_v31 }
 0xef6   :  { %5851 = vmatpush3.bf16.msra.mxu0 %v6184_v59 }
 0xef7   :  { %5852 = vmatprep.subr.bf16.mxu0 %v6370_v31 }
 0xefa   :  { %5853 = vmatpush3.bf16.msra.mxu0 %v6185_v14 }
 0xefb   :  { %5854 = vmatprep.subr.bf16.mxu0 %v6370_v31 }
 0xefe   :  { %5855 = vmatpush3.bf16.msra.mxu0 %v6186_v18 }
 0xeff   :  { %5856 = vmatprep.subr.bf16.mxu0 %v6370_v31 }
 0xf02   :  { %5857 = vmatpush3.bf16.msra.mxu0 %v6187_v21 }
 0xf03   :  { %5858 = vmatprep.subr.bf16.mxu0 %v6370_v31 }
 0xf06   :  { %5859 = vmatpush3.bf16.msra.mxu0 %v6188_v19 }
 0xf07   :  { %5864 = vmatprep.subr.bf16.mxu0 %v6370_v31 }
 0xf09   :  { %5861 = vmatmul.mubr.msk.bf16.vlgmr.msra.gmra.mxu0 %vm7708_vm8, %v5135_v51 }
 0xf0a   :  { %5880 = vmatprep.mubr.msk.bf16.mxu0 %vm6374_vm9, %v6370_v31  ;;  %5865 = vmatpush3.bf16.msra.mxu0 %v6191_v54 }
 0xf0b   :  { %5866 = vmatprep.subr.bf16.mxu0 %v6370_v31 }
 0xf0e   :  { %5867 = vmatpush3.bf16.msra.mxu0 %v6194_v12 }
 0xf0f   :  { %5868 = vmatprep.subr.bf16.mxu0 %v6370_v31 }
 0xf12   :  { %5869 = vmatpush3.bf16.msra.mxu0 %v6197_v8  ;;  %v5137_v8 = vld [vmem:[%s8108_s20] ss:$0 sm:$0xff] }
 0xf13   :  { %5870 = vmatprep.subr.bf16.mxu0 %v6370_v31 }
 0xf16   :  { %5871 = vmatpush3.bf16.msra.mxu0 %v6200_v23 }
 0xf17   :  { %5872 = vmatprep.subr.bf16.mxu0 %v6370_v31 }
 0xf1a   :  { %5873 = vmatpush3.bf16.msra.mxu0 %v6203_v29 }
 0xf1b   :  { %5874 = vmatprep.subr.bf16.mxu0 %v6370_v31 }
 0xf1e   :  { %5875 = vmatpush3.bf16.msra.mxu0 %v6206_v55  ;;  %v3955_v55 = vand.u32 31, %v6852_v9 }
 0xf1f   :  { %5876 = vmatprep.subr.bf16.mxu0 %v6370_v31 }
 0xf22   :  { %5877 = vmatpush3.bf16.msra.mxu0 %v6209_v60  ;;  %v3956_v60 = vsub.s32 %v6869_v32, %v3955_v55  ;;  %v6215_v32 = vld [vmem:[%s8109_s21 + $0x28] sm:$0xff]  }
 0xf23   :  { %5878 = vmatprep.subr.bf16.mxu0 %v6370_v31 }
 0xf24   :  { %vm3972_vm4 = vcmp.eq.s32.totalorder %v6881_v35, %v3956_v60  ;;  %vm3971_vm3 = vcmp.eq.s32.totalorder %v6884_v36, %v3956_v60  ;;  %vm3968_vm11 = vcmp.eq.s32.totalorder %v6901_v40, %v3956_v60  ;;  %vm3967_vm10 = vcmp.eq.s32.totalorder %v6908_v41, %v3956_v60  ;;  %v6216_v35 = vld [vmem:[%s8109_s21 + $0x20] sm:$0xff]   ;;  %v6217_v36 = vld [vmem:[%s8109_s21 + $0x18] sm:$0xff]   ;;  %v6222_v41 = vld [vmem:[%s8109_s21 + $0x50] sm:$0xff]  }
 0xf25   :  { %vm3966_vm5 = vcmp.eq.s32.totalorder %v6915_v43, %v3956_v60  ;;  %vm3965_vm12 = vcmp.eq.s32.totalorder %v6922_v44, %v3956_v60  ;;  %vm3964_vm13 = vcmp.eq.s32.totalorder %v6556_v3, %v3956_v60  ;;  %vm3962_vm15 = vcmp.eq.s32.totalorder %v6940_v46, %v3956_v60  ;;  %v6221_v40 = vld [vmem:[%s8109_s21 + $0x58] sm:$0xff]   ;;  %v6223_v43 = vld [vmem:[%s8109_s21 + $0x48] sm:$0xff]   ;;  %v6224_v44 = vld [vmem:[%s8109_s21 + $0x40] sm:$0xff]  }
 0xf26   :  { %5879 = vmatpush3.bf16.msra.mxu0 %v6212_v11 }
 0xf27   :  { %4257 = vmatprep.subr.bf16.mxu0 %v6372_v15 }
 0xfa9   :  { %v5528_v16 = vpop.f32.mrf.mxu0 }
 0xfab   :  { %v5529_v34 = vpop.f32.mrf.mxu0 }
 0xfac   :  { %v5530_v49 = vadd.f32 %v5529_v34, %v5528_v16 }
 0xfad   :  { %v5531_v56 = vpop.f32.mrf.mxu0 }
 0xfae   :  { %v3606_v5 = vadd.f32 %v5530_v49, %v5102_v52  ;;  %v5217_v52 = vld [vmem:[%s8114_s26] ss:$0 sm:$0xff]  ;;  %s6377_s26 = smov [#allocation10]  }
 0xfaf   :  { %v5532_v13 = vpop.f32.mrf.mxu0 }
 0xfc9   :  { %v3645_v59 = vpop.f32.mrf.mxu0 }
 0xfca   :  { %v3646_v14 = vadd.f32 %v3645_v59, %v3606_v5 }
 0xfcb   :  { %v5862_v18 = vpop.f32.mrf.mxu0 }
 0xfcc   :  { %v3651_v21 = vmax.f32 %v3646_v14, 0.0 }
 0xfcd   :  { %v3648_v24 = vpop.f32.mrf.mxu0 }
 0xfce   :  { %v3702_v19 = vrot.slane %v3651_v21, 7  ;;  %v3705_v33 = vrot.slane %v3651_v21, 1  ;;  %v3711_v51 = vpack.c.bf16 %v3651_v21, %v3651_v21  ;;  %v6225_v24 = vld [vmem:[%s8111_s23 + $0x38] sm:$0xff]  }
 0xfcf   :  { %v5863_v25 = vpop.f32.mrf.mxu0 }
 0xfd0   :  { %v3704_v53 = vsel %vm199_vm0, 0.0, %v3702_v19  ;;  %v3707_v54 = vsel %vm224_vm1, %v3705_v33, 0.0  ;;  %3895 = vmatprep.mubr.bf16.mxu1 %v3711_v51  ;;  %v6226_v19 = vld [vmem:[%s8111_s23 + $0x30] sm:$0xff]   ;;  %v6227_v33 = vld [vmem:[%s8111_s23 + $0x28] sm:$0xff]   ;;  %v6228_v51 = vld [vmem:[%s8111_s23 + $0x20] sm:$0xff]  }
 0xfd1   :  { %v5165_v27 = vpack.c.bf16 %v3704_v53, %v3704_v53  ;;  %v5170_v12 = vpack.c.bf16 %v3707_v54, %v3707_v54  ;;  %v6229_v25 = vld [vmem:[%s8111_s23 + $0x18] sm:$0xff]   ;;  %v6230_v53 = vld [vmem:[%s8111_s23 + $0x10] sm:$0xff]   ;;  %v6231_v54 = vld [vmem:[%s8111_s23 + $0x8] sm:$0xff]  }
 0xfd3   :  { %5166 = vmatmul.mubr.msk.bf16.vlgmr.msra.gmra.mxu1 %vm7666_vm14, %v5165_v27  ;;  %5881 = vmatmul.mubr.msk.bf16.vlgmr.msra.gmra.mxu0 %vm7708_vm8, %v5170_v12  ;;  %vm3963_vm14 = vcmp.eq.s32.totalorder %v6933_v45, %v3956_v60  ;;  %vm3961_vm8 = vcmp.eq.s32.totalorder %v6645_v7, %v3956_v60  ;;  %v6213_v7 = vld [vmem:[%s8109_s21 + $0x38] sm:$0xff]   ;;  %v4165_v45 = vand.u32 1, %v6550_v1  ;;  %v6232_v27 = vld [vmem:[%s8111_s23] sm:$0xff]  }
 0xfd4   :  { %5886 = vmatprep.mubr.msk.f32.mxu1 %vm6374_vm9, %v6370_v31  ;;  %4258 = vmatpush1.bf16.msra.mxu0 %v6213_v7  ;;  %v6233_v12 = vld [vmem:[%s8111_s23 + $0x58] sm:$0xff]   ;;  %v6240_v7 = vld [vmem:[%s8113_s25 + $0x20] sm:$0xff]  }
 0xfd5   :  { %4259 = vmatprep.subr.bf16.mxu0 %v6372_v15 }
0x1093   :  { %v5559_v62 = vpop.f32.mrf.mxu1  ;;  %v3937_v57 = vpop.f32.mrf.mxu0 }
0x1095   :  { %v5560_v17 = vpop.f32.mrf.mxu1  ;;  %v5882_v0 = vpop.f32.mrf.mxu0 }
0x1096   :  { %v5561_v23 = vadd.f32 %v5560_v17, %v5559_v62  ;;  %v6234_v62 = vld [vmem:[%s8111_s23 + $0x50] sm:$0xff]   ;;  %v5189_v17 = vld [vmem:[%s8110_s22] ss:$0 sm:$0xff] }
0x1097   :  { %v5562_v50 = vpop.f32.mrf.mxu1  ;;  %v3940_v26 = vpop.f32.mrf.mxu0 }
0x1098   :  { %v3898_v29 = vadd.f32 %v5561_v23, %v5137_v8  ;;  %v6236_v8 = vld [vmem:[%s8111_s23 + $0x40] sm:$0xff]  }
0x1099   :  { %v5563_v28 = vpop.f32.mrf.mxu1  ;;  %v5883_v61 = vpop.f32.mrf.mxu0 }
0x109a   :  { %v3938_v63 = vadd.f32 %v3937_v57, %v3898_v29  ;;  %v6235_v57 = vld [vmem:[%s8111_s23 + $0x48] sm:$0xff]  }
0x109c   :  { %v3943_v48 = vmax.f32 %v3938_v63, 0.0 }
0x109e   :  { %3945 = vrot.lane.b32.xlu0 %v3943_v48, %s6367_s2 }
0x1110   :  { %v3946_v20 = vpop.permute.xlu0 %3945 }
0x1111   :  { %v3948_v4 = vsel %vm354_vm6, %v3946_v20, 0.0  ;;  %vm3969_vm6 = vcmp.eq.s32.totalorder %v6894_v38, %v3956_v60  ;;  %v6219_v38 = vld [vmem:[%s8109_s21 + $0x8] sm:$0xff]  }
0x1112   :  { %v3949_v58 = vmax.f32 %v3943_v48, %v3948_v4 }
0x1114   :  { %v3951_v6 = vrot.slane %v3949_v58, 1 }
0x1116   :  { %v3953_v10 = vsel %vm224_vm1, %v3951_v6, 0.0  ;;  %vm3970_vm1 = vcmp.eq.s32.totalorder %v6887_v37, %v3956_v60  ;;  %v6218_v37 = vld [vmem:[%s8109_s21 + $0x10] sm:$0xff]  }
0x1117   :  { %v3954_v11 = vmax.f32 %v3949_v58, %v3953_v10 }
0x1119   :  { %5885 = vmatpush3.msra.mxu1 %v3954_v11  ;;  %v6237_v11 = vld [vmem:[%s8113_s25 + $0x38] sm:$0xff]  }
0x111a   :  { %5887 = vmatmul.mubr.msk.f32.vlgmr.msra.gmra.mxu1 %vm3989_vm2, %v6865_v42  ;;  %5889 = vmatprep.subr.mxu1 %v6370_v31  ;;  %vm3960_vm2 = vcmp.eq.s32.totalorder %v6553_v2, %v3956_v60  ;;  %v6214_v42 = vld [vmem:[%s8109_s21 + $0x30] sm:$0xff]  }
0x111b   :  { %5890 = vmatpush3.msk.msra.mxu1 %vm3972_vm4, %v6371_v39  ;;  %5921 = vmatprep.mubr.msk.f32.mxu1 %vm6374_vm9, %v6370_v31  ;;  %vm3959_vm4 = vcmp.eq.s32.totalorder %v6956_v47, %v3956_v60 }
0x111c   :  { %5891 = vmatprep.subr.mxu1 %v6370_v31  ;;  %4260 = vmatpush1.bf16.msra.mxu0 %v6214_v42  ;;  %v6241_v42 = vld [vmem:[%s8113_s25 + $0x18] sm:$0xff]  }
0x111d   :  { %5892 = vmatpush3.msk.msra.mxu1 %vm3971_vm3, %v6371_v39  ;;  %vm3958_vm3 = vcmp.eq.s32.totalorder %v6993_v22, %v3956_v60  ;;  %4261 = vmatprep.subr.bf16.mxu0 %v6372_v15  ;;  %v6252_v22 = vld [vmem:[%s8115_s27] sm:$0xff]  }
0x111e   :  { %5893 = vmatprep.subr.mxu1 %v6370_v31 }
0x111f   :  { %5894 = vmatpush3.msk.msra.mxu1 %vm3970_vm1, %v6371_v39  ;;  %vm3957_vm1 = vcmp.eq.s32.totalorder %v6550_v1, %v3956_v60 }
0x1120   :  { %5895 = vmatprep.subr.mxu1 %v6370_v31  ;;  %4262 = vmatpush1.bf16.msra.mxu0 %v6215_v32  ;;  %v6242_v32 = vld [vmem:[%s8113_s25 + $0x10] sm:$0xff]  }
0x1121   :  { %5896 = vmatpush3.msk.msra.mxu1 %vm3969_vm6, %v6371_v39  ;;  %4263 = vmatprep.subr.bf16.mxu0 %v6372_v15  ;;  %vm4163_vm6 = vcmask 1042432  }
0x1122   :  { %5897 = vmatprep.subr.mxu1 %v6370_v31 }
0x1123   :  { %5898 = vmatpush3.msk.msra.mxu1 %vm3968_vm11, %v6371_v39  ;;  %vm7918_vm11 = vcmp.eq.s32.totalorder %v4165_v45, 1 }
0x1124   :  { %5899 = vmatprep.subr.mxu1 %v6370_v31  ;;  %4264 = vmatpush1.bf16.msra.mxu0 %v6216_v35  ;;  %v6243_v35 = vld [vmem:[%s8113_s25 + $0x8] sm:$0xff]  }
0x1125   :  { %5900 = vmatpush3.msk.msra.mxu1 %vm3967_vm10, %v6371_v39  ;;  %4265 = vmatprep.subr.bf16.mxu0 %v6372_v15  ;;  %vm7927_vm10 = vcmp.eq.s32.totalorder %v4165_v45, 0 }
0x1126   :  { %5901 = vmatprep.subr.mxu1 %v6370_v31 }
0x1127   :  { %5902 = vmatpush3.msk.msra.mxu1 %vm3966_vm5, %v6371_v39 }
0x1128   :  { %5903 = vmatprep.subr.mxu1 %v6370_v31  ;;  %4266 = vmatpush1.bf16.msra.mxu0 %v6217_v36  ;;  %v6244_v36 = vld [vmem:[%s8113_s25] sm:$0xff]  }
0x1129   :  { %5904 = vmatpush3.msk.msra.mxu1 %vm3965_vm12, %v6371_v39  ;;  %4267 = vmatprep.subr.bf16.mxu0 %v6372_v15 }
0x112a   :  { %5905 = vmatprep.subr.mxu1 %v6370_v31 }
0x112b   :  { %5906 = vmatpush3.msk.msra.mxu1 %vm3964_vm13, %v6371_v39  ;;  %vm4708_vm13 = vcmask 1043456  }
0x112c   :  { %5907 = vmatprep.subr.mxu1 %v6370_v31  ;;  %4268 = vmatpush1.bf16.msra.mxu0 %v6218_v37  ;;  %v6245_v37 = vld [vmem:[%s8113_s25 + $0x58] sm:$0xff]  }
0x112d   :  { %5908 = vmatpush3.msk.msra.mxu1 %vm3963_vm14, %v6371_v39  ;;  %4269 = vmatprep.subr.bf16.mxu0 %v6372_v15  ;;  %vm4704_vm14 = vcmask 31744  }
0x112e   :  { %5909 = vmatprep.subr.mxu1 %v6370_v31 }
0x112f   :  { %5910 = vmatpush3.msk.msra.mxu1 %vm3962_vm15, %v6371_v39 }
0x1130   :  { %5911 = vmatprep.subr.mxu1 %v6370_v31  ;;  %4270 = vmatpush1.bf16.msra.mxu0 %v6219_v38  ;;  %v6246_v38 = vld [vmem:[%s8113_s25 + $0x50] sm:$0xff]  }
0x1131   :  { %5912 = vmatpush3.msk.msra.mxu1 %vm3961_vm8, %v6371_v39  ;;  %4271 = vmatprep.subr.bf16.mxu0 %v6372_v15 }
0x1132   :  { %5913 = vmatprep.subr.mxu1 %v6370_v31 }
0x1133   :  { %5914 = vmatpush3.msk.msra.mxu1 %vm3960_vm2, %v6371_v39 }
0x1134   :  { %5915 = vmatprep.subr.mxu1 %v6370_v31 }
0x1135   :  { %5916 = vmatpush3.msk.msra.mxu1 %vm3959_vm4, %v6371_v39 }
0x1136   :  { %5917 = vmatprep.subr.mxu1 %v6370_v31 }
0x1137   :  { %5918 = vmatpush3.msk.msra.mxu1 %vm3958_vm3, %v6371_v39 }
0x1138   :  { %5919 = vmatprep.subr.mxu1 %v6370_v31 }
0x1139   :  { %5920 = vmatpush3.msk.msra.mxu1 %vm3957_vm1, %v6371_v39  ;;  %v6220_v39 = vld [vmem:[%s8109_s21] sm:$0xff]  }
0x113a   :  { %4419 = vmatprep.subr.bf16.mxu1 %v6372_v15  ;;  %4272 = vmatpush1.bf16.msra.mxu0 %v6220_v39  ;;  %v6247_v39 = vld [vmem:[%s8113_s25 + $0x48] sm:$0xff]  }
0x113b   :  { %4281 = vmatprep.subr.bf16.mxu0 %v6372_v15 }
0x113e   :  { %4282 = vmatpush2.bf16.msra.mxu0 %v6221_v40  ;;  %v6248_v40 = vld [vmem:[%s8113_s25 + $0x40] sm:$0xff]  }
0x113f   :  { %4283 = vmatprep.subr.bf16.mxu0 %v6372_v15 }
0x1142   :  { %4284 = vmatpush2.bf16.msra.mxu0 %v6222_v41  ;;  %v6249_v41 = vld [vmem:[%s8115_s27 + $0x18] sm:$0xff]  }
0x1143   :  { %4285 = vmatprep.subr.bf16.mxu0 %v6372_v15 }
0x1146   :  { %4286 = vmatpush2.bf16.msra.mxu0 %v6223_v43  ;;  %v6250_v43 = vld [vmem:[%s8115_s27 + $0x10] sm:$0xff]  }
0x1147   :  { %4287 = vmatprep.subr.bf16.mxu0 %v6372_v15 }
0x114a   :  { %4288 = vmatpush2.bf16.msra.mxu0 %v6224_v44  ;;  %v5203_v44 = vld [vmem:[%s8112_s24] ss:$0 sm:$0xff] }
0x114b   :  { %4581 = vmatprep.subr.bf16.mxu0 %v6372_v15 }
0x11da   :  { %v4058_v2 = vpop.f32.mrf.mxu1 }
0x11db   :  { %5922 = vmatmul.mubr.f32.vlgmr.msra.gmra.mxu1 %v4058_v2  ;;  %v6238_v2 = vld [vmem:[%s8113_s25 + $0x30] sm:$0xff]  }
0x11dc   :  { %v5888_v3 = vpop.f32.mrf.mxu1  ;;  %4420 = vmatpush1.bf16.msra.mxu1 %v6225_v24 }
0x11dd   :  { %4421 = vmatprep.subr.bf16.mxu1 %v6372_v15  ;;  %v6239_v3 = vld [vmem:[%s8113_s25 + $0x28] sm:$0xff]  }
0x11e0   :  { %4422 = vmatpush1.bf16.msra.mxu1 %v6226_v19 }
0x11e1   :  { %4423 = vmatprep.subr.bf16.mxu1 %v6372_v15 }
0x11e4   :  { %4424 = vmatpush1.bf16.msra.mxu1 %v6227_v33  ;;  %v6251_v33 = vld [vmem:[%s8115_s27 + $0x8] sm:$0xff]   ;;  %s4815_s27 = sshll.u32 %s6377_s26, 4  ;;  %s4816_s27 = int_to_ptr.vmem [resolvable:$true] %s4815_s27 }
0x11e5   :  { %4425 = vmatprep.subr.bf16.mxu1 %v6372_v15  ;;  %s6333_s9 = scalar_lea.vmem %s4816_s27, 32  ;;  %p6338_p7 = scmp.lt.s32.totalorder %s4816_s27, %s4816_s27 }
0x11e6   :  { %p6334_p6 = scmp.ne.s32.totalorder %s4816_s27, %s6333_s9  ;;  %p6339_p8 = scmp.lt.s32.totalorder %s6333_s9, %s6333_s9 }
0x11e8   :  { %4426 = vmatpush1.bf16.msra.mxu1 %v6228_v51  ;;  %p6340_p9 = por %p6339_p8, %p6338_p7 }
0x11e9   :  { %4427 = vmatprep.subr.bf16.mxu1 %v6372_v15 }
0x11ea   :  { %p6341_p10 = pnand %p6340_p9, %p6334_p6 }
0x11ec   :  { %4428 = vmatpush1.bf16.msra.mxu1 %v6229_v25 }
0x11ed   :  { %4429 = vmatprep.subr.bf16.mxu1 %v6372_v15 }
0x11f0   :  { %4430 = vmatpush1.bf16.msra.mxu1 %v6230_v53 }
0x11f1   :  { %4431 = vmatprep.subr.bf16.mxu1 %v6372_v15 }
0x11f4   :  { %4432 = vmatpush1.bf16.msra.mxu1 %v6231_v54 }
0x11f5   :  { %4433 = vmatprep.subr.bf16.mxu1 %v6372_v15 }
0x11f8   :  { %4434 = vmatpush1.bf16.msra.mxu1 %v6232_v27 }
0x11f9   :  { %4443 = vmatprep.subr.bf16.mxu1 %v6372_v15 }
0x11fc   :  { %4444 = vmatpush2.bf16.msra.mxu1 %v6233_v12 }
0x11fd   :  { %4445 = vmatprep.subr.bf16.mxu1 %v6372_v15 }
0x1200   :  { %4446 = vmatpush2.bf16.msra.mxu1 %v6234_v62 }
0x1201   :  { %4447 = vmatprep.subr.bf16.mxu1 %v6372_v15 }
0x1204   :  { %4448 = vmatpush2.bf16.msra.mxu1 %v6235_v57  ;;  %v4699_v57 = vadd.s32 1, %v6550_v1 }
0x1205   :  { %4449 = vmatprep.subr.bf16.mxu1 %v6372_v15 }
0x1208   :  { %4450 = vmatpush2.bf16.msra.mxu1 %v6236_v8  ;;  %v4700_v8 = vmul.u32 2, %v4699_v57 }
0x1209   :  { %5924 = vmatprep.subr.bf16.mxu1 %v6370_v31 }
0x120a   :  { %vm4701_vm5 = vcmp.lt.s32.totalorder %v6852_v9, %v4700_v8 }
0x129b   :  { %v4128_v46 = vpop.f32.mrf.mxu1 }
0x129c   :  { %v4161_v47 = vrot.slane %v4128_v46, 1  ;;  %4170 = vrot.lane.b32.xlu1 %v4128_v46, %s6363_s6  ;;  %v4158_v49 = vrot.slane %v4128_v46, 7 }
0x129d   :  { %v5923_v16 = vpop.f32.mrf.mxu1 }
0x129e   :  { %v4164_v34 = vsel %vm4163_vm6, %v4161_v47, 0.0  ;;  %v4160_v5 = vsel %vm199_vm0, 0.0, %v4158_v49 }
0x129f   :  { %v4169_v56 = vsel %vm7918_vm11, 0.0, %v4164_v34  ;;  %v4167_v14 = vsel %vm7927_vm10, 0.0, %v4160_v5 }
0x12a0   :  { %v4175_v13 = vpack.c.bf16 %v4169_v56, %v4169_v56 }
0x12a2   :  { %5202 = vmatprep.mubr.msk.bf16.mxu0 %vm363_vm7, %v4175_v13 }
0x130e   :  { %v4171_v59 = vpop.permute.xlu1 %4170 }
0x130f   :  { %v4173_v18 = vsel %vm363_vm7, %v4167_v14, %v4171_v59 }
0x1310   :  { %v4174_v21 = vpack.c.bf16 %v4173_v18, %v4173_v18 }
0x1312   :  { %4290 = vmatmul.mubr.bf16.vlgmr.msra.gmra.mxu0 %v4174_v21 }
0x1313   :  { %4582 = vmatpush1.bf16.msra.mxu0 %v6237_v11 }
0x1314   :  { %4583 = vmatprep.subr.bf16.mxu0 %v6372_v15 }
0x1317   :  { %4584 = vmatpush1.bf16.msra.mxu0 %v6238_v2 }
0x1318   :  { %4585 = vmatprep.subr.bf16.mxu0 %v6372_v15 }
0x131b   :  { %4586 = vmatpush1.bf16.msra.mxu0 %v6239_v3 }
0x131c   :  { %4587 = vmatprep.subr.bf16.mxu0 %v6372_v15 }
0x131f   :  { %4588 = vmatpush1.bf16.msra.mxu0 %v6240_v7 }
0x1320   :  { %4589 = vmatprep.subr.bf16.mxu0 %v6372_v15 }
0x1323   :  { %4590 = vmatpush1.bf16.msra.mxu0 %v6241_v42 }
0x1324   :  { %4591 = vmatprep.subr.bf16.mxu0 %v6372_v15 }
0x1327   :  { %4592 = vmatpush1.bf16.msra.mxu0 %v6242_v32 }
0x1328   :  { %4593 = vmatprep.subr.bf16.mxu0 %v6372_v15 }
0x132b   :  { %4594 = vmatpush1.bf16.msra.mxu0 %v6243_v35 }
0x132c   :  { %4595 = vmatprep.subr.bf16.mxu0 %v6372_v15 }
0x132f   :  { %4596 = vmatpush1.bf16.msra.mxu0 %v6244_v36 }
0x1330   :  { %4605 = vmatprep.subr.bf16.mxu0 %v6372_v15 }
0x1333   :  { %4606 = vmatpush2.bf16.msra.mxu0 %v6245_v37 }
0x1334   :  { %4607 = vmatprep.subr.bf16.mxu0 %v6372_v15 }
0x1337   :  { %4608 = vmatpush2.bf16.msra.mxu0 %v6246_v38 }
0x1338   :  { %4609 = vmatprep.subr.bf16.mxu0 %v6372_v15 }
0x133b   :  { %4610 = vmatpush2.bf16.msra.mxu0 %v6247_v39 }
0x133c   :  { %4611 = vmatprep.subr.bf16.mxu0 %v6372_v15 }
0x133f   :  { %4612 = vmatpush2.bf16.msra.mxu0 %v6248_v40 }
0x13d2   :  { %v4291_v0 = vpop.f32.mrf.mxu0 }
0x13d3   :  { %v4292_v23 = vadd.f32 %v5189_v17, %v4291_v0 }
0x13d4   :  { %v4293_v50 = vpop.f32.mrf.mxu0 }
0x13d5   :  { %v4297_v26 = vmax.f32 %v4292_v23, 0.0 }
0x13d6   :  { %v4294_v29 = vpop.f32.mrf.mxu0 }
0x13d7   :  { %v4327_v28 = vrot.slane %v4297_v26, 1  ;;  %4332 = vrot.lane.b32.xlu0 %v4297_v26, %s6363_s6  ;;  %v4324_v20 = vrot.slane %v4297_v26, 7  ;;  %v6376_v29 = vmov 1966171168  }
0x13d8   :  { %v4295_v61 = vpop.f32.mrf.mxu0 }
0x13d9   :  { %v4329_v63 = vsel %vm4163_vm6, %v4327_v28, 0.0  ;;  %v4326_v4 = vsel %vm199_vm0, 0.0, %v4324_v20  ;;  %v4784_v28 = vunpack.c.l.s4 %v6376_v29 }
0x13da   :  { %v4331_v48 = vsel %vm7918_vm11, 0.0, %v4329_v63  ;;  %v4330_v60 = vsel %vm7927_vm10, 0.0, %v4326_v4 }
0x13db   :  { %v4337_v55 = vpack.c.bf16 %v4331_v48, %v4331_v48  ;;  %v4785_v61 = vunpack.c.0.s8 %v4784_v28 }
0x13dd   :  { %5216 = vmatprep.mubr.msk.bf16.mxu1 %vm363_vm7, %v4337_v55  ;;  %v4788_v63 = vsub.s32 %v4785_v61, %v6550_v1 }
0x1449   :  { %v4333_v58 = vpop.permute.xlu0 %4332 }
0x144a   :  { %v4335_v6 = vsel %vm363_vm7, %v4330_v60, %v4333_v58 }
0x144b   :  { %v4336_v10 = vpack.c.bf16 %v4335_v6, %v4335_v6 }
0x144d   :  { %4452 = vmatmul.mubr.bf16.vlgmr.msra.gmra.mxu1 %v4336_v10 }
0x144e   :  { %5932 = vmatprep.mubr.msk.bf16.mxu1 %vm6374_vm9, %v6370_v31  ;;  %5925 = vmatpush3.bf16.msra.mxu1 %v6249_v41 }
0x144f   :  { %5926 = vmatprep.subr.bf16.mxu1 %v6370_v31 }
0x1452   :  { %5927 = vmatpush3.bf16.msra.mxu1 %v6250_v43 }
0x1453   :  { %5928 = vmatprep.subr.bf16.mxu1 %v6370_v31 }
0x1456   :  { %5929 = vmatpush3.bf16.msra.mxu1 %v6251_v33 }
0x1457   :  { %5930 = vmatprep.subr.bf16.mxu1 %v6370_v31 }
0x145a   :  { %5931 = vmatpush3.bf16.msra.mxu1 %v6252_v22 }
0x145b   :  { %5936 = vmatprep.subr.mxu1 %v6370_v31 }
0x150d   :  { %v4453_v15 = vpop.f32.mrf.mxu1 }
0x150e   :  { %v4454_v45 = vadd.f32 %v5203_v44, %v4453_v15 }
0x150f   :  { %v4455_v46 = vpop.f32.mrf.mxu1 }
0x1510   :  { %v4459_v47 = vmax.f32 %v4454_v45, 0.0 }
0x1511   :  { %v4456_v16 = vpop.f32.mrf.mxu1 }
0x1512   :  { %v4489_v34 = vrot.slane %v4459_v47, 1  ;;  %4494 = vrot.lane.b32.xlu1 %v4459_v47, %s6363_s6  ;;  %v4486_v59 = vrot.slane %v4459_v47, 7 }
0x1513   :  { %v4457_v56 = vpop.f32.mrf.mxu1 }
0x1514   :  { %v4491_v13 = vsel %vm4163_vm6, %v4489_v34, 0.0  ;;  %v4488_v14 = vsel %vm199_vm0, 0.0, %v4486_v59  ;;  %vm4698_vm0 = vcmp.ge.s32.totalorder %v6852_v9, %v1161_v30 }
0x1515   :  { %v4493_v49 = vsel %vm7918_vm11, 0.0, %v4491_v13  ;;  %v4492_v21 = vsel %vm7927_vm10, 0.0, %v4488_v14  ;;  %vm4702_vm12 = vmand %vm4698_vm0, %vm4701_vm5 }
0x1516   :  { %v4499_v5 = vpack.c.bf16 %v4493_v49, %v4493_v49  ;;  %v4703_v17 = vsel %vm4702_vm12, 1.0, %v6370_v31 }
0x1518   :  { %5230 = vmatprep.mubr.msk.bf16.mxu0 %vm363_vm7, %v4499_v5 }
0x1584   :  { %v4495_v18 = vpop.permute.xlu1 %4494 }
0x1585   :  { %v4497_v24 = vsel %vm363_vm7, %v4492_v21, %v4495_v18 }
0x1586   :  { %v4498_v19 = vpack.c.bf16 %v4497_v24, %v4497_v24 }
0x1588   :  { %4614 = vmatmul.mubr.bf16.vlgmr.msra.gmra.mxu0 %v4498_v19 }
0x1648   :  { %v4615_v51 = vpop.f32.mrf.mxu0 }
0x1649   :  { %v4616_v25 = vadd.f32 %v5217_v52, %v4615_v51 }
0x164a   :  { %v4617_v53 = vpop.f32.mrf.mxu0 }
0x164b   :  { %v4621_v54 = vmax.f32 %v4616_v25, 0.0 }
0x164c   :  { %v4618_v27 = vpop.f32.mrf.mxu0 }
0x164d   :  { %v4622_v12 = vpack.c.bf16 %v4621_v54, %v4621_v54 }
0x164e   :  { %v4619_v62 = vpop.f32.mrf.mxu0 }
0x164f   :  { %5933 = vmatmul.mubr.msk.bf16.vlgmr.msra.gmra.mxu1 %vm363_vm7, %v4622_v12  ;;  %vm4807_vm7 = vcmask 73728  }
0x1650   :  { %5938 = vmatprep.mubr.msk.f32.mxu1 %vm6374_vm9, %v6370_v31 }
0x170f   :  { %v4692_v0 = vpop.f32.mrf.mxu1 }
0x1710   :  { %5937 = vmatpush3.msk.msra.mxu1 %vm4708_vm13, %v4692_v0 }
0x1711   :  { %v5934_v23 = vpop.f32.mrf.mxu1  ;;  %5939 = vmatmul.mubr.msk.f32.vlgmr.msra.gmra.mxu1 %vm4704_vm14, %v4703_v17 }
0x1713   :  { %v4695_v50 = vpop.f32.mrf.mxu1 }
0x1715   :  { %v5935_v26 = vpop.f32.mrf.mxu1 }
0x17d1   :  { %v4778_v48 = vpop.f32.mrf.mxu1 }
0x17d2   :  { %v4789_v30 = vrot.slane %v4778_v48, %v4788_v63 }
0x17d3   :  { %v5940_v9 = vpop.f32.mrf.mxu1 }
0x17d4   :  { %v4790_v55 = vcombine.high %v4789_v30, %v4789_v30  ;;  %v4797_v31 = vrot.slane %v4789_v30, %v4788_v63 }
0x17d6   :  { %v4804_v20 = vrot.slane %v4790_v55, %v4788_v63  ;;  %4808 = vst.msk [vmem:[#allocation10] sm:$0x1] %vm4807_vm7, %v4797_v31 }
0x17d8   :  { %4809 = vst.msk [vmem:[#allocation10 + $0x1] sm:$0x1] %vm4807_vm7, %v4804_v20 }
0x17d9   :  { %6344 = shalt.err (!%p6341_p10)
}
0x17da   :  { %s6378_s3 = smov 16   ;;  %s6379_s0 = smov 1  }
0x17db   :  { %4821 = dma.vmem_to_hbm [thread:$0]  %s4816_s27, 32, %s8116_s28, [#allocation4], %s6378_s3, %s6378_s3, %s6379_s0  }
0x17dc   :  { %6359 = dma.done.wait [#allocation4], 32  }
0x17dd   :  { %6360 = vsyncadd [#allocation4], 4294967264 }
0x17de   :  { %4825 = vsyncpa [#allocation3], 1 }
0x17df   :  { %4826 = vsyncpa [#allocation6], 1 }
0x17e0   :  { %4827 = vsyncpa [#allocation9], 1 }
0x17e1   :  { %4828 = vsyncpa [#allocation4], 1 }

</bundles_post_ra>
